<compile_context>
chip_gen: v6e
topology: v6e:2x2x1
jax: 0.10.0
libtpu: 0.0.40
codegen_flags: <defaults>
</compile_context>

<pallas_src>
import functools
import math

import jax
import jax.numpy as jnp
from jax.experimental import pallas as pl
from jax.experimental.pallas import tpu as pltpu

# BatchNorm in eval mode with default init (running_mean=0, running_var=1,
# weight=1, bias=0) is a pure scale by 1/sqrt(1+eps); folded into the weights.
_BN_SCALE = 1.0 / math.sqrt(1.0 + 1e-5)


def _round_up(x, m):
    return (x + m - 1) // m * m


def _device_kind():
    try:
        return jax.devices()[0].device_kind.lower()
    except Exception:  # pragma: no cover - defensive
        return ""


# ----------------------------------------------------------------------------
# Pallas kernel: fused MLP1 -> max-pool(nsample) -> MLP2 over one voxel tile.
# Output block is stored channels-first ([n_out, tile]) so the pallas_call
# result is directly the NCW layout the module returns.
# ----------------------------------------------------------------------------
def _sa_kernel(g_ref, w1, b1, w2, b2, w3, b3, w4, b4, w5, b5, out_ref,
               *, bf16_epilogue):
    # g_ref: [nsample, TILE_S, C0p] bf16 block for this (batch, voxel-tile) step.
    ns, tg, c0p = g_ref.shape
    ep = jnp.bfloat16 if bf16_epilogue else jnp.float32

    def conv_bn_relu(x_bf16, w_ref, b_ref):
        # BN scale already folded into w/b; accumulate in f32 on the MXU, then
        # do the bias+ReLU epilogue in bf16 on v6e/v7x (bf16 VALU) / f32 on v5e.
        y = jnp.dot(x_bf16, w_ref[...], preferred_element_type=jnp.float32)
        y = y.astype(ep)
        return jnp.maximum(y + b_ref[...].astype(ep), 0.0)

    def mxu(h):  # ensure bf16 operand for the next matmul (no-op in bf16 mode)
        return h if h.dtype == jnp.bfloat16 else h.astype(jnp.bfloat16)

    # --- MLP1 over every grouped point: [ns*TILE_S, C0p] -> [ns*TILE_S, 256]
    x = g_ref[...].reshape(ns * tg, c0p)                      # bf16
    h = conv_bn_relu(x, w1, b1)
    h = conv_bn_relu(mxu(h), w2, b2)
    h = conv_bn_relu(mxu(h), w3, b3)                          # [ns*tg, 256]

    # --- max-pool over nsample: single leading-axis reduce of a 3D block
    pooled = jnp.max(h.reshape(ns, tg, h.shape[-1]), axis=0)  # [tg, 256]

    # --- MLP2 on pooled voxel features: [TILE_S, 256] -> [TILE_S, 256]
    p = conv_bn_relu(mxu(pooled), w4, b4)
    p = conv_bn_relu(mxu(p), w5, b5)

    # Channels-first store: [n_out, TILE_S] (XLU transpose; lane-dense output).
    out_ref[...] = p.T.astype(out_ref.dtype)


def _pick_tile_s(nsample, c0p, n_out, s, vmem_limit_bytes, is_v7, batch):
    """Pick the voxel-axis tile under a live-VMEM budget (nsample-aware)."""
    budget = int(vmem_limit_bytes * 0.75)           # headroom for compiler scratch
    tile = 128                                      # floor: MXU M-dim fill
    for cand in (1024, 512, 256, 128):
        if nsample * cand > 8192:                   # keep activation rows bounded
            continue
        in_blk = 2 * nsample * cand * c0p * 2       # bf16 input, double-buffered
        out_blk = 2 * n_out * cand * 4              # f32 output, double-buffered
        acts = nsample * cand * (64 + 128 + 2 * 256) * 4   # worst-case f32 live
        weights = 2 * 2 * (c0p * 64 + 64 * 128 + 128 * 256 + 2 * 256 * 256)
        if in_blk + out_blk + acts + weights <= budget:
            tile = cand
            break
    # Never tile wider than the (128-padded) voxel axis itself.
    tile = min(tile, _round_up(max(s, 1), 128))
    # v7x megacore: prefer >=2 grid steps so both TensorCores get work.
    if is_v7:
        while batch * (_round_up(s, tile) // tile) < 2 and tile >= 256:
            tile //= 2
    return tile


def _run_sa_kernel(grouped, params, tile_s, vmem_limit_bytes, bf16_epilogue):
    """grouped: [B, nsample, S_pad, C0p] bf16; params: list of (w bf16, b f32)."""
    batch, ns, s_pad, c0p = grouped.shape
    n_out = params[-1][0].shape[1]
    assert s_pad % tile_s == 0
    grid = (batch, s_pad // tile_s)

    in_specs = [pl.BlockSpec((None, ns, tile_s, c0p), lambda b, s: (b, 0, s, 0))]
    flat_params = []
    for (w, bias) in params:
        # Constant index_map -> fetched once; single-buffering (pl.Buffered(1))
        # would reclaim a few hundred KB more but is left at defaults for
        # portability across jax versions.
        in_specs.append(pl.BlockSpec(w.shape, lambda b, s: (0, 0)))
        in_specs.append(pl.BlockSpec(bias.shape, lambda b, s: (0, 0)))
        flat_params += [w, bias]

    kernel = functools.partial(_sa_kernel, bf16_epilogue=bf16_epilogue)

    return pl.pallas_call(
        kernel,
        out_shape=jax.ShapeDtypeStruct((batch, n_out, s_pad), jnp.float32),
        grid=grid,
        in_specs=in_specs,
        out_specs=pl.BlockSpec((None, n_out, tile_s), lambda b, s: (b, 0, s)),
        compiler_params=pltpu.CompilerParams(
            dimension_semantics=("parallel", "parallel"),   # megacore sharding
            vmem_limit_bytes=vmem_limit_bytes,
        ),
    )(grouped, *flat_params)


# ----------------------------------------------------------------------------
# Plain-JAX glue: voxel centers, voxel query / grouping (no sort)
# ----------------------------------------------------------------------------
def cal_new_xyz(divide):
    x_num, y_num, z_num = divide
    xs = -x_num / 2 + 0.5 + jnp.arange(x_num, dtype=jnp.float32)
    ys = -y_num / 2 + 0.5 + jnp.arange(y_num, dtype=jnp.float32)
    zs = -z_num / 2 + 0.5 + jnp.arange(z_num, dtype=jnp.float32)
    gx, gy, gz = jnp.meshgrid(xs, ys, zs, indexing="ij")
    return jnp.stack([gx.ravel(), gy.ravel(), gz.ravel()], axis=-1)  # [S, 3]


def voxel_group(xyz, feats, new_xyz, nsample, radius):
    """xyz [B,N,3], feats [B,N,D], new_xyz [S,3] -> grouped [B,S,nsample,3+D].

    First `nsample` in-voxel points in original order, padded by repeating the
    first hit. Uses a cumsum compaction + scatter instead of argsort.
    Note: empty voxels fall back to point index 0 (standard query-ball fallback).
    """
    B, N, _ = xyz.shape
    S = new_xyz.shape[0]
    diff = xyz[:, None, :, :] - new_xyz[None, :, None, :]            # [B,S,N,3]
    mask = jnp.all(jnp.abs(diff) <= (0.5 + radius), axis=-1)         # [B,S,N]

    rank = jnp.cumsum(mask.astype(jnp.int32), axis=-1) - 1           # [B,S,N]
    keep = mask & (rank < nsample)
    slot = jnp.where(keep, rank, nsample)                            # extras -> dump slot
    n_ids = jnp.broadcast_to(jnp.arange(N, dtype=jnp.int32), (B, S, N))
    bidx = jnp.arange(B, dtype=jnp.int32)[:, None, None]
    sidx = jnp.arange(S, dtype=jnp.int32)[None, :, None]
    idx = jnp.zeros((B, S, nsample + 1), dtype=jnp.int32)
    idx = idx.at[bidx, sidx, slot].set(n_ids)
    idx = idx[..., :nsample]                                         # [B,S,ns]

    cnt = jnp.sum(mask, axis=-1, keepdims=True)                      # [B,S,1]
    first = idx[..., :1]
    pos = jnp.arange(nsample, dtype=jnp.int32)[None, None, :]
    idx = jnp.where(pos < jnp.maximum(cnt, 1), idx, first)           # pad with first hit

    bfull = jnp.arange(B)[:, None, None]
    g_xyz = xyz[bfull, idx] - new_xyz[None, :, None, :]              # [B,S,ns,3]
    g_feat = feats[bfull, idx]                                       # [B,S,ns,D]
    return jnp.concatenate([g_xyz, g_feat], axis=-1)                 # [B,S,ns,3+D]


# ----------------------------------------------------------------------------
# Parameters (deterministic init — synthetic, not a checkpoint)
# BN(eval, default init) is folded in; first weight padded to C0p rows; bf16.
# ----------------------------------------------------------------------------
def init_params(key, in_channel):
    dims = [(in_channel, 64), (64, 128), (128, 256), (256, 256), (256, 256)]
    c0p = max(8, _round_up(in_channel, 8))
    params = []
    keys = jax.random.split(key, len(dims))
    for li, (k, (cin, cout)) in enumerate(zip(keys, dims)):
        w = jax.random.normal(k, (cin, cout), dtype=jnp.float32) * 0.02
        b = jnp.zeros((1, cout), dtype=jnp.float32)
        w = w * _BN_SCALE                      # fold eval-mode BatchNorm
        b = b * _BN_SCALE
        if li == 0 and cin < c0p:
            w = jnp.pad(w, ((0, c0p - cin), (0, 0)))   # padded input channels are 0
        params.append((w.astype(jnp.bfloat16), b))
    return params


# ----------------------------------------------------------------------------
# Full forward (== get_model.forward)
# ----------------------------------------------------------------------------
def get_model_forward(xyz, search_area, params, divide, nsample, overlap):
    new_xyz = cal_new_xyz(divide)                                    # [S,3]
    radius = overlap / 2.0
    B = xyz.shape[0]
    S = new_xyz.shape[0]

    # TODO(synk): at production shapes the O(B*S*N) voxel query below dominates;
    # moving it into the kernel would need PrefetchScalarGridSpec + per-group
    # DMA gather (indices computed in a tiled pass), left as plain JAX here.
    grouped = voxel_group(xyz, search_area, new_xyz, nsample, radius)  # [B,S,ns,C0]
    C0 = grouped.shape[-1]
    C0p = max(8, _round_up(C0, 8))
    n_out = params[-1][0].shape[1]

    # Generation-aware VMEM budget and tile size.
    kind = _device_kind()
    is_v7 = "v7" in kind
    is_v6_plus = is_v7 or ("v6" in kind)
    if is_v7:
        vmem_limit = 48 * 1024 * 1024          # v7x physical VMEM is only 64 MiB
    elif ("v6" in kind) or ("v5" in kind):
        vmem_limit = 64 * 1024 * 1024          # 128 MiB physical -> plenty of headroom
    else:
        vmem_limit = 32 * 1024 * 1024          # conservative default / interpret
    tile_s = _pick_tile_s(nsample, C0p, n_out, S, vmem_limit, is_v7, B)
    s_pad = _round_up(S, tile_s)

    # Layout: [B, nsample, S_pad, C0p]; cast to bf16 BEFORE transpose/pad so
    # the layout passes and the kernel-input DMA move half the bytes.
    g = grouped.astype(jnp.bfloat16)
    g = jnp.transpose(g, (0, 2, 1, 3))                               # [B, ns, S, C0]
    g = jnp.pad(g, ((0, 0), (0, 0), (0, s_pad - S), (0, C0p - C0)))

    out = _run_sa_kernel(g, params, tile_s, vmem_limit,
                         bf16_epilogue=is_v6_plus)                   # [B, 256, S_pad]
    new_points = out[:, :, :S]                                       # [B, 256, S] (NCW)
    new_xyz_b = jnp.broadcast_to(new_xyz[None, :, :], (B, S, 3))     # [B, S, 3]
    return new_xyz_b, new_points


# ----------------------------------------------------------------------------
if __name__ == "__main__":
    # Small shapes consistent with the module:
    #   divide = (2,2,2) -> S = 8 voxel centers, nsample = 8, overlap = 0.5
    #   in_channel = 6  ( 3 relative-xyz + 3 per-point features )
    B, N, D = 2, 64, 3
    in_channel = 3 + D
    nsample = 8
    overlap = 0.5
    divide = (2, 2, 2)

    key = jax.random.PRNGKey(0)
    k_xyz, k_feat, k_par = jax.random.split(key, 3)
    xyz = jax.random.uniform(k_xyz, (B, N, 3), dtype=jnp.float32,
                             minval=-1.0, maxval=1.0)                 # points in [-1,1]^3
    search_area = jax.random.normal(k_feat, (B, N, D), dtype=jnp.float32)

    params = init_params(k_par, in_channel)

    new_xyz_out, new_points_out = get_model_forward(
        xyz, search_area, params, divide, nsample, overlap)
    jax.block_until_ready(new_points_out)

    S = divide[0] * divide[1] * divide[2]
    assert new_xyz_out.shape == (B, S, 3)
    assert new_points_out.shape == (B, 256, S)
    assert bool(jnp.all(jnp.isfinite(new_points_out)))
    # TODO(synk): exact VoxelSetAbstraction source was not provided; grouping rule
    # (voxel query padded with first hit) follows the standard PointNet++-style impl.
    print("KERNEL_OK")
</pallas_src>

<mosaic_0001>
module attributes {stable_mosaic.version = 11 : i64} {
  func.func @_sa_kernel(%arg0: i32, %arg1: i32, %arg2: memref<1x8x128x8xbf16, #tpu.memory_space<vmem>>, %arg3: memref<8x64xbf16, #tpu.memory_space<vmem>>, %arg4: memref<1x64xf32, #tpu.memory_space<vmem>>, %arg5: memref<64x128xbf16, #tpu.memory_space<vmem>>, %arg6: memref<1x128xf32, #tpu.memory_space<vmem>>, %arg7: memref<128x256xbf16, #tpu.memory_space<vmem>>, %arg8: memref<1x256xf32, #tpu.memory_space<vmem>>, %arg9: memref<256x256xbf16, #tpu.memory_space<vmem>>, %arg10: memref<1x256xf32, #tpu.memory_space<vmem>>, %arg11: memref<256x256xbf16, #tpu.memory_space<vmem>>, %arg12: memref<1x256xf32, #tpu.memory_space<vmem>>, %arg13: memref<1x256x128xf32, #tpu.memory_space<vmem>>) attributes {dimension_semantics = [#tpu.dimension_semantics<parallel>, #tpu.dimension_semantics<parallel>], iteration_bounds = array<i64: 2, 1>, scalar_prefetch = 0 : i64, scratch_operands = 0 : i64, tpu.core_type = #tpu.core_type<tc>, window_params = [{transform_indices = @transform_0, window_bounds = array<i64: 1, 8, 128, 8>}, {pipeline_mode = #tpu.pipeline_mode<synchronous>, transform_indices = @transform_1, window_bounds = array<i64: 8, 64>}, {pipeline_mode = #tpu.pipeline_mode<synchronous>, transform_indices = @transform_2, window_bounds = array<i64: 1, 64>}, {pipeline_mode = #tpu.pipeline_mode<synchronous>, transform_indices = @transform_3, window_bounds = array<i64: 64, 128>}, {pipeline_mode = #tpu.pipeline_mode<synchronous>, transform_indices = @transform_4, window_bounds = array<i64: 1, 128>}, {pipeline_mode = #tpu.pipeline_mode<synchronous>, transform_indices = @transform_5, window_bounds = array<i64: 128, 256>}, {pipeline_mode = #tpu.pipeline_mode<synchronous>, transform_indices = @transform_6, window_bounds = array<i64: 1, 256>}, {pipeline_mode = #tpu.pipeline_mode<synchronous>, transform_indices = @transform_7, window_bounds = array<i64: 256, 256>}, {pipeline_mode = #tpu.pipeline_mode<synchronous>, transform_indices = @transform_8, window_bounds = array<i64: 1, 256>}, {pipeline_mode = #tpu.pipeline_mode<synchronous>, transform_indices = @transform_9, window_bounds = array<i64: 256, 256>}, {pipeline_mode = #tpu.pipeline_mode<synchronous>, transform_indices = @transform_10, window_bounds = array<i64: 1, 256>}, {transform_indices = @transform_11, window_bounds = array<i64: 1, 256, 128>}]} {
    %c0 = arith.constant 0 : index
    %c0_0 = arith.constant 0 : index
    %c0_1 = arith.constant 0 : index
    %c0_2 = arith.constant 0 : index
    %0 = vector.load %arg2[%c0, %c0_0, %c0_1, %c0_2] : memref<1x8x128x8xbf16, #tpu.memory_space<vmem>>, vector<1x8x128x8xbf16>
    %1 = vector.shape_cast %0 : vector<1x8x128x8xbf16> to vector<8x128x8xbf16>
    %2 = vector.shape_cast %1 : vector<8x128x8xbf16> to vector<1024x8xbf16>
    %c0_3 = arith.constant 0 : index
    %c0_4 = arith.constant 0 : index
    %3 = vector.load %arg3[%c0_3, %c0_4] : memref<8x64xbf16, #tpu.memory_space<vmem>>, vector<8x64xbf16>
    %cst = arith.constant dense<0.000000e+00> : vector<1024x64xf32>
    %4 = tpu.matmul %2, %3, %cst {dimension_numbers = #tpu.dot_dimension_numbers<[1], [0], [0], [1], [0, 0, 1, 1], [], []>} : vector<1024x8xbf16>, vector<8x64xbf16>, vector<1024x64xf32> -> vector<1024x64xf32>
    %c0_5 = arith.constant 0 : index
    %c0_6 = arith.constant 0 : index
    %5 = vector.load %arg4[%c0_5, %c0_6] : memref<1x64xf32, #tpu.memory_space<vmem>>, vector<1x64xf32>
    %6 = vector.broadcast %5 : vector<1x64xf32> to vector<1024x64xf32>
    %7 = arith.addf %4, %6 : vector<1024x64xf32>
    %cst_7 = arith.constant 0.000000e+00 : f32
    %8 = vector.broadcast %cst_7 : f32 to vector<1024x64xf32>
    %9 = arith.maximumf %7, %8 : vector<1024x64xf32>
    %10 = arith.truncf %9 : vector<1024x64xf32> to vector<1024x64xbf16>
    %c0_8 = arith.constant 0 : index
    %c0_9 = arith.constant 0 : index
    %11 = vector.load %arg5[%c0_8, %c0_9] : memref<64x128xbf16, #tpu.memory_space<vmem>>, vector<64x128xbf16>
    %cst_10 = arith.constant dense<0.000000e+00> : vector<1024x128xf32>
    %12 = tpu.matmul %10, %11, %cst_10 {dimension_numbers = #tpu.dot_dimension_numbers<[1], [0], [0], [1], [0, 0, 1, 1], [], []>} : vector<1024x64xbf16>, vector<64x128xbf16>, vector<1024x128xf32> -> vector<1024x128xf32>
    %c0_11 = arith.constant 0 : index
    %c0_12 = arith.constant 0 : index
    %13 = vector.load %arg6[%c0_11, %c0_12] : memref<1x128xf32, #tpu.memory_space<vmem>>, vector<1x128xf32>
    %14 = vector.broadcast %13 : vector<1x128xf32> to vector<1024x128xf32>
    %15 = arith.addf %12, %14 : vector<1024x128xf32>
    %cst_13 = arith.constant 0.000000e+00 : f32
    %16 = vector.broadcast %cst_13 : f32 to vector<1024x128xf32>
    %17 = arith.maximumf %15, %16 : vector<1024x128xf32>
    %18 = arith.truncf %17 : vector<1024x128xf32> to vector<1024x128xbf16>
    %c0_14 = arith.constant 0 : index
    %c0_15 = arith.constant 0 : index
    %19 = vector.load %arg7[%c0_14, %c0_15] : memref<128x256xbf16, #tpu.memory_space<vmem>>, vector<128x256xbf16>
    %cst_16 = arith.constant dense<0.000000e+00> : vector<1024x256xf32>
    %20 = tpu.matmul %18, %19, %cst_16 {dimension_numbers = #tpu.dot_dimension_numbers<[1], [0], [0], [1], [0, 0, 1, 1], [], []>} : vector<1024x128xbf16>, vector<128x256xbf16>, vector<1024x256xf32> -> vector<1024x256xf32>
    %c0_17 = arith.constant 0 : index
    %c0_18 = arith.constant 0 : index
    %21 = vector.load %arg8[%c0_17, %c0_18] : memref<1x256xf32, #tpu.memory_space<vmem>>, vector<1x256xf32>
    %22 = vector.broadcast %21 : vector<1x256xf32> to vector<1024x256xf32>
    %23 = arith.addf %20, %22 : vector<1024x256xf32>
    %cst_19 = arith.constant 0.000000e+00 : f32
    %24 = vector.broadcast %cst_19 : f32 to vector<1024x256xf32>
    %25 = arith.maximumf %23, %24 : vector<1024x256xf32>
    %26 = vector.shape_cast %25 : vector<1024x256xf32> to vector<8x128x256xf32>
    %cst_20 = arith.constant dense<0xFF800000> : vector<128x256xf32>
    %27 = vector.multi_reduction <maximumf>, %26, %cst_20 [0] : vector<8x128x256xf32> to vector<128x256xf32>
    %28 = arith.truncf %27 : vector<128x256xf32> to vector<128x256xbf16>
    %c0_21 = arith.constant 0 : index
    %c0_22 = arith.constant 0 : index
    %29 = vector.load %arg9[%c0_21, %c0_22] : memref<256x256xbf16, #tpu.memory_space<vmem>>, vector<256x256xbf16>
    %cst_23 = arith.constant dense<0.000000e+00> : vector<128x256xf32>
    %30 = tpu.matmul %28, %29, %cst_23 {dimension_numbers = #tpu.dot_dimension_numbers<[1], [0], [0], [1], [0, 0, 1, 1], [], []>} : vector<128x256xbf16>, vector<256x256xbf16>, vector<128x256xf32> -> vector<128x256xf32>
    %c0_24 = arith.constant 0 : index
    %c0_25 = arith.constant 0 : index
    %31 = vector.load %arg10[%c0_24, %c0_25] : memref<1x256xf32, #tpu.memory_space<vmem>>, vector<1x256xf32>
    %32 = vector.broadcast %31 : vector<1x256xf32> to vector<128x256xf32>
    %33 = arith.addf %30, %32 : vector<128x256xf32>
    %cst_26 = arith.constant 0.000000e+00 : f32
    %34 = vector.broadcast %cst_26 : f32 to vector<128x256xf32>
    %35 = arith.maximumf %33, %34 : vector<128x256xf32>
    %36 = arith.truncf %35 : vector<128x256xf32> to vector<128x256xbf16>
    %c0_27 = arith.constant 0 : index
    %c0_28 = arith.constant 0 : index
    %37 = vector.load %arg11[%c0_27, %c0_28] : memref<256x256xbf16, #tpu.memory_space<vmem>>, vector<256x256xbf16>
    %cst_29 = arith.constant dense<0.000000e+00> : vector<128x256xf32>
    %38 = tpu.matmul %36, %37, %cst_29 {dimension_numbers = #tpu.dot_dimension_numbers<[1], [0], [0], [1], [0, 0, 1, 1], [], []>} : vector<128x256xbf16>, vector<256x256xbf16>, vector<128x256xf32> -> vector<128x256xf32>
    %c0_30 = arith.constant 0 : index
    %c0_31 = arith.constant 0 : index
    %39 = vector.load %arg12[%c0_30, %c0_31] : memref<1x256xf32, #tpu.memory_space<vmem>>, vector<1x256xf32>
    %40 = vector.broadcast %39 : vector<1x256xf32> to vector<128x256xf32>
    %41 = arith.addf %38, %40 : vector<128x256xf32>
    %cst_32 = arith.constant 0.000000e+00 : f32
    %42 = vector.broadcast %cst_32 : f32 to vector<128x256xf32>
    %43 = arith.maximumf %41, %42 : vector<128x256xf32>
    %44 = tpu.transpose %43, [1, 0] : vector<128x256xf32> -> vector<256x128xf32>
    %c0_33 = arith.constant 0 : index
    %c0_34 = arith.constant 0 : index
    %c0_35 = arith.constant 0 : index
    %45 = vector.load %arg13[%c0_33, %c0_34, %c0_35] : memref<1x256x128xf32, #tpu.memory_space<vmem>>, vector<1x256x128xf32>
    %46 = vector.shape_cast %45 : vector<1x256x128xf32> to vector<256x128xf32>
    %47 = vector.shape_cast %44 : vector<256x128xf32> to vector<1x256x128xf32>
    tpu.vector_store %arg13[%c0_33, %c0_34, %c0_35], %47 {strides = array<i32>} : memref<1x256x128xf32, #tpu.memory_space<vmem>>, vector<1x256x128xf32>,
    return
  }
  func.func @transform_0(%arg0: i32, %arg1: i32) -> (i32, i32, i32, i32) {
    %c0_i32 = arith.constant 0 : i32
    %c0_i32_0 = arith.constant 0 : i32
    %c0_i32_1 = arith.constant 0 : i32
    return %arg0, %c0_i32, %arg1, %c0_i32_0 : i32, i32, i32, i32
  }
  func.func @transform_1(%arg0: i32, %arg1: i32) -> (i32, i32) {
    %c0_i32 = arith.constant 0 : i32
    %c0_i32_0 = arith.constant 0 : i32
    %c0_i32_1 = arith.constant 0 : i32
    return %c0_i32, %c0_i32_0 : i32, i32
  }
  func.func @transform_2(%arg0: i32, %arg1: i32) -> (i32, i32) {
    %c0_i32 = arith.constant 0 : i32
    %c0_i32_0 = arith.constant 0 : i32
    %c0_i32_1 = arith.constant 0 : i32
    return %c0_i32, %c0_i32_0 : i32, i32
  }
  func.func @transform_3(%arg0: i32, %arg1: i32) -> (i32, i32) {
    %c0_i32 = arith.constant 0 : i32
    %c0_i32_0 = arith.constant 0 : i32
    %c0_i32_1 = arith.constant 0 : i32
    return %c0_i32, %c0_i32_0 : i32, i32
  }
  func.func @transform_4(%arg0: i32, %arg1: i32) -> (i32, i32) {
    %c0_i32 = arith.constant 0 : i32
    %c0_i32_0 = arith.constant 0 : i32
    %c0_i32_1 = arith.constant 0 : i32
    return %c0_i32, %c0_i32_0 : i32, i32
  }
  func.func @transform_5(%arg0: i32, %arg1: i32) -> (i32, i32) {
    %c0_i32 = arith.constant 0 : i32
    %c0_i32_0 = arith.constant 0 : i32
    %c0_i32_1 = arith.constant 0 : i32
    return %c0_i32, %c0_i32_0 : i32, i32
  }
  func.func @transform_6(%arg0: i32, %arg1: i32) -> (i32, i32) {
    %c0_i32 = arith.constant 0 : i32
    %c0_i32_0 = arith.constant 0 : i32
    %c0_i32_1 = arith.constant 0 : i32
    return %c0_i32, %c0_i32_0 : i32, i32
  }
  func.func @transform_7(%arg0: i32, %arg1: i32) -> (i32, i32) {
    %c0_i32 = arith.constant 0 : i32
    %c0_i32_0 = arith.constant 0 : i32
    %c0_i32_1 = arith.constant 0 : i32
    return %c0_i32, %c0_i32_0 : i32, i32
  }
  func.func @transform_8(%arg0: i32, %arg1: i32) -> (i32, i32) {
    %c0_i32 = arith.constant 0 : i32
    %c0_i32_0 = arith.constant 0 : i32
    %c0_i32_1 = arith.constant 0 : i32
    return %c0_i32, %c0_i32_0 : i32, i32
  }
  func.func @transform_9(%arg0: i32, %arg1: i32) -> (i32, i32) {
    %c0_i32 = arith.constant 0 : i32
    %c0_i32_0 = arith.constant 0 : i32
    %c0_i32_1 = arith.constant 0 : i32
    return %c0_i32, %c0_i32_0 : i32, i32
  }
  func.func @transform_10(%arg0: i32, %arg1: i32) -> (i32, i32) {
    %c0_i32 = arith.constant 0 : i32
    %c0_i32_0 = arith.constant 0 : i32
    %c0_i32_1 = arith.constant 0 : i32
    return %c0_i32, %c0_i32_0 : i32, i32
  }
  func.func @transform_11(%arg0: i32, %arg1: i32) -> (i32, i32, i32) {
    %c0_i32 = arith.constant 0 : i32
    %c0_i32_0 = arith.constant 0 : i32
    return %arg0, %c0_i32, %arg1 : i32, i32, i32
  }
}

</mosaic_0001>

<bundles_post_ra>
// kernel: tpu_custom_call.1
= control target key start
LH: loop header
LB: loop body
LE: loop exit
PB: predicated region body
PF: predicated region fallthrough
CT: control target
= control target key end

     0   :  { %s8354_s0 = inlined_call_operand.vmem [shape: bf16[2,8,128,8], index: 0, kind: input, shape index: {}]   ;;  %s8355_s1 = inlined_call_operand.vmem [shape: bf16[8,64], index: 1, kind: input, shape index: {}]   ;;  %s8356_s2 = inlined_call_operand.vmem [shape: f32[1,64], index: 2, kind: input, shape index: {}]   ;;  %s8357_s3 = inlined_call_operand.vmem [shape: bf16[64,128], index: 3, kind: input, shape index: {}]   ;;  %s8358_s4 = inlined_call_operand.vmem [shape: f32[1,128], index: 4, kind: input, shape index: {}]   ;;  %s8359_s5 = inlined_call_operand.vmem [shape: bf16[128,256], index: 5, kind: input, shape index: {}]   ;;  %s8360_s6 = inlined_call_operand.vmem [shape: f32[1,256], index: 6, kind: input, shape index: {}]   ;;  %s8361_s7 = inlined_call_operand.vmem [shape: bf16[256,256], index: 7, kind: input, shape index: {}]   ;;  %s8362_s8 = inlined_call_operand.vmem [shape: f32[1,256], index: 8, kind: input, shape index: {}]   ;;  %s8363_s9 = inlined_call_operand.vmem [shape: bf16[256,256], index: 9, kind: input, shape index: {}]   ;;  %s8364_s10 = inlined_call_operand.vmem [shape: f32[1,256], index: 10, kind: input, shape index: {}]   ;;  %s8365_s11 = inlined_call_operand.hbm [shape: f32[2,256,128], index: 11, kind: output, shape index: {}]  }
   0x1   :  { %8366 = sst [smem:[#allocation5_spill]] %s8354_s0 }
   0x2   :  { %8367 = sst [smem:[#allocation6_spill]] %s8355_s1 }
   0x3   :  { %16 = vsyncpa [#allocation3], 0 }
   0x4   :  { %18 = vsyncpa [#allocation3 + $0x1], 0  ;;  %s6042_s17 = smov 0   ;;  %s6044_s18 = smov 0  }
   0x5   :  { %s6046_s19 = smov 0   ;;  %s6048_s20 = smov 0  }
   0x6   :  { %s6050_s21 = smov 0   ;;  %s6052_s22 = smov 0  }
   0x7 LB: > { %s4955_s23 = sadd.s32 4294967295, %s5976_s22   ;;  %s4956_s24 = sadd.s32 4294967294, %s5976_s22   ;;  %s5976_s22 = sphi %s6052_s22, %s24_s22   ;;  %s5972_s21 = sphi %s6050_s21, %s8376_s21   ;;  %s5968_s20 = sphi %s6048_s20, %s8375_s20   ;;  %s5964_s19 = sphi %s6046_s19, %s8374_s19   ;;  %s5960_s18 = sphi %s6044_s18, %s8373_s18   ;;  %s5956_s17 = sphi %s6042_s17, %s8372_s17  }
   0x8   : > { %s36_s25 = sadd.s32 1, %s5972_s21  ;;  %s283_s26 = sadd.s32 1, %s5964_s19 }
   0x9   : > { %p38_p0 = scmp.ge.s32.totalorder %s36_s25, 2  ;;  %p293_p1 = scmp.ne.s32.totalorder %s5964_s19, %s5960_s18 }
   0xa   : > { %p294_p2 = scmp.eq.s32.totalorder %s4955_s23, 1  ;;  %p299_p3 = scmp.ne.s32.totalorder %s5960_s18, %s5956_s17 }
   0xb   : > { %s8378_s25 = smov (%p38_p0, %s36_s25), 0  ;;  %p300_p5 = scmp.eq.s32.totalorder %s4956_s24, 1 }
   0xc   : > { %p6082_p4 = por %p294_p2, %p293_p1  ;;  %s278_s28 = ssub.s32 %s5972_s21, %s8378_s25 }
   0xd   : > { %p4959_p6 = scmp.ge.s32.totalorder %s5976_s22, 1  ;;  %p281_p7 = scmp.eq.s32.totalorder %s278_s28, 0 }
   0xe   : > { %p6089_p8 = por %p300_p5, %p299_p3  ;;  %p361_p9 = scmp.lt.s32.totalorder %s5976_s22, 3 }
   0xf   : > { %s6095_s30 = scalar_select %p281_p7, %s5964_s19, %s283_s26  }
  0x10   : > { %p362_p10 = pnand %p4959_p6, %p361_p9 }
  0x11   : > { %s8370_s1 = sld [smem:[#allocation6_spill]] (!%p362_p10)  ;;  %p406_p11 = scmp.lt.s32.totalorder (!%p362_p10), %s5968_s20, 1 }
  0x12   : > { %365 = sbr.rel (%p362_p10) target bundleno = 1700 (0x6a4), region = 64  ;;  %s8371_s0 = sld [smem:[#allocation5_spill]] (!%p362_p10) }
  0x13   : > { %s402_s12 = sand.u32 (!%p362_p10), 1, %s5960_s18   ;;  %s5247_s15 = sshll.u32 (!%p362_p10), %s5968_s20, 12 }
  0x14   : > { %s4960_s13 = sshll.u32 (!%p362_p10), %s402_s12, 8  ;;  %s8301_s26 = scalar_lea.hbm (!%p362_p10), %s8365_s11, %s5247_s15 }
  0x15   : > { %s8264_s14 = scalar_lea.vmem (!%p362_p10), [#allocation2], %s4960_s13 }
  0x17   : > { %v544_v0 = vld [vmem:[%s8370_s1] sm:$0xf]  ;;  %vm1065_vm0 = vcmask 1043456   ;;  %v5715_v1 = vld [vmem:[%s8357_s3 + $0x18] sm:$0xff]   ;;  %s407_s16 = scalar_select %p406_p11, %s5968_s20, 1  ;;  %vm872_vm1 = vcmask 64512  }
  0x18   : > { %5649 = vmatprep.subr.msk.bf16.mxu0 %vm1065_vm0, %v544_v0  ;;  %v1067_v2 = vsel %vm1065_vm0, %v544_v0, 0  ;;  %5650 = vmatprep.subr.msk.bf16.mxu1 %vm1065_vm0, %v544_v0  ;;  %v5740_v7 = vld [vmem:[%s8357_s3 + $0x10] sm:$0xff]   ;;  %v5753_v12 = vld [vmem:[%s8357_s3 + $0x8] sm:$0xff]   ;;  %v5766_v35 = vld [vmem:[%s8357_s3] sm:$0xff]   ;;  %vm1845_vm2 = vcmask 523264  }
  0x19   : > { %5382 = vmatpush3.bf16.msra.mxu0 %v1067_v2  ;;  %5648 = vmatpush3.bf16.msra.mxu1 %v1067_v2  ;;  %s5246_s23 = sshll.u32 %s407_s16, 9  ;;  %s4877_s16 = sshll.u32 %s8264_s14, 4  ;;  %s8303_s16 = int_to_ptr.vmem [resolvable:$true] %s4877_s16 }
  0x1a   : > { %5511 = vmatprep.subr.bf16.mxu1 %v5715_v1  ;;  %s6108_s28 = scalar_lea.vmem %s8371_s0, %s5246_s23  ;;  %s8309_s0 = scalar_lea.sflag [#allocation3], %s402_s12 }
  0x1b   : > { %v5709_v3 = vld [vmem:[%s6108_s28] sm:$0xff]   ;;  %v5710_v4 = vld [vmem:[%s6108_s28 + $0x8] sm:$0xff]   ;;  %v5711_v5 = vld [vmem:[%s6108_s28 + $0x10] sm:$0xff]   ;;  %s5900_s20 = scalar_lea.vmem %s8303_s16, 4096 }
  0x1c   : > { %5383 = vmatprep.mubr.msk.bf16.mxu0 %vm872_vm1, %v5709_v3  ;;  %v5712_v6 = vld [vmem:[%s6108_s28 + $0x80] sm:$0xff]   ;;  %v5714_v8 = vld [vmem:[%s6108_s28 + $0x88] sm:$0xff]   ;;  %v5713_v9 = vld [vmem:[%s6108_s28 + $0x18] sm:$0xff]   ;;  %p5901_p12 = scmp.ne.s32.totalorder %s8303_s16, %s5900_s20 }
  0x1d   : > { %5384 = vmatmul.mubr.msk.bf16.vlgmr.msra.gmra.mxu0 %vm872_vm1, %v5710_v4  ;;  %5415 = vmatprep.mubr.msk.bf16.mxu1 %vm872_vm1, %v5712_v6  ;;  %v5717_v10 = vld [vmem:[%s6108_s28 + $0x90] sm:$0xff]   ;;  %v5716_v11 = vld [vmem:[%s6108_s28 + $0x20] sm:$0xff]   ;;  %v5719_v13 = vld [vmem:[%s6108_s28 + $0x98] sm:$0xff]  }
  0x1e   : > { %5387 = vmatprep.mubr.msk.bf16.mxu0 %vm872_vm1, %v5711_v5  ;;  %5416 = vmatmul.mubr.msk.bf16.vlgmr.msra.gmra.mxu1 %vm872_vm1, %v5714_v8  ;;  %v5721_v14 = vld [vmem:[%s6108_s28 + $0xa0] sm:$0xff]   ;;  %v5718_v15 = vld [vmem:[%s6108_s28 + $0x28] sm:$0xff]   ;;  %v5720_v16 = vld [vmem:[%s6108_s28 + $0x30] sm:$0xff]   ;;  %p5902_p13 = pnand %p5901_p12, %p6082_p4 }
  0x1f   : > { %5512 = vmatpush3.bf16.msra.mxu1 %v5715_v1  ;;  %5419 = vmatprep.mubr.msk.bf16.mxu1 %vm872_vm1, %v5717_v10  ;;  %v5723_v17 = vld [vmem:[%s6108_s28 + $0xa8] sm:$0xff]   ;;  %v5725_v18 = vld [vmem:[%s6108_s28 + $0xb0] sm:$0xff]   ;;  %v5722_v19 = vld [vmem:[%s6108_s28 + $0x38] sm:$0xff]  }
  0x20   : > { %5513 = vmatprep.subr.bf16.mxu1 %v5740_v7  ;;  %v5724_v20 = vld [vmem:[%s6108_s28 + $0x40] sm:$0xff]   ;;  %v5727_v21 = vld [vmem:[%s6108_s28 + $0xb8] sm:$0xff]   ;;  %v5726_v23 = vld [vmem:[%s6108_s28 + $0x48] sm:$0xff]   ;;  %p5903_p0 = pneg %p5902_p13 }
  0x21   : > { %v5729_v22 = vld [vmem:[%s6108_s28 + $0xc0] sm:$0xff]   ;;  %v5728_v24 = vld [vmem:[%s6108_s28 + $0x50] sm:$0xff]   ;;  %v5731_v25 = vld [vmem:[%s6108_s28 + $0xc8] sm:$0xff]  }
  0x22   : > { %v5733_v26 = vld [vmem:[%s6108_s28 + $0xd0] sm:$0xff]   ;;  %v5730_v27 = vld [vmem:[%s6108_s28 + $0x58] sm:$0xff]   ;;  %v5732_v28 = vld [vmem:[%s6108_s28 + $0x60] sm:$0xff]  }
  0x23   : > { %5514 = vmatpush3.bf16.msra.mxu1 %v5740_v7  ;;  %v5735_v29 = vld [vmem:[%s6108_s28 + $0xd8] sm:$0xff]   ;;  %v5737_v30 = vld [vmem:[%s6108_s28 + $0xe0] sm:$0xff]   ;;  %v5734_v31 = vld [vmem:[%s6108_s28 + $0x68] sm:$0xff]  }
  0x24   : > { %5515 = vmatprep.subr.bf16.mxu1 %v5753_v12  ;;  %v5736_v32 = vld [vmem:[%s6108_s28 + $0x70] sm:$0xff]   ;;  %v5739_v33 = vld [vmem:[%s6108_s28 + $0xe8] sm:$0xff]   ;;  %v5738_v36 = vld [vmem:[%s6108_s28 + $0x78] sm:$0xff]  }
  0x25   : > { %5388 = vmatmul.mubr.msk.bf16.gmra.mxu0 %vm872_vm1, %v5713_v9  ;;  %v5741_v34 = vld [vmem:[%s6108_s28 + $0xf0] sm:$0xff]   ;;  %v5742_v37 = vld [vmem:[%s6108_s28 + $0xf8] sm:$0xff]   ;;  %v5743_v38 = vld [vmem:[%s6108_s28 + $0x100] sm:$0xff]  }
  0x26   : > { %5391 = vmatprep.mubr.msk.bf16.mxu0 %vm872_vm1, %v5716_v11  ;;  %5420 = vmatmul.mubr.msk.bf16.gmra.mxu1 %vm872_vm1, %v5719_v13  ;;  %v5744_v39 = vld [vmem:[%s6108_s28 + $0x108] sm:$0xff]   ;;  %v5745_v40 = vld [vmem:[%s6108_s28 + $0x110] sm:$0xff]   ;;  %v5746_v41 = vld [vmem:[%s6108_s28 + $0x118] sm:$0xff]  }
  0x27   : > { %5423 = vmatprep.mubr.msk.bf16.mxu1 %vm872_vm1, %v5721_v14  ;;  %5516 = vmatpush3.bf16.msra.mxu1 %v5753_v12  ;;  %v5747_v42 = vld [vmem:[%s6108_s28 + $0x120] sm:$0xff]   ;;  %v5748_v43 = vld [vmem:[%s6108_s28 + $0x128] sm:$0xff]   ;;  %v5749_v44 = vld [vmem:[%s6108_s28 + $0x130] sm:$0xff]  }
  0x28   : > { %5517 = vmatprep.subr.bf16.mxu1 %v5766_v35  ;;  %v5750_v45 = vld [vmem:[%s6108_s28 + $0x138] sm:$0xff]   ;;  %v5751_v46 = vld [vmem:[%s6108_s28 + $0x140] sm:$0xff]   ;;  %v5752_v47 = vld [vmem:[%s6108_s28 + $0x148] sm:$0xff]  }
  0x29   : > { %v5754_v48 = vld [vmem:[%s6108_s28 + $0x150] sm:$0xff]   ;;  %v5755_v49 = vld [vmem:[%s6108_s28 + $0x158] sm:$0xff]   ;;  %v5756_v50 = vld [vmem:[%s6108_s28 + $0x160] sm:$0xff]  }
  0x2a   : > { %v5757_v51 = vld [vmem:[%s6108_s28 + $0x168] sm:$0xff]   ;;  %v5758_v52 = vld [vmem:[%s6108_s28 + $0x170] sm:$0xff]   ;;  %v5759_v53 = vld [vmem:[%s6108_s28 + $0x178] sm:$0xff]  }
  0x2b   : > { %5518 = vmatpush3.bf16.msra.mxu1 %v5766_v35  ;;  %v5760_v54 = vld [vmem:[%s6108_s28 + $0x180] sm:$0xff]   ;;  %v5761_v55 = vld [vmem:[%s6108_s28 + $0x188] sm:$0xff]   ;;  %v5762_v56 = vld [vmem:[%s6108_s28 + $0x190] sm:$0xff]  }
  0x2c   : > { %v5763_v57 = vld [vmem:[%s6108_s28 + $0x198] sm:$0xff]   ;;  %v5764_v58 = vld [vmem:[%s6108_s28 + $0x1a0] sm:$0xff]   ;;  %v5765_v59 = vld [vmem:[%s6108_s28 + $0x1a8] sm:$0xff]  }
  0x2d   : > { %5392 = vmatmul.mubr.msk.bf16.gmra.mxu0 %vm872_vm1, %v5718_v15  ;;  %v5767_v60 = vld [vmem:[%s6108_s28 + $0x1b0] sm:$0xff]   ;;  %v5768_v61 = vld [vmem:[%s6108_s28 + $0x1b8] sm:$0xff]   ;;  %v5769_v62 = vld [vmem:[%s6108_s28 + $0x1c0] sm:$0xff]  }
  0x2e   : > { %5395 = vmatprep.mubr.msk.bf16.mxu0 %vm872_vm1, %v5720_v16  ;;  %5424 = vmatmul.mubr.msk.bf16.gmra.mxu1 %vm872_vm1, %v5723_v17  ;;  %v5770_v63 = vld [vmem:[%s6108_s28 + $0x1c8] sm:$0xff]   ;;  %v5771_v0 = vld [vmem:[%s6108_s28 + $0x1d0] sm:$0xff]   ;;  %v5772_v1 = vld [vmem:[%s6108_s28 + $0x1d8] sm:$0xff]  }
  0x2f   : > { %5427 = vmatprep.mubr.msk.bf16.mxu1 %vm872_vm1, %v5725_v18  ;;  %v5773_v2 = vld [vmem:[%s6108_s28 + $0x1e0] sm:$0xff]   ;;  %v5774_v3 = vld [vmem:[%s6108_s28 + $0x1e8] sm:$0xff]   ;;  %v5775_v4 = vld [vmem:[%s6108_s28 + $0x1f0] sm:$0xff]  }
  0x30   : > { %v5776_v5 = vld [vmem:[%s6108_s28 + $0x1f8] sm:$0xff]   ;;  %v6250_v8 = vld [vmem:[%s8356_s2] ss:$0 sm:$0xff]  ;;  %s5979_s28 = smov [#allocation2]  }
  0x31   : > { %s5904_s13 = sshll.u32 %s5979_s28, 4  ;;  %s5905_s13 = int_to_ptr.vmem [resolvable:$false] %s5904_s13 }
  0x32   : > { %s5906_s15 = scalar_lea.vmem %s5905_s13, 8192  ;;  %p5907_p1 = scmp.lt.s32.totalorder %s8303_s16, %s5905_s13 }
  0x33   : > { %p5908_p2 = scmp.lt.s32.totalorder %s5906_s15, %s5900_s20 }
  0x35   : > { %5396 = vmatmul.mubr.msk.bf16.gmra.mxu0 %vm872_vm1, %v5722_v19  ;;  %p5909_p3 = por %p5908_p2, %p5907_p1 }
  0x36   : > { %5399 = vmatprep.mubr.msk.bf16.mxu0 %vm872_vm1, %v5724_v20  ;;  %5428 = vmatmul.mubr.msk.bf16.gmra.mxu1 %vm872_vm1, %v5727_v21 }
  0x37   : > { %5431 = vmatprep.mubr.msk.bf16.mxu1 %vm872_vm1, %v5729_v22  ;;  %p5910_p5 = pnand %p5909_p3, %p5903_p0 }
  0x3d   : > { %5400 = vmatmul.mubr.msk.bf16.gmra.mxu0 %vm872_vm1, %v5726_v23 }
  0x3e   : > { %5403 = vmatprep.mubr.msk.bf16.mxu0 %vm872_vm1, %v5728_v24  ;;  %5432 = vmatmul.mubr.msk.bf16.gmra.mxu1 %vm872_vm1, %v5731_v25 }
  0x3f   : > { %5435 = vmatprep.mubr.msk.bf16.mxu1 %vm872_vm1, %v5733_v26 }
  0x45   : > { %5404 = vmatmul.mubr.msk.bf16.gmra.mxu0 %vm872_vm1, %v5730_v27 }
  0x46   : > { %5407 = vmatprep.mubr.msk.bf16.mxu0 %vm872_vm1, %v5732_v28  ;;  %5436 = vmatmul.mubr.msk.bf16.gmra.mxu1 %vm872_vm1, %v5735_v29 }
  0x47   : > { %5439 = vmatprep.mubr.msk.bf16.mxu1 %vm872_vm1, %v5737_v30 }
  0x4d   : > { %5408 = vmatmul.mubr.msk.bf16.gmra.mxu0 %vm872_vm1, %v5734_v31 }
  0x4e   : > { %5411 = vmatprep.mubr.msk.bf16.mxu0 %vm872_vm1, %v5736_v32  ;;  %5440 = vmatmul.mubr.msk.bf16.gmra.mxu1 %vm872_vm1, %v5739_v33 }
  0x4f   : > { %5443 = vmatprep.mubr.msk.bf16.mxu1 %vm872_vm1, %v5741_v34 }
  0x55   : > { %5412 = vmatmul.mubr.msk.bf16.gmra.mxu0 %vm872_vm1, %v5738_v36 }
  0x56   : > { %5444 = vmatmul.mubr.msk.bf16.gmra.mxu1 %vm872_vm1, %v5742_v37 }
  0x57   : > { %5447 = vmatprep.mubr.msk.bf16.mxu1 %vm872_vm1, %v5743_v38 }
  0x5e   : > { %5448 = vmatmul.mubr.msk.bf16.gmra.mxu1 %vm872_vm1, %v5744_v39 }
  0x5f   : > { %5451 = vmatprep.mubr.msk.bf16.mxu1 %vm872_vm1, %v5745_v40 }
  0x66   : > { %5452 = vmatmul.mubr.msk.bf16.gmra.mxu1 %vm872_vm1, %v5746_v41 }
  0x67   : > { %5455 = vmatprep.mubr.msk.bf16.mxu1 %vm872_vm1, %v5747_v42 }
  0x6e   : > { %5456 = vmatmul.mubr.msk.bf16.gmra.mxu1 %vm872_vm1, %v5748_v43 }
  0x6f   : > { %5459 = vmatprep.mubr.msk.bf16.mxu1 %vm872_vm1, %v5749_v44 }
  0x76   : > { %5460 = vmatmul.mubr.msk.bf16.gmra.mxu1 %vm872_vm1, %v5750_v45 }
  0x77   : > { %5463 = vmatprep.mubr.msk.bf16.mxu1 %vm872_vm1, %v5751_v46 }
  0x7e   : > { %5464 = vmatmul.mubr.msk.bf16.gmra.mxu1 %vm872_vm1, %v5752_v47 }
  0x7f   : > { %5467 = vmatprep.mubr.msk.bf16.mxu1 %vm872_vm1, %v5754_v48 }
  0x86   : > { %5468 = vmatmul.mubr.msk.bf16.gmra.mxu1 %vm872_vm1, %v5755_v49 }
  0x87   : > { %5471 = vmatprep.mubr.msk.bf16.mxu1 %vm872_vm1, %v5756_v50 }
  0x8e   : > { %5472 = vmatmul.mubr.msk.bf16.gmra.mxu1 %vm872_vm1, %v5757_v51 }
  0x8f   : > { %5475 = vmatprep.mubr.msk.bf16.mxu1 %vm872_vm1, %v5758_v52 }
  0x96   : > { %5476 = vmatmul.mubr.msk.bf16.gmra.mxu1 %vm872_vm1, %v5759_v53 }
  0x97   : > { %5479 = vmatprep.mubr.msk.bf16.mxu1 %vm872_vm1, %v5760_v54 }
  0x9e   : > { %5480 = vmatmul.mubr.msk.bf16.gmra.mxu1 %vm872_vm1, %v5761_v55 }
  0x9f   : > { %5483 = vmatprep.mubr.msk.bf16.mxu1 %vm872_vm1, %v5762_v56 }
  0xa6   : > { %5484 = vmatmul.mubr.msk.bf16.gmra.mxu1 %vm872_vm1, %v5763_v57 }
  0xa7   : > { %5487 = vmatprep.mubr.msk.bf16.mxu1 %vm872_vm1, %v5764_v58 }
  0xae   : > { %5488 = vmatmul.mubr.msk.bf16.gmra.mxu1 %vm872_vm1, %v5765_v59  ;;  %v5777_v59 = vld [vmem:[%s8359_s5 + $0x70] ss:$8 sps:$4 sm:$0xff]  }
  0xaf   : > { %5491 = vmatprep.mubr.msk.bf16.mxu1 %vm872_vm1, %v5767_v60  ;;  %v5779_v60 = vld [vmem:[%s8359_s5 + $0x74] ss:$8 sps:$4 sm:$0xff]  }
  0xb0   : > { %2883 = vmatprep.subr.bf16.mxu0 %v5779_v60 }
  0xb1   : > { %2884 = vmatpush1.bf16.msra.mxu0 %v5777_v59 }
  0xb6   : > { %5492 = vmatmul.mubr.msk.bf16.gmra.mxu1 %vm872_vm1, %v5768_v61 }
  0xb7   : > { %5495 = vmatprep.mubr.msk.bf16.mxu1 %vm872_vm1, %v5769_v62 }
  0xbe   : > { %5496 = vmatmul.mubr.msk.bf16.gmra.mxu1 %vm872_vm1, %v5770_v63 }
  0xbf   : > { %5499 = vmatprep.mubr.msk.bf16.mxu1 %vm872_vm1, %v5771_v0 }
  0xc6   : > { %5500 = vmatmul.mubr.msk.bf16.gmra.mxu1 %vm872_vm1, %v5772_v1 }
  0xc7   : > { %5503 = vmatprep.mubr.msk.bf16.mxu1 %vm872_vm1, %v5773_v2 }
  0xce   : > { %5504 = vmatmul.mubr.msk.bf16.gmra.mxu1 %vm872_vm1, %v5774_v3 }
  0xcf   : > { %5507 = vmatprep.mubr.msk.bf16.mxu1 %vm872_vm1, %v5775_v4 }
  0xd6   : > { %5508 = vmatmul.mubr.msk.bf16.gmra.mxu1 %vm872_vm1, %v5776_v5 }
  0xdd   : > { %v5385_v6 = vpop.f32.mrf.mxu0 }
  0xde   : > { %v6252_v10 = vpop.f32.mrf.mxu1  ;;  %v1112_v13 = vadd.f32 %v5385_v6, %v6250_v8 }
  0xdf   : > { %v1103_v7 = vpop.f32.mrf.mxu0 }
  0xe0   : > { %v1104_v11 = vadd.f32 %v6250_v8, %v1103_v7  ;;  %v6257_v15 = vpop.f32.mrf.mxu1  ;;  %v1616_v22 = vmax.f32 %v1112_v13, 0.0 }
  0xe1   : > { %v5386_v9 = vpop.f32.mrf.mxu0 }
  0xe2   : > { %v1115_v12 = vadd.f32 %v5386_v9, %v6250_v8  ;;  %v6260_v19 = vpop.f32.mrf.mxu1  ;;  %v1614_v20 = vmax.f32 %v1104_v11, 0.0 }
  0xe3   : > { %v1106_v14 = vpop.f32.mrf.mxu0 }
  0xe4   : > { %v1107_v16 = vadd.f32 %v6250_v8, %v1106_v14  ;;  %v1617_v17 = vmax.f32 %v1115_v12, 0.0  ;;  %v6263_v25 = vpop.f32.mrf.mxu1 }
  0xe5   : > { %v5389_v18 = vpop.f32.mrf.mxu0 }
  0xe6   : > { %v1615_v21 = vmax.f32 %v1107_v16, 0.0  ;;  %v1128_v23 = vadd.f32 %v5389_v18, %v6250_v8  ;;  %v1743_v28 = vpack.c.bf16 %v1617_v17, %v1616_v22  ;;  %v6266_v30 = vpop.f32.mrf.mxu1  ;;  %v5780_v18 = vld [vmem:[%s8359_s5 + $0x60] ss:$8 sps:$4 sm:$0xff]  }
  0xe7   : > { %v1119_v24 = vpop.f32.mrf.mxu0 }
  0xe8   : > { %v1742_v26 = vpack.c.bf16 %v1615_v21, %v1614_v20  ;;  %v1120_v27 = vadd.f32 %v6250_v8, %v1119_v24  ;;  %v1620_v32 = vmax.f32 %v1128_v23, 0.0  ;;  %v6271_v34 = vpop.f32.mrf.mxu1  ;;  %v5782_v20 = vld [vmem:[%s8359_s5 + $0x64] ss:$8 sps:$4 sm:$0xff]  }
  0xe9   : > { %v5390_v29 = vpop.f32.mrf.mxu0  ;;  %2885 = vmatprep.subr.bf16.mxu0 %v5782_v20 }
  0xea   : > { %v1131_v31 = vadd.f32 %v5390_v29, %v6250_v8  ;;  %5519 = vmatprep.mubr.msk.bf16.mxu1 %vm1845_vm2, %v1742_v26  ;;  %v1618_v35 = vmax.f32 %v1120_v27, 0.0  ;;  %v6274_v39 = vpop.f32.mrf.mxu1  ;;  %2886 = vmatpush1.bf16.msra.mxu0 %v5780_v18 }
  0xeb   : > { %v1122_v33 = vpop.f32.mrf.mxu0  ;;  %5520 = vmatmul.mubr.msk.bf16.vlgmr.msra.gmra.mxu1 %vm1845_vm2, %v1743_v28 }
  0xec   : > { %v1621_v36 = vmax.f32 %v1131_v31, 0.0  ;;  %v1123_v37 = vadd.f32 %v6250_v8, %v1122_v33  ;;  %v6277_v44 = vpop.f32.mrf.mxu1 }
  0xed   : > { %v5393_v38 = vpop.f32.mrf.mxu0 }
  0xee   : > { %v1619_v40 = vmax.f32 %v1123_v37, 0.0  ;;  %v1745_v41 = vpack.c.bf16 %v1621_v36, %v1620_v32  ;;  %v1144_v42 = vadd.f32 %v5393_v38, %v6250_v8  ;;  %v6280_v48 = vpop.f32.mrf.mxu1 }
  0xef   : > { %v1135_v43 = vpop.f32.mrf.mxu0 }
  0xf0   : > { %v1744_v45 = vpack.c.bf16 %v1619_v40, %v1618_v35  ;;  %v1136_v46 = vadd.f32 %v6250_v8, %v1135_v43  ;;  %v1624_v50 = vmax.f32 %v1144_v42, 0.0  ;;  %v6285_v52 = vpop.f32.mrf.mxu1  ;;  %v5783_v43 = vld [vmem:[%s8359_s5 + $0x50] ss:$8 sps:$4 sm:$0xff]  }
  0xf1   : > { %v5394_v47 = vpop.f32.mrf.mxu0 }
  0xf2   : > { %v1147_v49 = vadd.f32 %v5394_v47, %v6250_v8  ;;  %5523 = vmatprep.mubr.msk.bf16.mxu1 %vm1845_vm2, %v1744_v45  ;;  %v1622_v53 = vmax.f32 %v1136_v46, 0.0  ;;  %v6288_v57 = vpop.f32.mrf.mxu1  ;;  %v5785_v45 = vld [vmem:[%s8359_s5 + $0x54] ss:$8 sps:$4 sm:$0xff]  }
  0xf3   : > { %v1138_v51 = vpop.f32.mrf.mxu0  ;;  %5524 = vmatmul.mubr.msk.bf16.gmra.mxu1 %vm1845_vm2, %v1745_v41  ;;  %2887 = vmatprep.subr.bf16.mxu0 %v5785_v45 }
  0xf4   : > { %v1625_v54 = vmax.f32 %v1147_v49, 0.0  ;;  %v1139_v55 = vadd.f32 %v6250_v8, %v1138_v51  ;;  %v6297_v0 = vpop.f32.mrf.mxu1  ;;  %2888 = vmatpush1.bf16.msra.mxu0 %v5783_v43 }
  0xf5   : > { %v5397_v56 = vpop.f32.mrf.mxu0 }
  0xf6   : > { %v1623_v58 = vmax.f32 %v1139_v55, 0.0  ;;  %v1747_v61 = vpack.c.bf16 %v1625_v54, %v1624_v50  ;;  %v1160_v62 = vadd.f32 %v5397_v56, %v6250_v8  ;;  %v6300_v4 = vpop.f32.mrf.mxu1 }
  0xf7   : > { %v1151_v63 = vpop.f32.mrf.mxu0 }
  0xf8   : > { %v1746_v1 = vpack.c.bf16 %v1623_v58, %v1622_v53  ;;  %v1152_v2 = vadd.f32 %v6250_v8, %v1151_v63  ;;  %v1628_v6 = vmax.f32 %v1160_v62, 0.0  ;;  %v6305_v9 = vpop.f32.mrf.mxu1 }
  0xf9   : > { %v5398_v3 = vpop.f32.mrf.mxu0 }
  0xfa   : > { %v1163_v5 = vadd.f32 %v5398_v3, %v6250_v8  ;;  %5527 = vmatprep.mubr.msk.bf16.mxu1 %vm1845_vm2, %v1746_v1  ;;  %v1626_v11 = vmax.f32 %v1152_v2, 0.0  ;;  %v6308_v16 = vpop.f32.mrf.mxu1 }
  0xfb   : > { %v1154_v7 = vpop.f32.mrf.mxu0  ;;  %5528 = vmatmul.mubr.msk.bf16.gmra.mxu1 %vm1845_vm2, %v1747_v61 }
  0xfc   : > { %v1629_v12 = vmax.f32 %v1163_v5, 0.0  ;;  %v1155_v13 = vadd.f32 %v6250_v8, %v1154_v7  ;;  %v6317_v24 = vpop.f32.mrf.mxu1  ;;  %v5786_v5 = vld [vmem:[%s8359_s5 + $0x40] ss:$8 sps:$4 sm:$0xff]  }
  0xfd   : > { %v5401_v14 = vpop.f32.mrf.mxu0 }
  0xfe   : > { %v1627_v17 = vmax.f32 %v1155_v13, 0.0  ;;  %v1749_v21 = vpack.c.bf16 %v1629_v12, %v1628_v6  ;;  %v1176_v22 = vadd.f32 %v5401_v14, %v6250_v8  ;;  %v6320_v29 = vpop.f32.mrf.mxu1  ;;  %v5788_v6 = vld [vmem:[%s8359_s5 + $0x44] ss:$8 sps:$4 sm:$0xff]  }
  0xff   : > { %v1167_v23 = vpop.f32.mrf.mxu0  ;;  %2889 = vmatprep.subr.bf16.mxu0 %v5788_v6 }
 0x100   : > { %v1748_v26 = vpack.c.bf16 %v1627_v17, %v1626_v11  ;;  %v1168_v27 = vadd.f32 %v6250_v8, %v1167_v23  ;;  %v1632_v32 = vmax.f32 %v1176_v22, 0.0  ;;  %v6325_v35 = vpop.f32.mrf.mxu1  ;;  %2890 = vmatpush1.bf16.msra.mxu0 %v5786_v5 }
 0x101   : > { %v5402_v28 = vpop.f32.mrf.mxu0 }
 0x102   : > { %v1179_v31 = vadd.f32 %v5402_v28, %v6250_v8  ;;  %5531 = vmatprep.mubr.msk.bf16.mxu1 %vm1845_vm2, %v1748_v26  ;;  %v1630_v36 = vmax.f32 %v1168_v27, 0.0  ;;  %v6328_v41 = vpop.f32.mrf.mxu1 }
 0x103   : > { %v1170_v33 = vpop.f32.mrf.mxu0  ;;  %5532 = vmatmul.mubr.msk.bf16.gmra.mxu1 %vm1845_vm2, %v1749_v21 }
 0x104   : > { %v1633_v37 = vmax.f32 %v1179_v31, 0.0  ;;  %v1171_v38 = vadd.f32 %v6250_v8, %v1170_v33  ;;  %v6337_v50 = vpop.f32.mrf.mxu1 }
 0x105   : > { %v5405_v40 = vpop.f32.mrf.mxu0 }
 0x106   : > { %v1631_v42 = vmax.f32 %v1171_v38, 0.0  ;;  %v1751_v46 = vpack.c.bf16 %v1633_v37, %v1632_v32  ;;  %v1192_v47 = vadd.f32 %v5405_v40, %v6250_v8  ;;  %v6340_v55 = vpop.f32.mrf.mxu1  ;;  %v5789_v37 = vld [vmem:[%s8359_s5 + $0x30] ss:$8 sps:$4 sm:$0xff]   ;;  %v5791_v38 = vld [vmem:[%s8359_s5 + $0x34] ss:$8 sps:$4 sm:$0xff]  }
 0x107   : > { %v1183_v49 = vpop.f32.mrf.mxu0  ;;  %2891 = vmatprep.subr.bf16.mxu0 %v5791_v38 }
 0x108   : > { %v1750_v51 = vpack.c.bf16 %v1631_v42, %v1630_v36  ;;  %v1184_v53 = vadd.f32 %v6250_v8, %v1183_v49  ;;  %v1636_v58 = vmax.f32 %v1192_v47, 0.0  ;;  %v6345_v60 = vpop.f32.mrf.mxu1  ;;  %v1232_v49 = vadd.f32 %v6250_v8, %v6257_v15  ;;  %2892 = vmatpush1.bf16.msra.mxu0 %v5789_v37 }
 0x109   : > { %v5406_v54 = vpop.f32.mrf.mxu0 }
 0x10a   : > { %v1195_v56 = vadd.f32 %v5406_v54, %v6250_v8  ;;  %5535 = vmatprep.mubr.msk.bf16.mxu1 %vm1845_vm2, %v1750_v51  ;;  %v1634_v61 = vmax.f32 %v1184_v53, 0.0  ;;  %v6348_v2 = vpop.f32.mrf.mxu1  ;;  %v1235_v54 = vadd.f32 %v6250_v8, %v6263_v25  ;;  %v5792_v25 = vld [vmem:[%s8359_s5 + $0x20] ss:$8 sps:$4 sm:$0xff]  }
 0x10b   : > { %v1186_v59 = vpop.f32.mrf.mxu0  ;;  %5536 = vmatmul.mubr.msk.bf16.gmra.mxu1 %vm1845_vm2, %v1751_v46 }
 0x10c   : > { %v1637_v62 = vmax.f32 %v1195_v56, 0.0  ;;  %v1187_v63 = vadd.f32 %v6250_v8, %v1186_v59  ;;  %v6357_v13 = vpop.f32.mrf.mxu1  ;;  %v1647_v5 = vmax.f32 %v1235_v54, 0.0 }
 0x10d   : > { %v5409_v1 = vpop.f32.mrf.mxu0 }
 0x10e   : > { %v1635_v3 = vmax.f32 %v1187_v63, 0.0  ;;  %v1753_v7 = vpack.c.bf16 %v1637_v62, %v1636_v58  ;;  %v1208_v11 = vadd.f32 %v5409_v1, %v6250_v8  ;;  %v6360_v20 = vpop.f32.mrf.mxu1  ;;  %v1646_v1 = vmax.f32 %v1232_v49, 0.0 }
 0x10f   : > { %v1199_v12 = vpop.f32.mrf.mxu0  ;;  %v1267_v49 = vadd.f32 %v6250_v8, %v6297_v0  ;;  %v1275_v0 = vadd.f32 %v6288_v57, %v6250_v8 }
 0x110   : > { %v1752_v14 = vpack.c.bf16 %v1635_v3, %v1634_v61  ;;  %v1200_v17 = vadd.f32 %v6250_v8, %v1199_v12  ;;  %v1640_v22 = vmax.f32 %v1208_v11, 0.0  ;;  %v6365_v26 = vpop.f32.mrf.mxu1 }
 0x111   : > { %v5410_v18 = vpop.f32.mrf.mxu0 }
 0x112   : > { %v1211_v21 = vadd.f32 %v5410_v18, %v6250_v8  ;;  %5539 = vmatprep.mubr.msk.bf16.mxu1 %vm1845_vm2, %v1752_v14  ;;  %v1638_v27 = vmax.f32 %v1200_v17, 0.0  ;;  %v6368_v33 = vpop.f32.mrf.mxu1  ;;  %v1240_v17 = vadd.f32 %v6252_v10, %v6250_v8  ;;  %v1243_v18 = vadd.f32 %v6260_v19, %v6250_v8  ;;  %v5795_v10 = vld [vmem:[%s8359_s5 + $0x10] ss:$8 sps:$4 sm:$0xff]   ;;  %v5797_v19 = vld [vmem:[%s8359_s5 + $0x14] ss:$8 sps:$4 sm:$0xff]  }
 0x113   : > { %v1202_v23 = vpop.f32.mrf.mxu0  ;;  %5540 = vmatmul.mubr.msk.bf16.gmra.mxu1 %vm1845_vm2, %v1753_v7  ;;  %v5794_v7 = vld [vmem:[%s8359_s5 + $0x24] ss:$8 sps:$4 sm:$0xff]  }
 0x114   : > { %v1641_v28 = vmax.f32 %v1211_v21, 0.0  ;;  %v1203_v31 = vadd.f32 %v6250_v8, %v1202_v23  ;;  %v6377_v45 = vpop.f32.mrf.mxu1  ;;  %2893 = vmatprep.subr.bf16.mxu0 %v5794_v7  ;;  %v1248_v23 = vadd.f32 %v6250_v8, %v6271_v34  ;;  %v1648_v34 = vmax.f32 %v1240_v17, 0.0 }
 0x115   : > { %v5413_v32 = vpop.f32.mrf.mxu0  ;;  %2894 = vmatpush1.bf16.msra.mxu0 %v5792_v25  ;;  %v5978_v17 = vmov 0  }
 0x116   : > { %v1639_v36 = vmax.f32 %v1203_v31, 0.0  ;;  %v1755_v40 = vpack.c.bf16 %v1641_v28, %v1640_v22  ;;  %v1224_v42 = vadd.f32 %v5413_v32, %v6250_v8  ;;  %v6382_v53 = vpop.f32.mrf.mxu1  ;;  %v1758_v22 = vpack.c.bf16 %v1647_v5, %v1646_v1  ;;  %2895 = vmatprep.subr.bf16.mxu0 %v5797_v19  ;;  %2915 = vmatprep.mubr.bf16.mxu0 %v5978_v17 }
 0x117   : > { %v1215_v43 = vpop.f32.mrf.mxu0  ;;  %v1649_v31 = vmax.f32 %v1243_v18, 0.0  ;;  %v1280_v1 = vadd.f32 %v6250_v8, %v6305_v9  ;;  %v1283_v5 = vadd.f32 %v6250_v8, %v6317_v24  ;;  %v1657_v9 = vmax.f32 %v1275_v0, 0.0 }
 0x118   : > { %v1754_v46 = vpack.c.bf16 %v1639_v36, %v1638_v27  ;;  %v1216_v47 = vadd.f32 %v6250_v8, %v1215_v43  ;;  %v1644_v58 = vmax.f32 %v1224_v42, 0.0  ;;  %v6389_v61 = vpop.f32.mrf.mxu1  ;;  %v1251_v27 = vadd.f32 %v6250_v8, %v6277_v44 }
 0x119   : > { %v5414_v51 = vpop.f32.mrf.mxu0  ;;  %v1650_v44 = vmax.f32 %v1248_v23, 0.0  ;;  %2896 = vmatpush1.bf16.msra.mxu0 %v5795_v10  ;;  %v1759_v38 = vpack.c.bf16 %v1649_v31, %v1648_v34  ;;  %v1259_v42 = vadd.f32 %v6274_v39, %v6250_v8  ;;  %v1658_v24 = vmax.f32 %v1280_v1, 0.0 }
 0x11a   : > { %v1227_v56 = vadd.f32 %v5414_v51, %v6250_v8  ;;  %5543 = vmatprep.mubr.msk.bf16.mxu1 %vm1845_vm2, %v1754_v46  ;;  %v1642_v62 = vmax.f32 %v1216_v47, 0.0  ;;  %v6392_v3 = vpop.f32.mrf.mxu1  ;;  %v1651_v36 = vmax.f32 %v1251_v27, 0.0  ;;  %v1264_v47 = vadd.f32 %v6250_v8, %v6285_v52 }
 0x11b   : > { %v1218_v59 = vpop.f32.mrf.mxu0  ;;  %5544 = vmatmul.mubr.msk.bf16.gmra.mxu1 %vm1845_vm2, %v1755_v40  ;;  %v1256_v40 = vadd.f32 %v6266_v30, %v6250_v8  ;;  %v1653_v30 = vmax.f32 %v1259_v42, 0.0  ;;  %v1272_v52 = vadd.f32 %v6280_v48, %v6250_v8  ;;  %v5798_v48 = vld [vmem:[%s8359_s5] ss:$8 sps:$4 sm:$0xff]   ;;  %v1291_v23 = vadd.f32 %v6308_v16, %v6250_v8 }
 0x11c   : > { %v1645_v63 = vmax.f32 %v1227_v56, 0.0  ;;  %v1219_v15 = vadd.f32 %v6250_v8, %v1218_v59  ;;  %v6400_v12 = vpop.f32.mrf.mxu1  ;;  %v1760_v46 = vpack.c.bf16 %v1651_v36, %v1650_v44  ;;  %v1654_v39 = vmax.f32 %v1264_v47, 0.0 }
 0x11d   : > { %v1652_v54 = vmax.f32 %v1256_v40, 0.0  ;;  %v1656_v57 = vmax.f32 %v1272_v52, 0.0  ;;  %v1296_v19 = vadd.f32 %v6250_v8, %v6325_v35  ;;  %v1299_v34 = vadd.f32 %v6250_v8, %v6337_v50 }
 0x11e   : > { %v1643_v6 = vmax.f32 %v1219_v15, 0.0  ;;  %v1757_v11 = vpack.c.bf16 %v1645_v63, %v1644_v58  ;;  %v6406_v21 = vpop.f32.mrf.mxu1  ;;  %v1655_v58 = vmax.f32 %v1267_v49, 0.0  ;;  %v1304_v35 = vadd.f32 %v6320_v29, %v6250_v8 }
 0x11f   : > { %v1763_v18 = vpack.c.bf16 %v1657_v9, %v1656_v57  ;;  %v1662_v16 = vmax.f32 %v1296_v19, 0.0  ;;  %v1307_v50 = vadd.f32 %v6328_v41, %v6250_v8  ;;  %v1312_v49 = vadd.f32 %v6250_v8, %v6345_v60 }
 0x120   : > { %v1756_v14 = vpack.c.bf16 %v1643_v6, %v1642_v62  ;;  %v6414_v28 = vpop.f32.mrf.mxu1  ;;  %v1761_v62 = vpack.c.bf16 %v1653_v30, %v1652_v54  ;;  %v1762_v15 = vpack.c.bf16 %v1655_v58, %v1654_v39  ;;  %v5800_v6 = vld [vmem:[%s8359_s5 + $0x4] ss:$8 sps:$4 sm:$0xff]   ;;  %v1315_v54 = vadd.f32 %v6250_v8, %v6357_v13 }
 0x121   : > { %2897 = vmatprep.subr.bf16.mxu0 %v5800_v6  ;;  %v1664_v39 = vmax.f32 %v1304_v35, 0.0  ;;  %v1665_v29 = vmax.f32 %v1307_v50, 0.0  ;;  %v1666_v41 = vmax.f32 %v1312_v49, 0.0  ;;  %v1320_v60 = vadd.f32 %v6340_v55, %v6250_v8 }
 0x122   : > { %5547 = vmatprep.mubr.msk.bf16.mxu1 %vm1845_vm2, %v1756_v14  ;;  %v6423_v32 = vpop.f32.mrf.mxu1  ;;  %2898 = vmatpush1.bf16.msra.mxu0 %v5798_v48  ;;  %v1323_v13 = vadd.f32 %v6348_v2, %v6250_v8  ;;  %v1331_v6 = vadd.f32 %v6250_v8, %v6377_v45  ;;  %v1339_v45 = vadd.f32 %v6368_v33, %v6250_v8 }
 0x123   : > { %5548 = vmatmul.mubr.msk.bf16.gmra.mxu1 %vm1845_vm2, %v1757_v11  ;;  %v1659_v11 = vmax.f32 %v1283_v5, 0.0  ;;  %v1767_v0 = vpack.c.bf16 %v1665_v29, %v1664_v39  ;;  %v1328_v5 = vadd.f32 %v6250_v8, %v6365_v26  ;;  %v1668_v57 = vmax.f32 %v1320_v60, 0.0 }
 0x124   : > { %5551 = vmatprep.mubr.msk.bf16.mxu1 %vm1845_vm2, %v1758_v22  ;;  %v6425_v37 = vpop.f32.mrf.mxu1  ;;  %v1288_v22 = vadd.f32 %v6300_v4, %v6250_v8  ;;  %v1661_v4 = vmax.f32 %v1291_v23, 0.0  ;;  %v1669_v55 = vmax.f32 %v1323_v13, 0.0  ;;  %v1336_v26 = vadd.f32 %v6360_v20, %v6250_v8 }
 0x125   : > { %v1764_v10 = vpack.c.bf16 %v1659_v11, %v1658_v24  ;;  %v1670_v2 = vmax.f32 %v1328_v5, 0.0  ;;  %v1671_v24 = vmax.f32 %v1331_v6, 0.0  ;;  %v1347_v19 = vadd.f32 %v6250_v8, %v6400_v12 }
 0x126   : > { %v6431_v43 = vpop.f32.mrf.mxu1  ;;  %v1660_v44 = vmax.f32 %v1288_v22, 0.0  ;;  %v1673_v20 = vmax.f32 %v1339_v45, 0.0  ;;  %v1355_v12 = vadd.f32 %v6392_v3, %v6250_v8  ;;  %v1363_v49 = vadd.f32 %v6250_v8, %v6425_v37 }
 0x127   : > { %v1770_v23 = vpack.c.bf16 %v1671_v24, %v1670_v2  ;;  %v1371_v37 = vadd.f32 %v6423_v32, %v6250_v8 }
 0x128   : > { %v6438_v51 = vpop.f32.mrf.mxu1  ;;  %v1765_v42 = vpack.c.bf16 %v1661_v4, %v1660_v44  ;;  %v1672_v44 = vmax.f32 %v1336_v26, 0.0 }
 0x12a   : > { %v6441_v56 = vpop.f32.mrf.mxu1 }
 0x12b   : > { %5552 = vmatmul.mubr.msk.bf16.gmra.mxu1 %vm1845_vm2, %v1759_v38  ;;  %v1663_v38 = vmax.f32 %v1299_v34, 0.0 }
 0x12c   : > { %5555 = vmatprep.mubr.msk.bf16.mxu1 %vm1845_vm2, %v1760_v46  ;;  %v6443_v59 = vpop.f32.mrf.mxu1 }
 0x12d   : > { %v1766_v47 = vpack.c.bf16 %v1663_v38, %v1662_v16  ;;  %v1675_v16 = vmax.f32 %v1347_v19, 0.0  ;;  %v1379_v5 = vadd.f32 %v6250_v8, %v6443_v59  ;;  %v1387_v59 = vadd.f32 %v6441_v56, %v6250_v8 }
 0x12e   : > { %v6449_v63 = vpop.f32.mrf.mxu1 }
 0x12f   : > { %v1683_v2 = vmax.f32 %v1379_v5, 0.0 }
 0x130   : > { %v6459_v25 = vpop.f32.mrf.mxu1 }
 0x132   : > { %v6465_v7 = vpop.f32.mrf.mxu1 }
 0x133   : > { %5556 = vmatmul.mubr.msk.bf16.gmra.mxu1 %vm1845_vm2, %v1761_v62  ;;  %v1667_v62 = vmax.f32 %v1315_v54, 0.0 }
 0x134   : > { %5559 = vmatprep.mubr.msk.bf16.mxu1 %vm1845_vm2, %v1762_v15  ;;  %v6467_v14 = vpop.f32.mrf.mxu1 }
 0x135   : > { %v1768_v1 = vpack.c.bf16 %v1667_v62, %v1666_v41  ;;  %v1679_v41 = vmax.f32 %v1363_v49, 0.0 }
 0x136   : > { %v6474_v27 = vpop.f32.mrf.mxu1 }
 0x138   : > { %v6481_v31 = vpop.f32.mrf.mxu1 }
 0x13a   : > { %v6484_v36 = vpop.f32.mrf.mxu1 }
 0x13b   : > { %5560 = vmatmul.mubr.msk.bf16.gmra.mxu1 %vm1845_vm2, %v1763_v18  ;;  %v1769_v18 = vpack.c.bf16 %v1669_v55, %v1668_v57 }
 0x13c   : > { %5563 = vmatprep.mubr.msk.bf16.mxu1 %vm1845_vm2, %v1764_v10  ;;  %v6486_v40 = vpop.f32.mrf.mxu1  ;;  %v1344_v10 = vadd.f32 %v6250_v8, %v6389_v61  ;;  %v1352_v61 = vadd.f32 %v6382_v53, %v6250_v8  ;;  %v1677_v53 = vmax.f32 %v1355_v12, 0.0 }
 0x13e   : > { %v6492_v46 = vpop.f32.mrf.mxu1  ;;  %v1674_v33 = vmax.f32 %v1344_v10, 0.0  ;;  %v1676_v39 = vmax.f32 %v1352_v61, 0.0  ;;  %v1395_v10 = vadd.f32 %v6250_v8, %v6467_v14  ;;  %v1403_v14 = vadd.f32 %v6465_v7, %v6250_v8 }
 0x140   : > { %v6499_v30 = vpop.f32.mrf.mxu1  ;;  %v1772_v50 = vpack.c.bf16 %v1675_v16, %v1674_v33  ;;  %v1687_v33 = vmax.f32 %v1395_v10, 0.0 }
 0x142   : > { %v6502_v58 = vpop.f32.mrf.mxu1 }
 0x143   : > { %5564 = vmatmul.mubr.msk.bf16.gmra.mxu1 %vm1845_vm2, %v1765_v42  ;;  %v1771_v42 = vpack.c.bf16 %v1673_v20, %v1672_v44 }
 0x144   : > { %5567 = vmatprep.mubr.msk.bf16.mxu1 %vm1845_vm2, %v1766_v47  ;;  %v6504_v52 = vpop.f32.mrf.mxu1  ;;  %v1360_v47 = vadd.f32 %v6250_v8, %v6414_v28  ;;  %v1368_v28 = vadd.f32 %v6406_v21, %v6250_v8  ;;  %v1681_v21 = vmax.f32 %v1371_v37, 0.0 }
 0x146   : > { %v6510_v15 = vpop.f32.mrf.mxu1  ;;  %v1678_v3 = vmax.f32 %v1360_v47, 0.0  ;;  %v1680_v57 = vmax.f32 %v1368_v28, 0.0  ;;  %v1411_v47 = vadd.f32 %v6250_v8, %v6486_v40  ;;  %v1419_v40 = vadd.f32 %v6484_v36, %v6250_v8 }
 0x148   : > { %v6517_v48 = vpop.f32.mrf.mxu1  ;;  %v1774_v13 = vpack.c.bf16 %v1679_v41, %v1678_v3  ;;  %v1691_v3 = vmax.f32 %v1411_v47, 0.0 }
 0x14a   : > { %v6520_v9 = vpop.f32.mrf.mxu1 }
 0x14b   : > { %5568 = vmatmul.mubr.msk.bf16.gmra.mxu1 %vm1845_vm2, %v1767_v0  ;;  %v1773_v0 = vpack.c.bf16 %v1677_v53, %v1676_v39 }
 0x14c   : > { %5571 = vmatprep.mubr.msk.bf16.mxu1 %vm1845_vm2, %v1768_v1  ;;  %v6522_v11 = vpop.f32.mrf.mxu1  ;;  %v1376_v1 = vadd.f32 %v6250_v8, %v6438_v51  ;;  %v1384_v51 = vadd.f32 %v6431_v43, %v6250_v8  ;;  %v1685_v43 = vmax.f32 %v1387_v59, 0.0 }
 0x14e   : > { %v6528_v22 = vpop.f32.mrf.mxu1  ;;  %v1682_v32 = vmax.f32 %v1376_v1, 0.0  ;;  %v1684_v44 = vmax.f32 %v1384_v51, 0.0  ;;  %v1427_v1 = vadd.f32 %v6250_v8, %v6504_v52  ;;  %v1435_v52 = vadd.f32 %v6502_v58, %v6250_v8 }
 0x150   : > { %v6535_v34 = vpop.f32.mrf.mxu1  ;;  %v1776_v45 = vpack.c.bf16 %v1683_v2, %v1682_v32  ;;  %v1695_v32 = vmax.f32 %v1427_v1, 0.0 }
 0x152   : > { %v6538_v4 = vpop.f32.mrf.mxu1 }
 0x153   : > { %5572 = vmatmul.mubr.msk.bf16.gmra.mxu1 %vm1845_vm2, %v1769_v18  ;;  %v1775_v18 = vpack.c.bf16 %v1681_v21, %v1680_v57 }
 0x154   : > { %5575 = vmatprep.mubr.msk.bf16.mxu1 %vm1845_vm2, %v1770_v23  ;;  %v6540_v38 = vpop.f32.mrf.mxu1  ;;  %v1392_v23 = vadd.f32 %v6250_v8, %v6459_v25  ;;  %v1400_v25 = vadd.f32 %v6449_v63, %v6250_v8  ;;  %v1689_v63 = vmax.f32 %v1403_v14, 0.0 }
 0x156   : > { %v6546_v35 = vpop.f32.mrf.mxu1  ;;  %v1686_v56 = vmax.f32 %v1392_v23, 0.0  ;;  %v1688_v39 = vmax.f32 %v1400_v25, 0.0  ;;  %v1443_v23 = vadd.f32 %v6250_v8, %v6522_v11  ;;  %v1451_v11 = vadd.f32 %v6520_v9, %v6250_v8 }
 0x158   : > { %v6553_v54 = vpop.f32.mrf.mxu1  ;;  %v1778_v12 = vpack.c.bf16 %v1687_v33, %v1686_v56  ;;  %v1699_v56 = vmax.f32 %v1443_v23, 0.0 }
 0x15a   : > { %v6556_v29 = vpop.f32.mrf.mxu1 }
 0x15b   : > { %5576 = vmatmul.mubr.msk.bf16.gmra.mxu1 %vm1845_vm2, %v1771_v42  ;;  %v1777_v42 = vpack.c.bf16 %v1685_v43, %v1684_v44 }
 0x15c   : > { %5579 = vmatprep.mubr.msk.bf16.mxu1 %vm1845_vm2, %v1772_v50  ;;  %v6558_v62 = vpop.f32.mrf.mxu1  ;;  %v1408_v50 = vadd.f32 %v6250_v8, %v6481_v31  ;;  %v1416_v31 = vadd.f32 %v6474_v27, %v6250_v8  ;;  %v1693_v27 = vmax.f32 %v1419_v40, 0.0 }
 0x15e   : > { %v6564_v60 = vpop.f32.mrf.mxu1  ;;  %v1690_v7 = vmax.f32 %v1408_v50, 0.0  ;;  %v1692_v57 = vmax.f32 %v1416_v31, 0.0  ;;  %v1459_v50 = vadd.f32 %v6250_v8, %v6540_v38  ;;  %v1467_v38 = vadd.f32 %v6538_v4, %v6250_v8 }
 0x160   : > { %v6571_v6 = vpop.f32.mrf.mxu1  ;;  %v1780_v37 = vpack.c.bf16 %v1691_v3, %v1690_v7  ;;  %v1703_v7 = vmax.f32 %v1459_v50, 0.0 }
 0x162   : > { %v6574_v55 = vpop.f32.mrf.mxu1 }
 0x163   : > { %5580 = vmatmul.mubr.msk.bf16.gmra.mxu1 %vm1845_vm2, %v1773_v0  ;;  %v1779_v0 = vpack.c.bf16 %v1689_v63, %v1688_v39 }
 0x164   : > { %5583 = vmatprep.mubr.msk.bf16.mxu1 %vm1845_vm2, %v1774_v13  ;;  %v6576_v24 = vpop.f32.mrf.mxu1  ;;  %v1424_v13 = vadd.f32 %v6250_v8, %v6499_v30  ;;  %v1432_v30 = vadd.f32 %v6492_v46, %v6250_v8  ;;  %v1697_v46 = vmax.f32 %v1435_v52, 0.0  ;;  %v1488_v52 = vadd.f32 %v6250_v8, %v6571_v6 }
 0x165   : > { %v1499_v6 = vadd.f32 %v6574_v55, %v6250_v8 }
 0x166   : > { %v6582_v26 = vpop.f32.mrf.mxu1  ;;  %v1694_v36 = vmax.f32 %v1424_v13, 0.0  ;;  %v1696_v44 = vmax.f32 %v1432_v30, 0.0  ;;  %v1475_v13 = vadd.f32 %v6250_v8, %v6558_v62 }
 0x168   : > { %v6589_v19 = vpop.f32.mrf.mxu1  ;;  %v1782_v59 = vpack.c.bf16 %v1695_v32, %v1694_v36  ;;  %v1707_v36 = vmax.f32 %v1475_v13, 0.0 }
 0x16a   : > { %v6592_v20 = vpop.f32.mrf.mxu1 }
 0x16b   : > { %5584 = vmatmul.mubr.msk.bf16.gmra.mxu1 %vm1845_vm2, %v1775_v18  ;;  %v1781_v18 = vpack.c.bf16 %v1693_v27, %v1692_v57 }
 0x16c   : > { %5587 = vmatprep.mubr.msk.bf16.mxu1 %vm1845_vm2, %v1776_v45  ;;  %v6594_v16 = vpop.f32.mrf.mxu1  ;;  %v1440_v45 = vadd.f32 %v6250_v8, %v6517_v48  ;;  %v1448_v48 = vadd.f32 %v6510_v15, %v6250_v8  ;;  %v1701_v15 = vmax.f32 %v1451_v11, 0.0 }
 0x16e   : > { %v6600_v61 = vpop.f32.mrf.mxu1  ;;  %v1698_v58 = vmax.f32 %v1440_v45, 0.0  ;;  %v1700_v39 = vmax.f32 %v1448_v48, 0.0  ;;  %v1507_v48 = vadd.f32 %v6250_v8, %v6594_v16 }
 0x170   : > { %v6607_v49 = vpop.f32.mrf.mxu1  ;;  %v1784_v14 = vpack.c.bf16 %v1699_v56, %v1698_v58  ;;  %v1496_v58 = vadd.f32 %v6564_v60, %v6250_v8  ;;  %v1715_v50 = vmax.f32 %v1507_v48, 0.0 }
 0x172   : > { %v6610_v53 = vpop.f32.mrf.mxu1  ;;  %v1712_v11 = vmax.f32 %v1496_v58, 0.0 }
 0x173   : > { %5588 = vmatmul.mubr.msk.bf16.gmra.mxu1 %vm1845_vm2, %v1777_v42  ;;  %v1783_v42 = vpack.c.bf16 %v1697_v46, %v1696_v44 }
 0x174   : > { %5591 = vmatprep.mubr.msk.bf16.mxu1 %vm1845_vm2, %v1778_v12  ;;  %v6612_v41 = vpop.f32.mrf.mxu1  ;;  %v1456_v12 = vadd.f32 %v6250_v8, %v6535_v34  ;;  %v1464_v34 = vadd.f32 %v6528_v22, %v6250_v8  ;;  %v1705_v22 = vmax.f32 %v1467_v38, 0.0 }
 0x176   : > { %v6618_v28 = vpop.f32.mrf.mxu1  ;;  %v1702_v9 = vmax.f32 %v1456_v12, 0.0  ;;  %v1704_v57 = vmax.f32 %v1464_v34, 0.0 }
 0x178   : > { %v6625_v5 = vpop.f32.mrf.mxu1  ;;  %v1786_v40 = vpack.c.bf16 %v1703_v7, %v1702_v9  ;;  %v1787_v32 = vpack.c.bf16 %v1705_v22, %v1704_v57  ;;  %v1520_v9 = vadd.f32 %v6250_v8, %v6607_v49  ;;  %v1523_v7 = vadd.f32 %v6250_v8, %v6612_v41 }
 0x179   : > { %v1528_v41 = vadd.f32 %v6600_v61, %v6250_v8  ;;  %v1531_v22 = vadd.f32 %v6610_v53, %v6250_v8 }
 0x17a   : > { %v6628_v21 = vpop.f32.mrf.mxu1 }
 0x17b   : > { %5592 = vmatmul.mubr.msk.bf16.gmra.mxu1 %vm1845_vm2, %v1779_v0  ;;  %v1785_v0 = vpack.c.bf16 %v1701_v15, %v1700_v39  ;;  %v1512_v39 = vadd.f32 %v6582_v26, %v6250_v8  ;;  %v1720_v61 = vmax.f32 %v1528_v41, 0.0 }
 0x17c   : > { %5595 = vmatprep.mubr.msk.bf16.mxu1 %vm1845_vm2, %v1780_v37  ;;  %v6630_v2 = vpop.f32.mrf.mxu1  ;;  %v1472_v37 = vadd.f32 %v6250_v8, %v6553_v54  ;;  %v1483_v54 = vadd.f32 %v6556_v29, %v6250_v8 }
 0x17d   : > { %v1716_v34 = vmax.f32 %v1512_v39, 0.0 }
 0x17e   : > { %v6636_v51 = vpop.f32.mrf.mxu1  ;;  %v1706_v4 = vmax.f32 %v1472_v37, 0.0  ;;  %v1709_v23 = vmax.f32 %v1483_v54, 0.0  ;;  %v1719_v37 = vmax.f32 %v1523_v7, 0.0 }
 0x180   : > { %v6643_v10 = vpop.f32.mrf.mxu1  ;;  %v1788_v30 = vpack.c.bf16 %v1707_v36, %v1706_v4 }
 0x181   : > { %v1552_v48 = vadd.f32 %v6250_v8, %v6643_v10 }
 0x182   : > { %v6646_v43 = vpop.f32.mrf.mxu1 }
 0x183   : > { %5596 = vmatmul.mubr.msk.bf16.gmra.mxu1 %vm1845_vm2, %v1781_v18  ;;  %v1480_v18 = vadd.f32 %v6546_v35, %v6250_v8  ;;  %v1710_v35 = vmax.f32 %v1488_v52, 0.0  ;;  %v1726_v39 = vmax.f32 %v1552_v48, 0.0 }
 0x184   : > { %5599 = vmatprep.mubr.msk.bf16.mxu1 %vm1845_vm2, %v1782_v59  ;;  %v6648_v33 = vpop.f32.mrf.mxu1  ;;  %v1491_v59 = vadd.f32 %v6250_v8, %v6576_v24 }
 0x185   : > { %v1708_v45 = vmax.f32 %v1480_v18, 0.0  ;;  %v1539_v18 = vadd.f32 %v6250_v8, %v6630_v2 }
 0x186   : > { %v6654_v25 = vpop.f32.mrf.mxu1  ;;  %v1711_v46 = vmax.f32 %v1491_v59, 0.0 }
 0x187   : > { %v1789_v29 = vpack.c.bf16 %v1709_v23, %v1708_v45  ;;  %v1721_v45 = vmax.f32 %v1531_v22, 0.0 }
 0x188   : > { %v6661_v47 = vpop.f32.mrf.mxu1  ;;  %v1790_v24 = vpack.c.bf16 %v1711_v46, %v1710_v35  ;;  %v1723_v35 = vmax.f32 %v1539_v18, 0.0 }
 0x189   : > { %v1795_v58 = vpack.c.bf16 %v1721_v45, %v1720_v61 }
 0x18a   : > { %v6664_v63 = vpop.f32.mrf.mxu1 }
 0x18b   : > { %5600 = vmatmul.mubr.msk.bf16.gmra.mxu1 %vm1845_vm2, %v1783_v42  ;;  %v1504_v42 = vadd.f32 %v6250_v8, %v6589_v19  ;;  %v1515_v19 = vadd.f32 %v6592_v20, %v6250_v8  ;;  %v6727_v20 = vld [vmem:[%s8358_s4] ss:$0 sm:$0xff] }
 0x18c   : > { %5603 = vmatprep.mubr.msk.bf16.mxu1 %vm1845_vm2, %v1784_v14  ;;  %v6666_v3 = vpop.f32.mrf.mxu1  ;;  %v1713_v14 = vmax.f32 %v1499_v6, 0.0  ;;  %v1544_v6 = vadd.f32 %v6618_v28, %v6250_v8 }
 0x18d   : > { %v1714_v60 = vmax.f32 %v1504_v42, 0.0  ;;  %v1717_v38 = vmax.f32 %v1515_v19, 0.0 }
 0x18e   : > { %v6672_v31 = vpop.f32.mrf.mxu1  ;;  %v1791_v55 = vpack.c.bf16 %v1713_v14, %v1712_v11  ;;  %v1555_v11 = vadd.f32 %v6250_v8, %v6648_v33  ;;  %v1724_v28 = vmax.f32 %v1544_v6, 0.0 }
 0x18f   : > { %v1792_v16 = vpack.c.bf16 %v1715_v50, %v1714_v60  ;;  %v1793_v57 = vpack.c.bf16 %v1717_v38, %v1716_v34 }
 0x190   : > { %v6679_v1 = vpop.f32.mrf.mxu1 }
 0x192   : > { %v6682_v27 = vpop.f32.mrf.mxu1 }
 0x193   : > { %5604 = vmatmul.mubr.msk.bf16.gmra.mxu1 %vm1845_vm2, %v1785_v0 }
 0x194   : > { %5607 = vmatprep.mubr.msk.bf16.mxu1 %vm1845_vm2, %v1786_v40  ;;  %v6688_v62 = vpop.f32.mrf.mxu1  ;;  %v1718_v40 = vmax.f32 %v1520_v9, 0.0 }
 0x196   : > { %v6696_v44 = vpop.f32.mrf.mxu1  ;;  %v1794_v36 = vpack.c.bf16 %v1719_v37, %v1718_v40 }
 0x198   : > { %v6702_v56 = vpop.f32.mrf.mxu1 }
 0x19a   : > { %v6710_v12 = vpop.f32.mrf.mxu1 }
 0x19b   : > { %5608 = vmatmul.mubr.msk.bf16.gmra.mxu1 %vm1845_vm2, %v1787_v32  ;;  %v1536_v32 = vadd.f32 %v6250_v8, %v6625_v5 }
 0x19c   : > { %5611 = vmatprep.mubr.msk.bf16.mxu1 %vm1845_vm2, %v1788_v30  ;;  %v6716_v15 = vpop.f32.mrf.mxu1 }
 0x19d   : > { %v1722_v23 = vmax.f32 %v1536_v32, 0.0 }
 0x19f   : > { %v1796_v42 = vpack.c.bf16 %v1723_v35, %v1722_v23 }
 0x1a3   : > { %5612 = vmatmul.mubr.msk.bf16.gmra.mxu1 %vm1845_vm2, %v1789_v29 }
 0x1a4   : > { %5615 = vmatprep.mubr.msk.bf16.mxu1 %vm1845_vm2, %v1790_v24  ;;  %v1547_v24 = vadd.f32 %v6628_v21, %v6250_v8  ;;  %v1727_v21 = vmax.f32 %v1555_v11, 0.0  ;;  %v6759_v8 = vld [vmem:[%s8356_s2] ss:$0 sm:$0xff] }
 0x1a5   : > { %v1560_v33 = vadd.f32 %v6759_v8, %v6636_v51  ;;  %v1568_v38 = vadd.f32 %v6759_v8, %v6661_v47  ;;  %v1579_v32 = vadd.f32 %v6759_v8, %v6664_v63  ;;  %v1584_v18 = vadd.f32 %v6759_v8, %v6679_v1 }
 0x1a6   : > { %v1798_v34 = vpack.c.bf16 %v1727_v21, %v1726_v39  ;;  %v1603_v6 = vadd.f32 %v6759_v8, %v6716_v15  ;;  %v1608_v15 = vadd.f32 %v6759_v8, %v6696_v44  ;;  %v1611_v39 = vadd.f32 %v6759_v8, %v6710_v12 }
 0x1a7   : > { %v1728_v51 = vmax.f32 %v1560_v33, 0.0  ;;  %v1733_v45 = vmax.f32 %v1579_v32, 0.0 }
 0x1ab   : > { %v5521_v0 = vpop.f32.mrf.mxu1  ;;  %5616 = vmatmul.mubr.msk.bf16.gmra.mxu1 %vm1845_vm2, %v1791_v55  ;;  %v1725_v55 = vmax.f32 %v1547_v24, 0.0 }
 0x1ac   : > { %5619 = vmatprep.mubr.msk.bf16.mxu1 %vm1845_vm2, %v1792_v16  ;;  %v2081_v2 = vadd.f32 %v5521_v0, %v6727_v20  ;;  %v1563_v0 = vadd.f32 %v6759_v8, %v6646_v43 }
 0x1ad   : > { %v2072_v26 = vpop.f32.mrf.mxu1  ;;  %v1797_v7 = vpack.c.bf16 %v1725_v55, %v1724_v28 }
 0x1ae   : > { %v2073_v49 = vadd.f32 %v6727_v20, %v2072_v26  ;;  %v2585_v50 = vmax.f32 %v2081_v2, 0.0  ;;  %v1571_v26 = vadd.f32 %v6759_v8, %v6666_v3  ;;  %v1576_v3 = vadd.f32 %v6759_v8, %v6654_v25 }
 0x1af   : > { %v5522_v13 = vpop.f32.mrf.mxu1  ;;  %v1600_v2 = vadd.f32 %v6759_v8, %v6702_v56 }
 0x1b0   : > { %v2583_v52 = vmax.f32 %v2073_v49, 0.0  ;;  %v2084_v46 = vadd.f32 %v5522_v13, %v6727_v20  ;;  %v1729_v49 = vmax.f32 %v1563_v0, 0.0  ;;  %v1731_v43 = vmax.f32 %v1571_v26, 0.0 }
 0x1b1   : > { %v2075_v4 = vpop.f32.mrf.mxu1  ;;  %v1732_v25 = vmax.f32 %v1576_v3, 0.0 }
 0x1b2   : > { %v2076_v54 = vadd.f32 %v6727_v20, %v2075_v4  ;;  %v2586_v14 = vmax.f32 %v2084_v46, 0.0 }
 0x1b3   : > { %v5525_v30 = vpop.f32.mrf.mxu1  ;;  %5620 = vmatmul.mubr.msk.bf16.gmra.mxu1 %vm1845_vm2, %v1793_v57  ;;  %v1730_v57 = vmax.f32 %v1568_v38, 0.0 }
 0x1b4   : > { %v2584_v59 = vmax.f32 %v2076_v54, 0.0  ;;  %5623 = vmatprep.mubr.msk.bf16.mxu1 %vm1845_vm2, %v1794_v36  ;;  %v2712_v19 = vpack.c.bf16 %v2586_v14, %v2585_v50  ;;  %v2097_v47 = vadd.f32 %v5525_v30, %v6727_v20  ;;  %v1799_v36 = vpack.c.bf16 %v1729_v49, %v1728_v51 }
 0x1b5   : > { %v2088_v53 = vpop.f32.mrf.mxu1  ;;  %v1800_v54 = vpack.c.bf16 %v1731_v43, %v1730_v57  ;;  %v1738_v14 = vmax.f32 %v1600_v2, 0.0 }
 0x1b6   : > { %v2711_v5 = vpack.c.bf16 %v2584_v59, %v2583_v52  ;;  %v2089_v10 = vadd.f32 %v6727_v20, %v2088_v53  ;;  %v1587_v52 = vadd.f32 %v6759_v8, %v6688_v62  ;;  %v2589_v30 = vmax.f32 %v2097_v47, 0.0 }
 0x1b7   : > { %v5526_v29 = vpop.f32.mrf.mxu1  ;;  %v1734_v53 = vmax.f32 %v1584_v18, 0.0  ;;  %v1592_v62 = vadd.f32 %v6759_v8, %v6672_v31 }
 0x1b8   : > { %2916 = vmatmul.mubr.bf16.vlgmr.msra.gmra.mxu0 %v2711_v5  ;;  %v2587_v13 = vmax.f32 %v2089_v10, 0.0  ;;  %v2100_v41 = vadd.f32 %v5526_v29, %v6727_v20  ;;  %v1735_v63 = vmax.f32 %v1587_v52, 0.0  ;;  %v1801_v5 = vpack.c.bf16 %v1733_v45, %v1732_v25 }
 0x1b9   : > { %2925 = vmatprep.mubr.bf16.mxu0 %v5978_v17  ;;  %v2091_v60 = vpop.f32.mrf.mxu1  ;;  %v1595_v29 = vadd.f32 %v6759_v8, %v6682_v27  ;;  %v1736_v31 = vmax.f32 %v1592_v62, 0.0  ;;  %v1739_v27 = vmax.f32 %v1603_v6, 0.0 }
 0x1ba   : > { %v2092_v16 = vadd.f32 %v6727_v20, %v2091_v60  ;;  %v2590_v59 = vmax.f32 %v2100_v41, 0.0 }
 0x1bb   : > { %5624 = vmatmul.mubr.msk.bf16.gmra.mxu1 %vm1845_vm2, %v1795_v58  ;;  %v5529_v9 = vpop.f32.mrf.mxu1  ;;  %v1802_v58 = vpack.c.bf16 %v1735_v63, %v1734_v53  ;;  %v1737_v11 = vmax.f32 %v1595_v29, 0.0  ;;  %v1804_v21 = vpack.c.bf16 %v1739_v27, %v1738_v14 }
 0x1bc   : > { %5627 = vmatprep.mubr.msk.bf16.mxu1 %vm1845_vm2, %v1796_v42  ;;  %v2588_v40 = vmax.f32 %v2092_v16, 0.0  ;;  %v2714_v23 = vpack.c.bf16 %v2590_v59, %v2589_v30  ;;  %v2113_v60 = vadd.f32 %v5529_v9, %v6727_v20  ;;  %v1740_v9 = vmax.f32 %v1608_v15, 0.0 }
 0x1bd   : > { %v2104_v37 = vpop.f32.mrf.mxu1  ;;  %v1803_v55 = vpack.c.bf16 %v1737_v11, %v1736_v31 }
 0x1be   : > { %v2713_v22 = vpack.c.bf16 %v2588_v40, %v2587_v13  ;;  %v2105_v1 = vadd.f32 %v6727_v20, %v2104_v37 }
 0x1bf   : > { %v5530_v4 = vpop.f32.mrf.mxu1 }
 0x1c0   : > { %2926 = vmatmul.mubr.bf16.gmra.mxu0 %v2712_v19  ;;  %v2591_v24 = vmax.f32 %v2105_v1, 0.0  ;;  %v2116_v56 = vadd.f32 %v5530_v4, %v6727_v20  ;;  %v2593_v19 = vmax.f32 %v2113_v60, 0.0 }
 0x1c1   : > { %2935 = vmatprep.mubr.bf16.mxu0 %v5978_v17  ;;  %v2107_v61 = vpop.f32.mrf.mxu1 }
 0x1c2   : > { %v2108_v35 = vadd.f32 %v6727_v20, %v2107_v61  ;;  %v2594_v16 = vmax.f32 %v2116_v56, 0.0 }
 0x1c3   : > { %5628 = vmatmul.mubr.msk.bf16.gmra.mxu1 %vm1845_vm2, %v1797_v7  ;;  %v5533_v46 = vpop.f32.mrf.mxu1  ;;  %v1741_v7 = vmax.f32 %v1611_v39, 0.0 }
 0x1c4   : > { %5631 = vmatprep.mubr.msk.bf16.mxu1 %vm1845_vm2, %v1798_v34  ;;  %v2592_v42 = vmax.f32 %v2108_v35, 0.0  ;;  %v2716_v33 = vpack.c.bf16 %v2594_v16, %v2593_v19  ;;  %v2129_v40 = vadd.f32 %v5533_v46, %v6727_v20 }
 0x1c5   : > { %v2120_v48 = vpop.f32.mrf.mxu1  ;;  %v1805_v12 = vpack.c.bf16 %v1741_v7, %v1740_v9 }
 0x1c6   : > { %v2715_v50 = vpack.c.bf16 %v2592_v42, %v2591_v24  ;;  %v2121_v0 = vadd.f32 %v6727_v20, %v2120_v48  ;;  %v2597_v49 = vmax.f32 %v2129_v40, 0.0 }
 0x1c7   : > { %v5534_v28 = vpop.f32.mrf.mxu1 }
 0x1c8   : > { %2936 = vmatmul.mubr.bf16.gmra.mxu0 %v2713_v22  ;;  %v2595_v8 = vmax.f32 %v2121_v0, 0.0  ;;  %v2132_v37 = vadd.f32 %v5534_v28, %v6727_v20 }
 0x1c9   : > { %2945 = vmatprep.mubr.bf16.mxu0 %v5978_v17  ;;  %v2123_v10 = vpop.f32.mrf.mxu1 }
 0x1ca   : > { %v2124_v44 = vadd.f32 %v6727_v20, %v2123_v10  ;;  %v2598_v57 = vmax.f32 %v2132_v37, 0.0 }
 0x1cb   : > { %5632 = vmatmul.mubr.msk.bf16.gmra.mxu1 %vm1845_vm2, %v1799_v36  ;;  %v5537_v34 = vpop.f32.mrf.mxu1 }
 0x1cc   : > { %5635 = vmatprep.mubr.msk.bf16.mxu1 %vm1845_vm2, %v1800_v54  ;;  %v2596_v38 = vmax.f32 %v2124_v44, 0.0  ;;  %v2718_v41 = vpack.c.bf16 %v2598_v57, %v2597_v49  ;;  %v2145_v18 = vadd.f32 %v5537_v34, %v6727_v20 }
 0x1cd   : > { %v2136_v26 = vpop.f32.mrf.mxu1 }
 0x1ce   : > { %v2717_v13 = vpack.c.bf16 %v2596_v38, %v2595_v8  ;;  %v2137_v22 = vadd.f32 %v6727_v20, %v2136_v26  ;;  %v2601_v61 = vmax.f32 %v2145_v18, 0.0 }
 0x1cf   : > { %v5538_v51 = vpop.f32.mrf.mxu1 }
 0x1d0   : > { %2946 = vmatmul.mubr.bf16.gmra.mxu0 %v2714_v23  ;;  %v2599_v36 = vmax.f32 %v2137_v22, 0.0  ;;  %v2148_v54 = vadd.f32 %v5538_v51, %v6727_v20 }
 0x1d1   : > { %2955 = vmatprep.mubr.bf16.mxu0 %v5978_v17  ;;  %v2139_v43 = vpop.f32.mrf.mxu1 }
 0x1d2   : > { %v2140_v4 = vadd.f32 %v6727_v20, %v2139_v43  ;;  %v2602_v30 = vmax.f32 %v2148_v54, 0.0 }
 0x1d3   : > { %5636 = vmatmul.mubr.msk.bf16.gmra.mxu1 %vm1845_vm2, %v1801_v5  ;;  %v5541_v47 = vpop.f32.mrf.mxu1 }
 0x1d4   : > { %5639 = vmatprep.mubr.msk.bf16.mxu1 %vm1845_vm2, %v1802_v58  ;;  %v2600_v3 = vmax.f32 %v2140_v4, 0.0  ;;  %v2720_v45 = vpack.c.bf16 %v2602_v30, %v2601_v61  ;;  %v2161_v5 = vadd.f32 %v5541_v47, %v6727_v20 }
 0x1d5   : > { %v2152_v32 = vpop.f32.mrf.mxu1 }
 0x1d6   : > { %v2719_v52 = vpack.c.bf16 %v2600_v3, %v2599_v36  ;;  %v2153_v53 = vadd.f32 %v6727_v20, %v2152_v32  ;;  %v2605_v58 = vmax.f32 %v2161_v5, 0.0 }
 0x1d7   : > { %v5542_v59 = vpop.f32.mrf.mxu1 }
 0x1d8   : > { %2956 = vmatmul.mubr.bf16.gmra.mxu0 %v2715_v50  ;;  %v2603_v1 = vmax.f32 %v2153_v53, 0.0  ;;  %v2164_v62 = vadd.f32 %v5542_v59, %v6727_v20 }
 0x1d9   : > { %2965 = vmatprep.mubr.bf16.mxu0 %v5978_v17  ;;  %v2155_v25 = vpop.f32.mrf.mxu1 }
 0x1da   : > { %v2156_v63 = vadd.f32 %v6727_v20, %v2155_v25  ;;  %v2606_v6 = vmax.f32 %v2164_v62, 0.0 }
 0x1db   : > { %5640 = vmatmul.mubr.msk.bf16.gmra.mxu1 %vm1845_vm2, %v1803_v55  ;;  %v5545_v23 = vpop.f32.mrf.mxu1 }
 0x1dc   : > { %5643 = vmatprep.mubr.msk.bf16.mxu1 %vm1845_vm2, %v1804_v21  ;;  %v2604_v35 = vmax.f32 %v2156_v63, 0.0  ;;  %v2722_v42 = vpack.c.bf16 %v2606_v6, %v2605_v58  ;;  %v2177_v56 = vadd.f32 %v5545_v23, %v6727_v20 }
 0x1dd   : > { %v2168_v46 = vpop.f32.mrf.mxu1 }
 0x1de   : > { %v2721_v29 = vpack.c.bf16 %v2604_v35, %v2603_v1  ;;  %v2169_v48 = vadd.f32 %v6727_v20, %v2168_v46  ;;  %v2609_v15 = vmax.f32 %v2177_v56, 0.0 }
 0x1df   : > { %v5546_v2 = vpop.f32.mrf.mxu1 }
 0x1e0   : > { %2966 = vmatmul.mubr.bf16.gmra.mxu0 %v2716_v33  ;;  %v2607_v14 = vmax.f32 %v2169_v48, 0.0  ;;  %v2180_v50 = vadd.f32 %v5546_v2, %v6727_v20 }
 0x1e1   : > { %2975 = vmatprep.mubr.bf16.mxu0 %v5978_v17  ;;  %v2171_v24 = vpop.f32.mrf.mxu1 }
 0x1e2   : > { %v2172_v31 = vadd.f32 %v6727_v20, %v2171_v24  ;;  %v2610_v39 = vmax.f32 %v2180_v50, 0.0 }
 0x1e3   : > { %5644 = vmatmul.mubr.msk.bf16.gmra.mxu1 %vm1845_vm2, %v1805_v12  ;;  %v5549_v11 = vpop.f32.mrf.mxu1 }
 0x1e4   : > { %v2608_v27 = vmax.f32 %v2172_v31, 0.0  ;;  %v2724_v19 = vpack.c.bf16 %v2610_v39, %v2609_v15  ;;  %v2193_v44 = vadd.f32 %v5549_v11, %v6727_v20 }
 0x1e5   : > { %v2184_v60 = vpop.f32.mrf.mxu1 }
 0x1e6   : > { %v2723_v28 = vpack.c.bf16 %v2608_v27, %v2607_v14  ;;  %v2185_v16 = vadd.f32 %v6727_v20, %v2184_v60  ;;  %v2613_v38 = vmax.f32 %v2193_v44, 0.0 }
 0x1e7   : > { %v5550_v55 = vpop.f32.mrf.mxu1 }
 0x1e8   : > { %2976 = vmatmul.mubr.bf16.gmra.mxu0 %v2717_v13  ;;  %v2611_v7 = vmax.f32 %v2185_v16, 0.0  ;;  %v2196_v34 = vadd.f32 %v5550_v55, %v6727_v20 }
 0x1e9   : > { %2985 = vmatprep.mubr.bf16.mxu0 %v5978_v17  ;;  %v2187_v21 = vpop.f32.mrf.mxu1 }
 0x1ea   : > { %v2188_v10 = vadd.f32 %v6727_v20, %v2187_v21  ;;  %v2614_v26 = vmax.f32 %v2196_v34, 0.0 }
 0x1eb   : > { %v5553_v9 = vpop.f32.mrf.mxu1 }
 0x1ec   : > { %v2612_v33 = vmax.f32 %v2188_v10, 0.0  ;;  %v2726_v37 = vpack.c.bf16 %v2614_v26, %v2613_v38  ;;  %v2209_v36 = vadd.f32 %v5553_v9, %v6727_v20 }
 0x1ed   : > { %v2200_v0 = vpop.f32.mrf.mxu1 }
 0x1ee   : > { %v2725_v12 = vpack.c.bf16 %v2612_v33, %v2611_v7  ;;  %v2201_v49 = vadd.f32 %v6727_v20, %v2200_v0  ;;  %v2617_v18 = vmax.f32 %v2209_v36, 0.0 }
 0x1ef   : > { %v5554_v8 = vpop.f32.mrf.mxu1 }
 0x1f0   : > { %2986 = vmatmul.mubr.bf16.gmra.mxu0 %v2718_v41  ;;  %v2615_v41 = vmax.f32 %v2201_v49, 0.0  ;;  %v2212_v22 = vadd.f32 %v5554_v8, %v6727_v20 }
 0x1f1   : > { %2995 = vmatprep.mubr.bf16.mxu0 %v5978_v17  ;;  %v2203_v40 = vpop.f32.mrf.mxu1 }
 0x1f2   : > { %v2204_v13 = vadd.f32 %v6727_v20, %v2203_v40  ;;  %v2618_v3 = vmax.f32 %v2212_v22, 0.0 }
 0x1f3   : > { %v5557_v51 = vpop.f32.mrf.mxu1 }
 0x1f4   : > { %v2616_v57 = vmax.f32 %v2204_v13, 0.0  ;;  %v2728_v54 = vpack.c.bf16 %v2618_v3, %v2617_v18  ;;  %v2225_v1 = vadd.f32 %v5557_v51, %v6727_v20 }
 0x1f5   : > { %v2216_v43 = vpop.f32.mrf.mxu1 }
 0x1f6   : > { %v2727_v4 = vpack.c.bf16 %v2616_v57, %v2615_v41  ;;  %v2217_v61 = vadd.f32 %v6727_v20, %v2216_v43  ;;  %v2621_v5 = vmax.f32 %v2225_v1, 0.0 }
 0x1f7   : > { %v5558_v47 = vpop.f32.mrf.mxu1 }
 0x1f8   : > { %2996 = vmatmul.mubr.bf16.gmra.mxu0 %v2719_v52  ;;  %v2228_v53 = vadd.f32 %v5558_v47, %v6727_v20 }
 0x1f9   : > { %3005 = vmatprep.mubr.bf16.mxu0 %v5978_v17  ;;  %v2219_v32 = vpop.f32.mrf.mxu1 }
 0x1fa   : > { %v2220_v52 = vadd.f32 %v6727_v20, %v2219_v32  ;;  %v2622_v35 = vmax.f32 %v2228_v53, 0.0 }
 0x1fb   : > { %v5561_v59 = vpop.f32.mrf.mxu1 }
 0x1fc   : > { %v2620_v30 = vmax.f32 %v2220_v52, 0.0  ;;  %v2730_v62 = vpack.c.bf16 %v2622_v35, %v2621_v5  ;;  %v2241_v14 = vadd.f32 %v5561_v59, %v6727_v20 }
 0x1fd   : > { %v2232_v25 = vpop.f32.mrf.mxu1 }
 0x1fe   : > { %v2233_v58 = vadd.f32 %v6727_v20, %v2232_v25  ;;  %v2625_v56 = vmax.f32 %v2241_v14, 0.0 }
 0x1ff   : > { %v5562_v23 = vpop.f32.mrf.mxu1 }
 0x200   : > { %3006 = vmatmul.mubr.bf16.gmra.mxu0 %v2720_v45  ;;  %v2619_v45 = vmax.f32 %v2217_v61, 0.0  ;;  %v2244_v48 = vadd.f32 %v5562_v23, %v6727_v20 }
 0x201   : > { %3015 = vmatprep.mubr.bf16.mxu0 %v5978_v17  ;;  %v2235_v46 = vpop.f32.mrf.mxu1 }
 0x202   : > { %v2729_v63 = vpack.c.bf16 %v2620_v30, %v2619_v45  ;;  %v2626_v27 = vmax.f32 %v2244_v48, 0.0 }
 0x203   : > { %v5565_v2 = vpop.f32.mrf.mxu1 }
 0x204   : > { %v2732_v50 = vpack.c.bf16 %v2626_v27, %v2625_v56  ;;  %v2257_v7 = vadd.f32 %v5565_v2, %v6727_v20 }
 0x205   : > { %v2248_v24 = vpop.f32.mrf.mxu1 }
 0x206   : > { %v2249_v15 = vadd.f32 %v6727_v20, %v2248_v24  ;;  %v2629_v44 = vmax.f32 %v2257_v7, 0.0 }
 0x207   : > { %v5566_v11 = vpop.f32.mrf.mxu1 }
 0x208   : > { %3016 = vmatmul.mubr.bf16.gmra.mxu0 %v2721_v29  ;;  %v2236_v29 = vadd.f32 %v6727_v20, %v2235_v46  ;;  %v2260_v16 = vadd.f32 %v5566_v11, %v6727_v20 }
 0x209   : > { %3025 = vmatprep.mubr.bf16.mxu0 %v5978_v17  ;;  %v2251_v60 = vpop.f32.mrf.mxu1 }
 0x20a   : > { %v2624_v6 = vmax.f32 %v2236_v29, 0.0  ;;  %v2630_v33 = vmax.f32 %v2260_v16, 0.0 }
 0x20b   : > { %v5569_v55 = vpop.f32.mrf.mxu1 }
 0x20c   : > { %v2734_v34 = vpack.c.bf16 %v2630_v33, %v2629_v44  ;;  %v2273_v57 = vadd.f32 %v5569_v55, %v6727_v20 }
 0x20d   : > { %v2264_v21 = vpop.f32.mrf.mxu1 }
 0x20e   : > { %v2265_v38 = vadd.f32 %v6727_v20, %v2264_v21  ;;  %v2633_v47 = vmax.f32 %v2273_v57, 0.0 }
 0x20f   : > { %v5570_v9 = vpop.f32.mrf.mxu1 }
 0x210   : > { %3026 = vmatmul.mubr.bf16.gmra.mxu0 %v2722_v42  ;;  %v2623_v42 = vmax.f32 %v2233_v58, 0.0  ;;  %v2276_v13 = vadd.f32 %v5570_v9, %v6727_v20 }
 0x211   : > { %3035 = vmatprep.mubr.bf16.mxu0 %v5978_v17  ;;  %v2267_v0 = vpop.f32.mrf.mxu1 }
 0x212   : > { %v2731_v31 = vpack.c.bf16 %v2624_v6, %v2623_v42  ;;  %v2634_v41 = vmax.f32 %v2276_v13, 0.0 }
 0x213   : > { %v5573_v8 = vpop.f32.mrf.mxu1 }
 0x214   : > { %v2736_v3 = vpack.c.bf16 %v2634_v41, %v2633_v47  ;;  %v2289_v46 = vadd.f32 %v5573_v8, %v6727_v20 }
 0x215   : > { %v2280_v40 = vpop.f32.mrf.mxu1 }
 0x216   : > { %v2281_v52 = vadd.f32 %v6727_v20, %v2280_v40  ;;  %v2637_v58 = vmax.f32 %v2289_v46, 0.0 }
 0x217   : > { %v5574_v49 = vpop.f32.mrf.mxu1 }
 0x218   : > { %3036 = vmatmul.mubr.bf16.gmra.mxu0 %v2723_v28  ;;  %v2252_v28 = vadd.f32 %v6727_v20, %v2251_v60  ;;  %v2635_v45 = vmax.f32 %v2281_v52, 0.0 }
 0x219   : > { %3045 = vmatprep.mubr.bf16.mxu0 %v5978_v17 }
 0x21a   : > { %v2628_v39 = vmax.f32 %v2252_v28, 0.0 }
 0x220   : > { %3046 = vmatmul.mubr.bf16.gmra.mxu0 %v2724_v19  ;;  %v2627_v19 = vmax.f32 %v2249_v15, 0.0 }
 0x221   : > { %3055 = vmatprep.mubr.bf16.mxu0 %v5978_v17 }
 0x222   : > { %v2733_v10 = vpack.c.bf16 %v2628_v39, %v2627_v19 }
 0x228   : > { %3056 = vmatmul.mubr.bf16.gmra.mxu0 %v2725_v12  ;;  %v2268_v12 = vadd.f32 %v6727_v20, %v2267_v0 }
 0x229   : > { %3065 = vmatprep.mubr.bf16.mxu0 %v5978_v17 }
 0x22a   : > { %v2632_v26 = vmax.f32 %v2268_v12, 0.0 }
 0x230   : > { %3066 = vmatmul.mubr.bf16.gmra.mxu0 %v2726_v37  ;;  %v2631_v37 = vmax.f32 %v2265_v38, 0.0 }
 0x231   : > { %3075 = vmatprep.mubr.bf16.mxu0 %v5978_v17 }
 0x232   : > { %v2735_v51 = vpack.c.bf16 %v2632_v26, %v2631_v37 }
 0x238   : > { %3076 = vmatmul.mubr.bf16.gmra.mxu0 %v2727_v4  ;;  %v2283_v4 = vpop.f32.mrf.mxu1 }
 0x239   : > { %3085 = vmatprep.mubr.bf16.mxu0 %v5978_v17  ;;  %v2284_v32 = vadd.f32 %v6727_v20, %v2283_v4 }
 0x23b   : > { %v2636_v61 = vmax.f32 %v2284_v32, 0.0 }
 0x23d   : > { %v2737_v23 = vpack.c.bf16 %v2636_v61, %v2635_v45 }
 0x240   : > { %3086 = vmatmul.mubr.bf16.gmra.mxu0 %v2728_v54  ;;  %v5577_v54 = vpop.f32.mrf.mxu1 }
 0x241   : > { %3095 = vmatprep.mubr.bf16.mxu0 %v5978_v17  ;;  %v2305_v19 = vadd.f32 %v5577_v54, %v6727_v20 }
 0x242   : > { %v2296_v25 = vpop.f32.mrf.mxu1 }
 0x243   : > { %v2297_v11 = vadd.f32 %v6727_v20, %v2296_v25  ;;  %v2641_v33 = vmax.f32 %v2305_v19, 0.0 }
 0x244   : > { %v5578_v35 = vpop.f32.mrf.mxu1 }
 0x245   : > { %v2308_v55 = vadd.f32 %v5578_v35, %v6727_v20 }
 0x246   : > { %v2299_v2 = vpop.f32.mrf.mxu1 }
 0x247   : > { %v2300_v42 = vadd.f32 %v6727_v20, %v2299_v2 }
 0x248   : > { %3096 = vmatmul.mubr.bf16.gmra.mxu0 %v2729_v63  ;;  %v2292_v63 = vadd.f32 %v5574_v49, %v6727_v20 }
 0x249   : > { %3105 = vmatprep.mubr.bf16.mxu0 %v5978_v17  ;;  %v2640_v27 = vmax.f32 %v2300_v42, 0.0  ;;  %v2791_v42 = vld [vmem:[%s8360_s6] sm:$0x3] }
 0x250   : > { %3106 = vmatmul.mubr.bf16.gmra.mxu0 %v2730_v62  ;;  %v2638_v62 = vmax.f32 %v2292_v63, 0.0 }
 0x251   : > { %3115 = vmatprep.mubr.bf16.mxu0 %v5978_v17 }
 0x252   : > { %v2738_v24 = vpack.c.bf16 %v2638_v62, %v2637_v58 }
 0x258   : > { %3116 = vmatmul.mubr.bf16.gmra.mxu0 %v2731_v31  ;;  %v5581_v31 = vpop.f32.mrf.mxu1 }
 0x259   : > { %3125 = vmatprep.mubr.bf16.mxu0 %v5978_v17  ;;  %v2321_v32 = vadd.f32 %v5581_v31, %v6727_v20 }
 0x25a   : > { %v2312_v56 = vpop.f32.mrf.mxu1 }
 0x25b   : > { %v2313_v38 = vadd.f32 %v6727_v20, %v2312_v56  ;;  %v2645_v63 = vmax.f32 %v2321_v32, 0.0 }
 0x25c   : > { %v5582_v21 = vpop.f32.mrf.mxu1 }
 0x25d   : > { %v2324_v57 = vadd.f32 %v5582_v21, %v6727_v20 }
 0x25e   : > { %v2315_v7 = vpop.f32.mrf.mxu1 }
 0x25f   : > { %v2646_v52 = vmax.f32 %v2324_v57, 0.0 }
 0x260   : > { %3126 = vmatmul.mubr.bf16.gmra.mxu0 %v2732_v50  ;;  %v2639_v50 = vmax.f32 %v2297_v11, 0.0  ;;  %v5585_v8 = vpop.f32.mrf.mxu1 }
 0x261   : > { %3135 = vmatprep.mubr.bf16.mxu0 %v5978_v17  ;;  %v2742_v35 = vpack.c.bf16 %v2646_v52, %v2645_v63 }
 0x262   : > { %v2739_v15 = vpack.c.bf16 %v2640_v27, %v2639_v50  ;;  %v2328_v13 = vpop.f32.mrf.mxu1 }
 0x264   : > { %v5586_v47 = vpop.f32.mrf.mxu1 }
 0x266   : > { %v2331_v25 = vpop.f32.mrf.mxu1 }
 0x267   : > { %v2332_v46 = vadd.f32 %v6727_v20, %v2331_v25 }
 0x268   : > { %3136 = vmatmul.mubr.bf16.gmra.mxu0 %v2733_v10  ;;  %v2642_v10 = vmax.f32 %v2308_v55, 0.0  ;;  %v6943_v2 = vpop.f32.mrf.mxu1 }
 0x269   : > { %3145 = vmatprep.mubr.bf16.mxu0 %v5978_v17  ;;  %v2648_v27 = vmax.f32 %v2332_v46, 0.0 }
 0x26a   : > { %v2740_v44 = vpack.c.bf16 %v2642_v10, %v2641_v33  ;;  %v2344_v50 = vpop.f32.mrf.mxu1  ;;  %v2340_v10 = vadd.f32 %v5586_v47, %v6727_v20 }
 0x26c   : > { %v2650_v57 = vmax.f32 %v2340_v10, 0.0 }
 0x270   : > { %3146 = vmatmul.mubr.bf16.gmra.mxu0 %v2734_v34  ;;  %v2316_v34 = vadd.f32 %v6727_v20, %v2315_v7 }
 0x271   : > { %3155 = vmatprep.mubr.bf16.mxu0 %v5978_v17 }
 0x272   : > { %v2644_v40 = vmax.f32 %v2316_v34, 0.0 }
 0x278   : > { %v6867_v43 = vpop.f32.mrf.mxu0  ;;  %3156 = vmatmul.mubr.bf16.gmra.mxu0 %v2735_v51  ;;  %v2643_v51 = vmax.f32 %v2313_v38, 0.0  ;;  %v2337_v38 = vadd.f32 %v5585_v8, %v6727_v20 }
 0x279   : > { %3165 = vmatprep.mubr.bf16.mxu0 %v5978_v17 }
 0x27a   : > { %v6870_v22 = vpop.f32.mrf.mxu0  ;;  %v2741_v41 = vpack.c.bf16 %v2644_v40, %v2643_v51  ;;  %v2649_v8 = vmax.f32 %v2337_v38, 0.0  ;;  %v2345_v38 = vadd.f32 %v6727_v20, %v2344_v50 }
 0x27c   : > { %v6872_v36 = vpop.f32.mrf.mxu0 }
 0x27e   : > { %v6875_v18 = vpop.f32.mrf.mxu0 }
 0x280   : > { %v6878_v59 = vpop.f32.mrf.mxu0  ;;  %3166 = vmatmul.mubr.bf16.gmra.mxu0 %v2736_v3  ;;  %v2793_v3 = vlaneseq }
 0x281   : > { %3175 = vmatprep.mubr.bf16.mxu0 %v5978_v17 }
 0x282   : > { %v6881_v30 = vpop.f32.mrf.mxu0  ;;  %v2794_v45 = vshrl.u32 %v2793_v3, 7 }
 0x284   : > { %v6883_v53 = vpop.f32.mrf.mxu0  ;;  %v6945_v58 = vsub.s32 0, %v2794_v45  ;;  %v6951_v31 = vsub.s32 1, %v2794_v45 }
 0x286   : > { %v6886_v1 = vpop.f32.mrf.mxu0  ;;  %v6959_v55 = vrot.slane %v2791_v42, %v6945_v58  ;;  %v6962_v21 = vrot.slane %v2791_v42, %v6951_v31 }
 0x288   : > { %v6889_v5 = vpop.f32.mrf.mxu0  ;;  %3176 = vmatmul.mubr.bf16.gmra.mxu0 %v2737_v23  ;;  %v2918_v34 = vadd.f32 %v6867_v43, %v6959_v55  ;;  %v2920_v40 = vadd.f32 %v6870_v22, %v6962_v21  ;;  %v2922_v32 = vadd.f32 %v6872_v36, %v6959_v55  ;;  %v2924_v22 = vadd.f32 %v6875_v18, %v6962_v21 }
 0x289   : > { %3185 = vmatprep.mubr.bf16.mxu0 %v5978_v17  ;;  %v2928_v36 = vadd.f32 %v6878_v59, %v6959_v55  ;;  %v2932_v50 = vadd.f32 %v6883_v53, %v6959_v55  ;;  %v2938_v53 = vadd.f32 %v6889_v5, %v6959_v55 }
 0x28a   : > { %v6892_v29 = vpop.f32.mrf.mxu0  ;;  %v3556_v3 = vmax.f32 %v2918_v34, 0.0  ;;  %v3557_v25 = vmax.f32 %v2920_v40, 0.0  ;;  %v3558_v10 = vmax.f32 %v2922_v32, 0.0  ;;  %v2930_v40 = vadd.f32 %v6881_v30, %v6962_v21 }
 0x28c   : > { %v6894_v6 = vpop.f32.mrf.mxu0 }
 0x28e   : > { %v6897_v48 = vpop.f32.mrf.mxu0 }
 0x290   : > { %v6900_v14 = vpop.f32.mrf.mxu0  ;;  %3186 = vmatmul.mubr.bf16.gmra.mxu0 %v2738_v24  ;;  %v2329_v24 = vadd.f32 %v6727_v20, %v2328_v13 }
 0x291   : > { %3195 = vmatprep.mubr.bf16.mxu0 %v5978_v17 }
 0x292   : > { %v6903_v60 = vpop.f32.mrf.mxu0 }
 0x294   : > { %v6905_v28 = vpop.f32.mrf.mxu0 }
 0x296   : > { %v6908_v39 = vpop.f32.mrf.mxu0 }
 0x298   : > { %v6911_v16 = vpop.f32.mrf.mxu0  ;;  %3196 = vmatmul.mubr.bf16.gmra.mxu0 %v2739_v15  ;;  %v2647_v15 = vmax.f32 %v2329_v24, 0.0  ;;  %v2744_v24 = vpack.c.bf16 %v2650_v57, %v2649_v8 }
 0x299   : > { %3205 = vmatprep.mubr.bf16.mxu0 %v5978_v17 }
 0x29a   : > { %v6914_v9 = vpop.f32.mrf.mxu0  ;;  %v2743_v7 = vpack.c.bf16 %v2648_v27, %v2647_v15 }
 0x29c   : > { %v6916_v0 = vpop.f32.mrf.mxu0 }
 0x29e   : > { %v6919_v12 = vpop.f32.mrf.mxu0 }
 0x2a0   : > { %v6922_v26 = vpop.f32.mrf.mxu0  ;;  %3206 = vmatmul.mubr.bf16.gmra.mxu0 %v2740_v44  ;;  %v5590_v44 = vpop.f32.mrf.mxu1 }
 0x2a1   : > { %3215 = vmatprep.mubr.bf16.mxu0 %v5978_v17 }
 0x2a2   : > { %v6925_v37 = vpop.f32.mrf.mxu0  ;;  %v2347_v47 = vpop.f32.mrf.mxu1 }
 0x2a3   : > { %v2348_v42 = vadd.f32 %v6727_v20, %v2347_v47 }
 0x2a4   : > { %v6927_v49 = vpop.f32.mrf.mxu0  ;;  %v6987_v15 = vpop.f32.mrf.mxu1 }
 0x2a5   : > { %v2652_v47 = vmax.f32 %v2348_v42, 0.0 }
 0x2a6   : > { %v6930_v4 = vpop.f32.mrf.mxu0 }
 0x2a8   : > { %v6933_v54 = vpop.f32.mrf.mxu0  ;;  %3216 = vmatmul.mubr.bf16.gmra.mxu0 %v2741_v41 }
 0x2a9   : > { %3225 = vmatprep.mubr.bf16.mxu0 %v5978_v17 }
 0x2aa   : > { %v6936_v61 = vpop.f32.mrf.mxu0 }
 0x2ac   : > { %v6938_v23 = vpop.f32.mrf.mxu0 }
 0x2ae   : > { %v6941_v62 = vpop.f32.mrf.mxu0 }
 0x2b0   : > { %v6953_v11 = vpop.f32.mrf.mxu0  ;;  %3226 = vmatmul.mubr.bf16.gmra.mxu0 %v2742_v35 }
 0x2b1   : > { %3235 = vmatprep.mubr.bf16.mxu0 %v5978_v17 }
 0x2b2   : > { %v6956_v56 = vpop.f32.mrf.mxu0 }
 0x2b4   : > { %v6964_v19 = vpop.f32.mrf.mxu0 }
 0x2b6   : > { %v6967_v33 = vpop.f32.mrf.mxu0 }
 0x2b8   : > { %v2997_v13 = vpop.f32.mrf.mxu0  ;;  %3236 = vmatmul.mubr.bf16.gmra.mxu0 %v2743_v7 }
 0x2b9   : > { %v2998_v51 = vadd.f32 %v2997_v13, %v6959_v55  ;;  %3245 = vmatprep.mubr.bf16.mxu0 %v5978_v17 }
 0x2ba   : > { %v2999_v41 = vpop.f32.mrf.mxu0 }
 0x2bb   : > { %v3588_v52 = vmax.f32 %v2998_v51, 0.0  ;;  %v3000_v43 = vadd.f32 %v2999_v41, %v6962_v21  ;;  %v3559_v51 = vmax.f32 %v2924_v22, 0.0 }
 0x2bc   : > { %v3001_v45 = vpop.f32.mrf.mxu0 }
 0x2bd   : > { %v6981_v63 = vmax.f32 %v3556_v3, %v3588_v52  ;;  %v3589_v35 = vmax.f32 %v3000_v43, 0.0  ;;  %v3002_v46 = vadd.f32 %v3001_v45, %v6959_v55  ;;  %v3560_v3 = vmax.f32 %v2928_v36, 0.0  ;;  %v2360_v52 = vpop.f32.mrf.mxu1 }
 0x2be   : > { %v3003_v27 = vpop.f32.mrf.mxu0  ;;  %v3561_v45 = vmax.f32 %v2930_v40, 0.0  ;;  %v2356_v36 = vadd.f32 %v5590_v44, %v6727_v20 }
 0x2bf   : > { %v6989_v7 = vmax.f32 %v3557_v25, %v3589_v35  ;;  %v3590_v34 = vmax.f32 %v3002_v46, 0.0  ;;  %v3004_v18 = vadd.f32 %v3003_v27, %v6962_v21  ;;  %v2651_v25 = vmax.f32 %v2345_v38, 0.0 }
 0x2c0   : > { %v3007_v13 = vpop.f32.mrf.mxu0  ;;  %3246 = vmatmul.mubr.bf16.gmra.mxu0 %v2744_v24  ;;  %v2934_v35 = vadd.f32 %v6886_v1, %v6962_v21 }
 0x2c1   : > { %v6995_v57 = vmax.f32 %v3558_v10, %v3590_v34  ;;  %v3591_v59 = vmax.f32 %v3004_v18, 0.0  ;;  %v3008_v41 = vadd.f32 %v3007_v13, %v6959_v55  ;;  %3255 = vmatprep.mubr.bf16.mxu0 %v5978_v17  ;;  %v2745_v27 = vpack.c.bf16 %v2652_v47, %v2651_v25  ;;  %v7012_v34 = vpop.f32.mrf.mxu1 }
 0x2c2   : > { %v3009_v32 = vpop.f32.mrf.mxu0  ;;  %v3562_v18 = vmax.f32 %v2932_v50, 0.0  ;;  %v2353_v13 = vadd.f32 %v6943_v2, %v6727_v20  ;;  %v2942_v2 = vadd.f32 %v6894_v6, %v6959_v55 }
 0x2c3   : > { %v7001_v43 = vmax.f32 %v3559_v51, %v3591_v59  ;;  %v3592_v30 = vmax.f32 %v3008_v41, 0.0  ;;  %v3010_v8 = vadd.f32 %v3009_v32, %v6962_v21  ;;  %v2940_v51 = vadd.f32 %v6892_v29, %v6962_v21 }
 0x2c4   : > { %v3011_v22 = vpop.f32.mrf.mxu0  ;;  %v3563_v59 = vmax.f32 %v2934_v35, 0.0  ;;  %v3564_v32 = vmax.f32 %v2938_v53, 0.0  ;;  %v2653_v35 = vmax.f32 %v2353_v13, 0.0 }
 0x2c5   : > { %v7006_v46 = vmax.f32 %v3560_v3, %v3592_v30  ;;  %v3593_v24 = vmax.f32 %v3010_v8, 0.0  ;;  %v3012_v42 = vadd.f32 %v3011_v22, %v6959_v55  ;;  %v2654_v3 = vmax.f32 %v2356_v36, 0.0  ;;  %v2363_v30 = vpop.f32.mrf.mxu1  ;;  %v5803_v22 = vld [vmem:[%s8361_s7 + $0x74] ss:$8 sps:$4 sm:$0xff]  }
 0x2c6   : > { %v3013_v10 = vpop.f32.mrf.mxu0  ;;  %v2944_v36 = vadd.f32 %v6897_v48, %v6962_v21  ;;  %4256 = vmatprep.subr.bf16.mxu1 %v5803_v22 }
 0x2c7   : > { %v7014_v38 = vmax.f32 %v3561_v45, %v3593_v24  ;;  %v3594_v40 = vmax.f32 %v3012_v42, 0.0  ;;  %v3014_v1 = vadd.f32 %v3013_v10, %v6962_v21  ;;  %v5801_v45 = vld [vmem:[%s8361_s7 + $0x70] ss:$8 sps:$4 sm:$0xff]   ;;  %v3565_v24 = vmax.f32 %v2940_v51, 0.0  ;;  %v7044_v13 = vpop.f32.mrf.mxu1 }
 0x2c8   : > { %v3017_v44 = vpop.f32.mrf.mxu0  ;;  %3256 = vmatmul.mubr.bf16.gmra.mxu0 %v2745_v27  ;;  %v2746_v10 = vpack.c.bf16 %v2654_v3, %v2653_v35  ;;  %4257 = vmatpush1.bf16.msra.mxu1 %v5801_v45  ;;  %v3566_v51 = vmax.f32 %v2942_v2, 0.0 }
 0x2c9   : > { %v7021_v41 = vmax.f32 %v3562_v18, %v3594_v40  ;;  %v3595_v5 = vmax.f32 %v3014_v1, 0.0  ;;  %v3018_v47 = vadd.f32 %v3017_v44, %v6959_v55  ;;  %3265 = vmatprep.mubr.bf16.mxu0 %v5978_v17  ;;  %v2364_v18 = vadd.f32 %v6727_v20, %v2363_v30  ;;  %v2376_v45 = vpop.f32.mrf.mxu1 }
 0x2ca   : > { %v3019_v50 = vpop.f32.mrf.mxu0  ;;  %v2948_v40 = vadd.f32 %v6900_v14, %v6959_v55 }
 0x2cb   : > { %v7027_v8 = vmax.f32 %v3563_v59, %v3595_v5  ;;  %v3596_v29 = vmax.f32 %v3018_v47, 0.0  ;;  %v3020_v25 = vadd.f32 %v3019_v50, %v6962_v21  ;;  %v2361_v5 = vadd.f32 %v6727_v20, %v2360_v52 }
 0x2cc   : > { %v3021_v42 = vpop.f32.mrf.mxu0  ;;  %v2950_v47 = vadd.f32 %v6903_v60, %v6962_v21  ;;  %v2656_v2 = vmax.f32 %v2364_v18, 0.0  ;;  %v2952_v20 = vadd.f32 %v6905_v28, %v6959_v55  ;;  %v7069_v28 = vld [vmem:[%s8358_s4] ss:$0 sm:$0xff] }
 0x2cd   : > { %v7038_v6 = vmax.f32 %v3564_v32, %v3596_v29  ;;  %v3597_v27 = vmax.f32 %v3020_v25, 0.0  ;;  %v3022_v53 = vadd.f32 %v3021_v42, %v6959_v55  ;;  %v3567_v32 = vmax.f32 %v2944_v36, 0.0 }
 0x2ce   : > { %v3023_v1 = vpop.f32.mrf.mxu0  ;;  %v3568_v29 = vmax.f32 %v2948_v40, 0.0  ;;  %v2655_v35 = vmax.f32 %v2361_v5, 0.0  ;;  %v2954_v36 = vadd.f32 %v6908_v39, %v6962_v21  ;;  %v2372_v18 = vadd.f32 %v7069_v28, %v7012_v34 }
 0x2cf   : > { %v7046_v44 = vmax.f32 %v3565_v24, %v3597_v27  ;;  %v3598_v48 = vmax.f32 %v3022_v53, 0.0  ;;  %v3024_v59 = vadd.f32 %v3023_v1, %v6962_v21  ;;  %v3569_v24 = vmax.f32 %v2950_v47, 0.0 }
 0x2d0   : > { %v3027_v3 = vpop.f32.mrf.mxu0  ;;  %3266 = vmatmul.mubr.bf16.gmra.mxu0 %v2746_v10  ;;  %v2747_v40 = vpack.c.bf16 %v2656_v2, %v2655_v35  ;;  %v2958_v1 = vadd.f32 %v6911_v16, %v6959_v55  ;;  %v3570_v39 = vmax.f32 %v2952_v20, 0.0 }
 0x2d1   : > { %v7052_v50 = vmax.f32 %v3566_v51, %v3598_v48  ;;  %v3599_v14 = vmax.f32 %v3024_v59, 0.0  ;;  %v3028_v30 = vadd.f32 %v3027_v3, %v6959_v55  ;;  %3275 = vmatprep.mubr.bf16.mxu0 %v5978_v17  ;;  %v7075_v48 = vpop.f32.mrf.mxu1  ;;  %v2369_v3 = vadd.f32 %v7069_v28, %v6987_v15 }
 0x2d2   : > { %v3029_v25 = vpop.f32.mrf.mxu0  ;;  %v2962_v15 = vadd.f32 %v6916_v0, %v6959_v55 }
 0x2d3   : > { %v7058_v52 = vmax.f32 %v3567_v32, %v3599_v14  ;;  %v3600_v60 = vmax.f32 %v3028_v30, 0.0  ;;  %v3030_v22 = vadd.f32 %v3029_v25, %v6962_v21  ;;  %v2960_v32 = vadd.f32 %v6914_v9, %v6962_v21 }
 0x2d4   : > { %v3031_v42 = vpop.f32.mrf.mxu0  ;;  %v3571_v14 = vmax.f32 %v2954_v36, 0.0  ;;  %v3572_v25 = vmax.f32 %v2958_v1, 0.0  ;;  %v2657_v36 = vmax.f32 %v2369_v3, 0.0 }
 0x2d5   : > { %v7063_v27 = vmax.f32 %v3568_v29, %v3600_v60  ;;  %v3601_v53 = vmax.f32 %v3030_v22, 0.0  ;;  %v3032_v10 = vadd.f32 %v3031_v42, %v6959_v55  ;;  %v2658_v29 = vmax.f32 %v2372_v18, 0.0  ;;  %v2379_v60 = vpop.f32.mrf.mxu1  ;;  %v5806_v42 = vld [vmem:[%s8361_s7 + $0x64] ss:$8 sps:$4 sm:$0xff]  }
 0x2d6   : > { %v3033_v51 = vpop.f32.mrf.mxu0  ;;  %v2964_v18 = vadd.f32 %v6919_v12, %v6962_v21  ;;  %4258 = vmatprep.subr.bf16.mxu1 %v5806_v42 }
 0x2d7   : > { %v7077_v59 = vmax.f32 %v3569_v24, %v3601_v53  ;;  %v3602_v5 = vmax.f32 %v3032_v10, 0.0  ;;  %v3034_v47 = vadd.f32 %v3033_v51, %v6962_v21  ;;  %v5804_v24 = vld [vmem:[%s8361_s7 + $0x60] ss:$8 sps:$4 sm:$0xff]   ;;  %v3573_v53 = vmax.f32 %v2960_v32, 0.0  ;;  %v7107_v3 = vpop.f32.mrf.mxu1 }
 0x2d8   : > { %v3037_v34 = vpop.f32.mrf.mxu0  ;;  %3276 = vmatmul.mubr.bf16.gmra.mxu0 %v2747_v40  ;;  %v2748_v51 = vpack.c.bf16 %v2658_v29, %v2657_v36  ;;  %4259 = vmatpush1.bf16.msra.mxu1 %v5804_v24  ;;  %v3574_v32 = vmax.f32 %v2962_v15, 0.0 }
 0x2d9   : > { %v7084_v30 = vmax.f32 %v3570_v39, %v3602_v5  ;;  %v3603_v16 = vmax.f32 %v3034_v47, 0.0  ;;  %v3038_v2 = vadd.f32 %v3037_v34, %v6959_v55  ;;  %3285 = vmatprep.mubr.bf16.mxu0 %v5978_v17  ;;  %v2380_v39 = vadd.f32 %v7069_v28, %v2379_v60  ;;  %v2392_v24 = vpop.f32.mrf.mxu1 }
 0x2da   : > { %v3039_v20 = vpop.f32.mrf.mxu0  ;;  %v2968_v5 = vadd.f32 %v6922_v26, %v6959_v55 }
 0x2db   : > { %v7090_v22 = vmax.f32 %v3571_v14, %v3603_v16  ;;  %v3604_v9 = vmax.f32 %v3038_v2, 0.0  ;;  %v3040_v35 = vadd.f32 %v3039_v20, %v6962_v21  ;;  %v2377_v16 = vadd.f32 %v7069_v28, %v2376_v45 }
 0x2dc   : > { %v3041_v10 = vpop.f32.mrf.mxu0  ;;  %v2970_v2 = vadd.f32 %v6925_v37, %v6962_v21  ;;  %v2660_v15 = vmax.f32 %v2380_v39, 0.0  ;;  %v2972_v45 = vadd.f32 %v6927_v49, %v6959_v55 }
 0x2dd   : > { %v7101_v0 = vmax.f32 %v3572_v25, %v3604_v9  ;;  %v3605_v40 = vmax.f32 %v3040_v35, 0.0  ;;  %v3042_v1 = vadd.f32 %v3041_v10, %v6959_v55  ;;  %v3575_v25 = vmax.f32 %v2964_v18, 0.0 }
 0x2de   : > { %v3043_v47 = vpop.f32.mrf.mxu0  ;;  %v3576_v9 = vmax.f32 %v2968_v5, 0.0  ;;  %v3577_v10 = vmax.f32 %v2970_v2, 0.0  ;;  %v2388_v5 = vadd.f32 %v7069_v28, %v7075_v48 }
 0x2df   : > { %v7109_v34 = vmax.f32 %v3573_v53, %v3605_v40  ;;  %v3606_v12 = vmax.f32 %v3042_v1, 0.0  ;;  %v3044_v14 = vadd.f32 %v3043_v47, %v6962_v21  ;;  %v2659_v53 = vmax.f32 %v2377_v16, 0.0 }
 0x2e0   : > { %v3047_v29 = vpop.f32.mrf.mxu0  ;;  %3286 = vmatmul.mubr.bf16.gmra.mxu0 %v2748_v51  ;;  %v2974_v40 = vadd.f32 %v6930_v4, %v6962_v21  ;;  %v2978_v47 = vadd.f32 %v6933_v54, %v6959_v55 }
 0x2e1   : > { %v7115_v20 = vmax.f32 %v3574_v32, %v3606_v12  ;;  %v3607_v26 = vmax.f32 %v3044_v14, 0.0  ;;  %v3048_v60 = vadd.f32 %v3047_v29, %v6959_v55  ;;  %3295 = vmatprep.mubr.bf16.mxu0 %v5978_v17  ;;  %v2749_v49 = vpack.c.bf16 %v2660_v15, %v2659_v53  ;;  %v7133_v12 = vpop.f32.mrf.mxu1 }
 0x2e2   : > { %v3049_v35 = vpop.f32.mrf.mxu0  ;;  %v3578_v14 = vmax.f32 %v2972_v45, 0.0  ;;  %v2385_v29 = vadd.f32 %v7069_v28, %v7044_v13  ;;  %v2982_v13 = vadd.f32 %v6938_v23, %v6959_v55 }
 0x2e3   : > { %v7121_v42 = vmax.f32 %v3575_v25, %v3607_v26  ;;  %v3608_v37 = vmax.f32 %v3048_v60, 0.0  ;;  %v3050_v36 = vadd.f32 %v3049_v35, %v6962_v21  ;;  %v2980_v25 = vadd.f32 %v6936_v61, %v6962_v21 }
 0x2e4   : > { %v3051_v18 = vpop.f32.mrf.mxu0  ;;  %v3579_v26 = vmax.f32 %v2974_v40, 0.0  ;;  %v3580_v35 = vmax.f32 %v2978_v47, 0.0  ;;  %v2661_v40 = vmax.f32 %v2385_v29, 0.0 }
 0x2e5   : > { %v7126_v1 = vmax.f32 %v3576_v9, %v3608_v37  ;;  %v3609_v51 = vmax.f32 %v3050_v36, 0.0  ;;  %v3052_v39 = vadd.f32 %v3051_v18, %v6959_v55  ;;  %v2662_v9 = vmax.f32 %v2388_v5, 0.0  ;;  %v2395_v37 = vpop.f32.mrf.mxu1  ;;  %v5809_v18 = vld [vmem:[%s8361_s7 + $0x54] ss:$8 sps:$4 sm:$0xff]  }
 0x2e6   : > { %v3053_v32 = vpop.f32.mrf.mxu0  ;;  %v2984_v5 = vadd.f32 %v6941_v62, %v6962_v21  ;;  %4260 = vmatprep.subr.bf16.mxu1 %v5809_v18 }
 0x2e7   : > { %v7135_v16 = vmax.f32 %v3577_v10, %v3609_v51  ;;  %v3610_v2 = vmax.f32 %v3052_v39, 0.0  ;;  %v3054_v4 = vadd.f32 %v3053_v32, %v6962_v21  ;;  %v5807_v10 = vld [vmem:[%s8361_s7 + $0x50] ss:$8 sps:$4 sm:$0xff]   ;;  %v3581_v51 = vmax.f32 %v2980_v25, 0.0  ;;  %v7165_v29 = vpop.f32.mrf.mxu1 }
 0x2e8   : > { %v3057_v48 = vpop.f32.mrf.mxu0  ;;  %3296 = vmatmul.mubr.bf16.gmra.mxu0 %v2749_v49  ;;  %v2750_v32 = vpack.c.bf16 %v2662_v9, %v2661_v40  ;;  %4261 = vmatpush1.bf16.msra.mxu1 %v5807_v10  ;;  %v3582_v25 = vmax.f32 %v2982_v13, 0.0 }
 0x2e9   : > { %v7142_v60 = vmax.f32 %v3578_v14, %v3610_v2  ;;  %v3611_v54 = vmax.f32 %v3054_v4, 0.0  ;;  %v3058_v15 = vadd.f32 %v3057_v48, %v6959_v55  ;;  %3305 = vmatprep.mubr.bf16.mxu0 %v5978_v17  ;;  %v2396_v14 = vadd.f32 %v7069_v28, %v2395_v37  ;;  %v2408_v10 = vpop.f32.mrf.mxu1 }
 0x2ea   : > { %v3059_v45 = vpop.f32.mrf.mxu0  ;;  %v2988_v2 = vadd.f32 %v6953_v11, %v6959_v55 }
 0x2eb   : > { %v7148_v36 = vmax.f32 %v3579_v26, %v3611_v54  ;;  %v3612_v61 = vmax.f32 %v3058_v15, 0.0  ;;  %v3060_v53 = vadd.f32 %v3059_v45, %v6962_v21  ;;  %v2393_v54 = vadd.f32 %v7069_v28, %v2392_v24 }
 0x2ec   : > { %v3061_v39 = vpop.f32.mrf.mxu0  ;;  %v2990_v15 = vadd.f32 %v6956_v56, %v6962_v21  ;;  %v2664_v13 = vmax.f32 %v2396_v14, 0.0  ;;  %v2992_v24 = vadd.f32 %v6964_v19, %v6959_v55 }
 0x2ed   : > { %v7159_v23 = vmax.f32 %v3580_v35, %v3612_v61  ;;  %v3613_v49 = vmax.f32 %v3060_v53, 0.0  ;;  %v3062_v47 = vadd.f32 %v3061_v39, %v6959_v55  ;;  %v3583_v35 = vmax.f32 %v2984_v5, 0.0 }
 0x2ee   : > { %v3063_v4 = vpop.f32.mrf.mxu0  ;;  %v3584_v61 = vmax.f32 %v2988_v2, 0.0  ;;  %v3585_v39 = vmax.f32 %v2990_v15, 0.0  ;;  %v2404_v2 = vadd.f32 %v7069_v28, %v7133_v12 }
 0x2ef   : > { %v7167_v48 = vmax.f32 %v3581_v51, %v3613_v49  ;;  %v3614_v62 = vmax.f32 %v3062_v47, 0.0  ;;  %v3064_v26 = vadd.f32 %v3063_v4, %v6962_v21  ;;  %v2663_v51 = vmax.f32 %v2393_v54, 0.0 }
 0x2f0   : > { %v3067_v9 = vpop.f32.mrf.mxu0  ;;  %3306 = vmatmul.mubr.bf16.gmra.mxu0 %v2750_v32  ;;  %v2994_v49 = vadd.f32 %v6967_v33, %v6962_v21  ;;  %v2401_v33 = vadd.f32 %v7069_v28, %v7107_v3  ;;  %v5810_v3 = vld [vmem:[%s8361_s7 + $0x40] ss:$8 sps:$4 sm:$0xff]  }
 0x2f1   : > { %v7173_v45 = vmax.f32 %v3582_v25, %v3614_v62  ;;  %v3615_v11 = vmax.f32 %v3064_v26, 0.0  ;;  %v3068_v37 = vadd.f32 %v3067_v9, %v6959_v55  ;;  %3315 = vmatprep.mubr.bf16.mxu0 %v5978_v17  ;;  %v2751_v19 = vpack.c.bf16 %v2664_v13, %v2663_v51  ;;  %v5606_v25 = vpop.f32.mrf.mxu1  ;;  %v5812_v51 = vld [vmem:[%s8361_s7 + $0x44] ss:$8 sps:$4 sm:$0xff]  }
 0x2f2   : > { %v3069_v53 = vpop.f32.mrf.mxu0  ;;  %v3586_v62 = vmax.f32 %v2992_v24, 0.0  ;;  %v2666_v13 = vmax.f32 %v2404_v2, 0.0  ;;  %4262 = vmatprep.subr.bf16.mxu1 %v5812_v51 }
 0x2f3   : > { %v7179_v18 = vmax.f32 %v3583_v35, %v3615_v11  ;;  %v3616_v56 = vmax.f32 %v3068_v37, 0.0  ;;  %v3070_v40 = vadd.f32 %v3069_v53, %v6962_v21  ;;  %v3587_v35 = vmax.f32 %v2994_v49, 0.0  ;;  %v2411_v53 = vpop.f32.mrf.mxu1  ;;  %4263 = vmatpush1.bf16.msra.mxu1 %v5810_v3 }
 0x2f4   : > { %v3071_v5 = vpop.f32.mrf.mxu0 }
 0x2f5   : > { %v7184_v47 = vmax.f32 %v3584_v61, %v3616_v56  ;;  %v3617_v32 = vmax.f32 %v3070_v40, 0.0  ;;  %v3072_v14 = vadd.f32 %v3071_v5, %v6959_v55 }
 0x2f6   : > { %v3073_v4 = vpop.f32.mrf.mxu0 }
 0x2f7   : > { %v7189_v26 = vmax.f32 %v3585_v39, %v3617_v32  ;;  %v3618_v54 = vmax.f32 %v3072_v14, 0.0  ;;  %v3074_v15 = vadd.f32 %v3073_v4, %v6962_v21  ;;  %v2665_v39 = vmax.f32 %v2401_v33, 0.0 }
 0x2f8   : > { %v3077_v9 = vpop.f32.mrf.mxu0  ;;  %3316 = vmatmul.mubr.bf16.gmra.mxu0 %v2751_v19  ;;  %v2412_v19 = vadd.f32 %v7069_v28, %v2411_v53 }
 0x2f9   : > { %v7194_v11 = vmax.f32 %v3586_v62, %v3618_v54  ;;  %v3619_v37 = vmax.f32 %v3074_v15, 0.0  ;;  %v3078_v12 = vadd.f32 %v3077_v9, %v6959_v55  ;;  %3325 = vmatprep.mubr.bf16.mxu0 %v5978_v17  ;;  %v2752_v2 = vpack.c.bf16 %v2666_v13, %v2665_v39  ;;  %v7212_v62 = vpop.f32.mrf.mxu1 }
 0x2fa   : > { %v3079_v61 = vpop.f32.mrf.mxu0  ;;  %v2668_v13 = vmax.f32 %v2412_v19, 0.0 }
 0x2fb   : > { %v7198_v24 = vmax.f32 %v3587_v35, %v3619_v37  ;;  %v3620_v56 = vmax.f32 %v3078_v12, 0.0  ;;  %v3080_v40 = vadd.f32 %v3079_v61, %v6962_v21  ;;  %v2424_v53 = vpop.f32.mrf.mxu1 }
 0x2fc   : > { %v3081_v5 = vpop.f32.mrf.mxu0 }
 0x2fd   : > { %v7208_v49 = vmax.f32 %v6981_v63, %v3620_v56  ;;  %v3621_v32 = vmax.f32 %v3080_v40, 0.0  ;;  %v3082_v14 = vadd.f32 %v3081_v5, %v6959_v55  ;;  %v2409_v63 = vadd.f32 %v7069_v28, %v2408_v10 }
 0x2fe   : > { %v3083_v4 = vpop.f32.mrf.mxu0  ;;  %v2420_v5 = vadd.f32 %v7069_v28, %v5606_v25 }
 0x2ff   : > { %v7215_v54 = vmax.f32 %v6989_v7, %v3621_v32  ;;  %v3622_v15 = vmax.f32 %v3082_v14, 0.0  ;;  %v3084_v33 = vadd.f32 %v3083_v4, %v6962_v21  ;;  %v2667_v10 = vmax.f32 %v2409_v63, 0.0 }
 0x300   : > { %v3087_v9 = vpop.f32.mrf.mxu0  ;;  %3326 = vmatmul.mubr.bf16.gmra.mxu0 %v2752_v2  ;;  %v5610_v2 = vpop.f32.mrf.mxu1 }
 0x301   : > { %v7220_v35 = vmax.f32 %v6995_v57, %v3622_v15  ;;  %v3623_v37 = vmax.f32 %v3084_v33, 0.0  ;;  %v3088_v12 = vadd.f32 %v3087_v9, %v6959_v55  ;;  %3335 = vmatprep.mubr.bf16.mxu0 %v5978_v17  ;;  %v2753_v32 = vpack.c.bf16 %v2668_v13, %v2667_v10 }
 0x302   : > { %v3089_v61 = vpop.f32.mrf.mxu0  ;;  %v2417_v15 = vadd.f32 %v7069_v28, %v7165_v29  ;;  %v2670_v9 = vmax.f32 %v2420_v5, 0.0  ;;  %v5813_v29 = vld [vmem:[%s8361_s7 + $0x30] ss:$8 sps:$4 sm:$0xff]  }
 0x303   : > { %v7225_v7 = vmax.f32 %v7001_v43, %v3623_v37  ;;  %v3624_v56 = vmax.f32 %v3088_v12, 0.0  ;;  %v3090_v40 = vadd.f32 %v3089_v61, %v6962_v21 }
 0x304   : > { %v3091_v3 = vpop.f32.mrf.mxu0 }
 0x305   : > { %v7229_v51 = vmax.f32 %v7006_v46, %v3624_v56  ;;  %v3625_v57 = vmax.f32 %v3090_v40, 0.0  ;;  %v3092_v39 = vadd.f32 %v3091_v3, %v6959_v55  ;;  %v2669_v56 = vmax.f32 %v2417_v15, 0.0 }
 0x306   : > { %v3093_v14 = vpop.f32.mrf.mxu0 }
 0x307   : > { %v7234_v19 = vmax.f32 %v7014_v38, %v3625_v57  ;;  %v3626_v43 = vmax.f32 %v3092_v39, 0.0  ;;  %v3094_v4 = vadd.f32 %v3093_v14, %v6962_v21  ;;  %v2427_v38 = vpop.f32.mrf.mxu1  ;;  %v2754_v57 = vpack.c.bf16 %v2670_v9, %v2669_v56 }
 0x308   : > { %v3097_v33 = vpop.f32.mrf.mxu0  ;;  %3336 = vmatmul.mubr.bf16.gmra.mxu0 %v2753_v32  ;;  %v2428_v39 = vadd.f32 %v7069_v28, %v2427_v38 }
 0x309   : > { %v7240_v46 = vmax.f32 %v7021_v41, %v3626_v43  ;;  %v3627_v63 = vmax.f32 %v3094_v4, 0.0  ;;  %v3098_v25 = vadd.f32 %v3097_v33, %v6959_v55  ;;  %3345 = vmatprep.mubr.bf16.mxu0 %v5978_v17  ;;  %v5815_v41 = vld [vmem:[%s8361_s7 + $0x34] ss:$8 sps:$4 sm:$0xff]   ;;  %v7259_v32 = vpop.f32.mrf.mxu1 }
 0x30a   : > { %v3099_v37 = vpop.f32.mrf.mxu0  ;;  %4264 = vmatprep.subr.bf16.mxu1 %v5815_v41  ;;  %v2672_v9 = vmax.f32 %v2428_v39, 0.0 }
 0x30b   : > { %v7245_v12 = vmax.f32 %v7027_v8, %v3627_v63  ;;  %v3628_v13 = vmax.f32 %v3098_v25, 0.0  ;;  %v3100_v61 = vadd.f32 %v3099_v37, %v6962_v21  ;;  %4265 = vmatpush1.bf16.msra.mxu1 %v5813_v29  ;;  %v2440_v38 = vpop.f32.mrf.mxu1 }
 0x30c   : > { %v3101_v40 = vpop.f32.mrf.mxu0 }
 0x30d   : > { %v7255_v10 = vmax.f32 %v7038_v6, %v3628_v13  ;;  %v3629_v3 = vmax.f32 %v3100_v61, 0.0  ;;  %v3102_v8 = vadd.f32 %v3101_v40, %v6959_v55  ;;  %v2425_v6 = vadd.f32 %v7069_v28, %v2424_v53 }
 0x30e   : > { %v3103_v5 = vpop.f32.mrf.mxu0  ;;  %v2436_v40 = vadd.f32 %v7069_v28, %v5610_v2 }
 0x30f   : > { %v7262_v14 = vmax.f32 %v7046_v44, %v3629_v3  ;;  %v3630_v43 = vmax.f32 %v3102_v8, 0.0  ;;  %v3104_v4 = vadd.f32 %v3103_v5, %v6962_v21  ;;  %v2671_v53 = vmax.f32 %v2425_v6, 0.0 }
 0x310   : > { %v3107_v15 = vpop.f32.mrf.mxu0  ;;  %3346 = vmatmul.mubr.bf16.gmra.mxu0 %v2754_v57  ;;  %v5614_v57 = vpop.f32.mrf.mxu1 }
 0x311   : > { %v7267_v33 = vmax.f32 %v7052_v50, %v3630_v43  ;;  %v3631_v63 = vmax.f32 %v3104_v4, 0.0  ;;  %v3108_v25 = vadd.f32 %v3107_v15, %v6959_v55  ;;  %3355 = vmatprep.mubr.bf16.mxu0 %v5978_v17  ;;  %v2755_v3 = vpack.c.bf16 %v2672_v9, %v2671_v53 }
 0x312   : > { %v3109_v37 = vpop.f32.mrf.mxu0  ;;  %v2433_v43 = vadd.f32 %v7069_v28, %v7212_v62  ;;  %v2674_v15 = vmax.f32 %v2436_v40, 0.0  ;;  %v5816_v62 = vld [vmem:[%s8361_s7 + $0x20] ss:$8 sps:$4 sm:$0xff]  }
 0x313   : > { %v7272_v44 = vmax.f32 %v7058_v52, %v3631_v63  ;;  %v3632_v13 = vmax.f32 %v3108_v25, 0.0  ;;  %v3110_v61 = vadd.f32 %v3109_v37, %v6962_v21 }
 0x314   : > { %v3111_v29 = vpop.f32.mrf.mxu0 }
 0x315   : > { %v7276_v41 = vmax.f32 %v7063_v27, %v3632_v13  ;;  %v3633_v50 = vmax.f32 %v3110_v61, 0.0  ;;  %v3112_v56 = vadd.f32 %v3111_v29, %v6959_v55  ;;  %v2673_v13 = vmax.f32 %v2433_v43, 0.0 }
 0x316   : > { %v3113_v8 = vpop.f32.mrf.mxu0 }
 0x317   : > { %v7281_v39 = vmax.f32 %v7077_v59, %v3633_v50  ;;  %v3634_v52 = vmax.f32 %v3112_v56, 0.0  ;;  %v3114_v5 = vadd.f32 %v3113_v8, %v6962_v21  ;;  %v2443_v59 = vpop.f32.mrf.mxu1  ;;  %v2756_v50 = vpack.c.bf16 %v2674_v15, %v2673_v13 }
 0x318   : > { %v3117_v4 = vpop.f32.mrf.mxu0  ;;  %3356 = vmatmul.mubr.bf16.gmra.mxu0 %v2755_v3  ;;  %v2444_v56 = vadd.f32 %v7069_v28, %v2443_v59 }
 0x319   : > { %v7287_v27 = vmax.f32 %v7084_v30, %v3634_v52  ;;  %v3635_v6 = vmax.f32 %v3114_v5, 0.0  ;;  %v3118_v2 = vadd.f32 %v3117_v4, %v6959_v55  ;;  %3365 = vmatprep.mubr.bf16.mxu0 %v5978_v17  ;;  %v5818_v30 = vld [vmem:[%s8361_s7 + $0x24] ss:$8 sps:$4 sm:$0xff]   ;;  %v7306_v3 = vpop.f32.mrf.mxu1 }
 0x31a   : > { %v3119_v63 = vpop.f32.mrf.mxu0  ;;  %4266 = vmatprep.subr.bf16.mxu1 %v5818_v30  ;;  %v2676_v15 = vmax.f32 %v2444_v56, 0.0 }
 0x31b   : > { %v7292_v25 = vmax.f32 %v7090_v22, %v3635_v6  ;;  %v3636_v9 = vmax.f32 %v3118_v2, 0.0  ;;  %v3120_v37 = vadd.f32 %v3119_v63, %v6962_v21  ;;  %4267 = vmatpush1.bf16.msra.mxu1 %v5816_v62  ;;  %v2456_v59 = vpop.f32.mrf.mxu1 }
 0x31c   : > { %v3121_v61 = vpop.f32.mrf.mxu0 }
 0x31d   : > { %v7302_v53 = vmax.f32 %v7101_v0, %v3636_v9  ;;  %v3637_v29 = vmax.f32 %v3120_v37, 0.0  ;;  %v3122_v22 = vadd.f32 %v3121_v61, %v6959_v55  ;;  %v2441_v0 = vadd.f32 %v7069_v28, %v2440_v38 }
 0x31e   : > { %v3123_v40 = vpop.f32.mrf.mxu0  ;;  %v2452_v61 = vadd.f32 %v7069_v28, %v5614_v57 }
 0x31f   : > { %v7309_v8 = vmax.f32 %v7109_v34, %v3637_v29  ;;  %v3638_v52 = vmax.f32 %v3122_v22, 0.0  ;;  %v3124_v5 = vadd.f32 %v3123_v40, %v6962_v21  ;;  %v2675_v38 = vmax.f32 %v2441_v0, 0.0 }
 0x320   : > { %v3127_v43 = vpop.f32.mrf.mxu0  ;;  %3366 = vmatmul.mubr.bf16.gmra.mxu0 %v2756_v50  ;;  %v5618_v50 = vpop.f32.mrf.mxu1 }
 0x321   : > { %v7314_v4 = vmax.f32 %v7115_v20, %v3638_v52  ;;  %v3639_v6 = vmax.f32 %v3124_v5, 0.0  ;;  %v3128_v2 = vadd.f32 %v3127_v43, %v6959_v55  ;;  %3375 = vmatprep.mubr.bf16.mxu0 %v5978_v17  ;;  %v2757_v29 = vpack.c.bf16 %v2676_v15, %v2675_v38 }
 0x322   : > { %v3129_v63 = vpop.f32.mrf.mxu0  ;;  %v2449_v52 = vadd.f32 %v7069_v28, %v7259_v32  ;;  %v2678_v43 = vmax.f32 %v2452_v61, 0.0  ;;  %v5819_v32 = vld [vmem:[%s8361_s7 + $0x10] ss:$8 sps:$4 sm:$0xff]  }
 0x323   : > { %v7319_v34 = vmax.f32 %v7121_v42, %v3639_v6  ;;  %v3640_v9 = vmax.f32 %v3128_v2, 0.0  ;;  %v3130_v37 = vadd.f32 %v3129_v63, %v6962_v21 }
 0x324   : > { %v3131_v62 = vpop.f32.mrf.mxu0 }
 0x325   : > { %v7323_v30 = vmax.f32 %v7126_v1, %v3640_v9  ;;  %v3641_v20 = vmax.f32 %v3130_v37, 0.0  ;;  %v3132_v13 = vadd.f32 %v3131_v62, %v6959_v55  ;;  %v2677_v9 = vmax.f32 %v2449_v52, 0.0 }
 0x326   : > { %v3133_v22 = vpop.f32.mrf.mxu0 }
 0x327   : > { %v7328_v56 = vmax.f32 %v7135_v16, %v3641_v20  ;;  %v3642_v42 = vmax.f32 %v3132_v13, 0.0  ;;  %v3134_v40 = vadd.f32 %v3133_v22, %v6962_v21  ;;  %v2459_v16 = vpop.f32.mrf.mxu1  ;;  %v2758_v20 = vpack.c.bf16 %v2678_v43, %v2677_v9 }
 0x328   : > { %v3137_v5 = vpop.f32.mrf.mxu0  ;;  %3376 = vmatmul.mubr.bf16.gmra.mxu0 %v2757_v29  ;;  %v2460_v13 = vadd.f32 %v7069_v28, %v2459_v16 }
 0x329   : > { %v7334_v1 = vmax.f32 %v7142_v60, %v3642_v42  ;;  %v3643_v0 = vmax.f32 %v3134_v40, 0.0  ;;  %v3138_v57 = vadd.f32 %v3137_v5, %v6959_v55  ;;  %3385 = vmatprep.mubr.bf16.mxu0 %v5978_v17  ;;  %v5821_v60 = vld [vmem:[%s8361_s7 + $0x14] ss:$8 sps:$4 sm:$0xff]   ;;  %v7353_v29 = vpop.f32.mrf.mxu1 }
 0x32a   : > { %v3139_v6 = vpop.f32.mrf.mxu0  ;;  %4268 = vmatprep.subr.bf16.mxu1 %v5821_v60  ;;  %v2680_v43 = vmax.f32 %v2460_v13, 0.0 }
 0x32b   : > { %v7339_v2 = vmax.f32 %v7148_v36, %v3643_v0  ;;  %v3644_v15 = vmax.f32 %v3138_v57, 0.0  ;;  %v3140_v63 = vadd.f32 %v3139_v6, %v6962_v21  ;;  %4269 = vmatpush1.bf16.msra.mxu1 %v5819_v32  ;;  %v2472_v16 = vpop.f32.mrf.mxu1 }
 0x32c   : > { %v3141_v37 = vpop.f32.mrf.mxu0 }
 0x32d   : > { %v7349_v38 = vmax.f32 %v7159_v23, %v3644_v15  ;;  %v3645_v62 = vmax.f32 %v3140_v63, 0.0  ;;  %v3142_v36 = vadd.f32 %v3141_v37, %v6959_v55  ;;  %v2457_v23 = vadd.f32 %v7069_v28, %v2456_v59 }
 0x32e   : > { %v3143_v61 = vpop.f32.mrf.mxu0  ;;  %v2468_v37 = vadd.f32 %v7069_v28, %v5618_v50 }
 0x32f   : > { %v7356_v22 = vmax.f32 %v7167_v48, %v3645_v62  ;;  %v3646_v42 = vmax.f32 %v3142_v36, 0.0  ;;  %v3144_v40 = vadd.f32 %v3143_v61, %v6962_v21  ;;  %v2679_v59 = vmax.f32 %v2457_v23, 0.0 }
 0x330   : > { %v3147_v52 = vpop.f32.mrf.mxu0  ;;  %3386 = vmatmul.mubr.bf16.gmra.mxu0 %v2758_v20  ;;  %v5622_v20 = vpop.f32.mrf.mxu1 }
 0x331   : > { %v7361_v5 = vmax.f32 %v7173_v45, %v3646_v42  ;;  %v3647_v0 = vmax.f32 %v3144_v40, 0.0  ;;  %v3148_v57 = vadd.f32 %v3147_v52, %v6959_v55  ;;  %3395 = vmatprep.mubr.bf16.mxu0 %v5978_v17  ;;  %v2759_v62 = vpack.c.bf16 %v2680_v43, %v2679_v59 }
 0x332   : > { %v3149_v6 = vpop.f32.mrf.mxu0  ;;  %v2465_v42 = vadd.f32 %v7069_v28, %v7306_v3  ;;  %v2682_v52 = vmax.f32 %v2468_v37, 0.0  ;;  %v5822_v3 = vld [vmem:[%s8361_s7] ss:$8 sps:$4 sm:$0xff]  }
 0x333   : > { %v7366_v48 = vmax.f32 %v7179_v18, %v3647_v0  ;;  %v3648_v15 = vmax.f32 %v3148_v57, 0.0  ;;  %v3150_v63 = vadd.f32 %v3149_v6, %v6962_v21 }
 0x334   : > { %v3151_v32 = vpop.f32.mrf.mxu0 }
 0x335   : > { %v7370_v60 = vmax.f32 %v7184_v47, %v3648_v15  ;;  %v3649_v45 = vmax.f32 %v3150_v63, 0.0  ;;  %v3152_v9 = vadd.f32 %v3151_v32, %v6959_v55  ;;  %v2681_v15 = vmax.f32 %v2465_v42, 0.0 }
 0x336   : > { %v3153_v36 = vpop.f32.mrf.mxu0 }
 0x337   : > { %v7375_v13 = vmax.f32 %v7189_v26, %v3649_v45  ;;  %v3650_v18 = vmax.f32 %v3152_v9, 0.0  ;;  %v3154_v61 = vadd.f32 %v3153_v36, %v6962_v21  ;;  %v2475_v26 = vpop.f32.mrf.mxu1  ;;  %v2760_v45 = vpack.c.bf16 %v2682_v52, %v2681_v15 }
 0x338   : > { %v3157_v40 = vpop.f32.mrf.mxu0  ;;  %3396 = vmatmul.mubr.bf16.gmra.mxu0 %v2759_v62  ;;  %v2476_v9 = vadd.f32 %v7069_v28, %v2475_v26 }
 0x339   : > { %v7381_v47 = vmax.f32 %v7194_v11, %v3650_v18  ;;  %v3651_v23 = vmax.f32 %v3154_v61, 0.0  ;;  %v3158_v50 = vadd.f32 %v3157_v40, %v6959_v55  ;;  %3405 = vmatprep.mubr.bf16.mxu0 %v5978_v17  ;;  %v5824_v11 = vld [vmem:[%s8361_s7 + $0x4] ss:$8 sps:$4 sm:$0xff]   ;;  %v7400_v62 = vpop.f32.mrf.mxu1 }
 0x33a   : > { %v3159_v0 = vpop.f32.mrf.mxu0  ;;  %4270 = vmatprep.subr.bf16.mxu1 %v5824_v11  ;;  %v2684_v52 = vmax.f32 %v2476_v9, 0.0 }
 0x33b   : > { %v7386_v57 = vmax.f32 %v7198_v24, %v3651_v23  ;;  %v3652_v43 = vmax.f32 %v3158_v50, 0.0  ;;  %v3160_v6 = vadd.f32 %v3159_v0, %v6962_v21  ;;  %4271 = vmatpush1.bf16.msra.mxu1 %v5822_v3  ;;  %v2488_v26 = vpop.f32.mrf.mxu1 }
 0x33c   : > { %v3161_v63 = vpop.f32.mrf.mxu0 }
 0x33d   : > { %v7396_v59 = vmax.f32 %v7208_v49, %v3652_v43  ;;  %v3653_v32 = vmax.f32 %v3160_v6, 0.0  ;;  %v3162_v24 = vadd.f32 %v3161_v63, %v6959_v55  ;;  %v2473_v49 = vadd.f32 %v7069_v28, %v2472_v16 }
 0x33e   : > { %v3163_v37 = vpop.f32.mrf.mxu0  ;;  %v2484_v63 = vadd.f32 %v7069_v28, %v5622_v20 }
 0x33f   : > { %v7403_v36 = vmax.f32 %v7215_v54, %v3653_v32  ;;  %v3654_v18 = vmax.f32 %v3162_v24, 0.0  ;;  %v3164_v61 = vadd.f32 %v3163_v37, %v6962_v21  ;;  %v2683_v16 = vmax.f32 %v2473_v49, 0.0 }
 0x340   : > { %v3167_v42 = vpop.f32.mrf.mxu0  ;;  %3406 = vmatmul.mubr.bf16.gmra.mxu0 %v2760_v45  ;;  %v5626_v45 = vpop.f32.mrf.mxu1 }
 0x341   : > { %v7408_v40 = vmax.f32 %v7220_v35, %v3654_v18  ;;  %v3655_v23 = vmax.f32 %v3164_v61, 0.0  ;;  %v3168_v50 = vadd.f32 %v3167_v42, %v6959_v55  ;;  %3415 = vmatprep.mubr.bf16.mxu0 %v5978_v17  ;;  %v2761_v32 = vpack.c.bf16 %v2684_v52, %v2683_v16 }
 0x342   : > { %v3169_v0 = vpop.f32.mrf.mxu0  ;;  %v2481_v18 = vadd.f32 %v7069_v28, %v7353_v29  ;;  %v2686_v42 = vmax.f32 %v2484_v63, 0.0  ;;  %v5825_v29 = vld [vmem:[%s8361_s7 + $0xf0] ss:$8 sps:$4 sm:$0xff]  }
 0x343   : > { %v7413_v54 = vmax.f32 %v7225_v7, %v3655_v23  ;;  %v3656_v43 = vmax.f32 %v3168_v50, 0.0  ;;  %v3170_v6 = vadd.f32 %v3169_v0, %v6962_v21 }
 0x344   : > { %v3171_v3 = vpop.f32.mrf.mxu0 }
 0x345   : > { %v7417_v11 = vmax.f32 %v7229_v51, %v3656_v43  ;;  %v3657_v35 = vmax.f32 %v3170_v6, 0.0  ;;  %v3172_v15 = vadd.f32 %v3171_v3, %v6959_v55  ;;  %v2685_v43 = vmax.f32 %v2481_v18, 0.0 }
 0x346   : > { %v3173_v24 = vpop.f32.mrf.mxu0 }
 0x347   : > { %v7422_v9 = vmax.f32 %v7234_v19, %v3657_v35  ;;  %v3658_v7 = vmax.f32 %v3172_v15, 0.0  ;;  %v3174_v37 = vadd.f32 %v3173_v24, %v6962_v21  ;;  %v2491_v19 = vpop.f32.mrf.mxu1  ;;  %v2762_v35 = vpack.c.bf16 %v2686_v42, %v2685_v43 }
 0x348   : > { %v3177_v61 = vpop.f32.mrf.mxu0  ;;  %3416 = vmatmul.mubr.bf16.gmra.mxu0 %v2761_v32  ;;  %v2492_v15 = vadd.f32 %v7069_v28, %v2491_v19 }
 0x349   : > { %v7428_v51 = vmax.f32 %v7240_v46, %v3658_v7  ;;  %v3659_v49 = vmax.f32 %v3174_v37, 0.0  ;;  %v3178_v20 = vadd.f32 %v3177_v61, %v6959_v55  ;;  %3425 = vmatprep.mubr.bf16.mxu0 %v5978_v17  ;;  %v5827_v46 = vld [vmem:[%s8361_s7 + $0xf4] ss:$8 sps:$4 sm:$0xff]   ;;  %v7447_v32 = vpop.f32.mrf.mxu1 }
 0x34a   : > { %v3179_v23 = vpop.f32.mrf.mxu0  ;;  %4272 = vmatprep.subr.bf16.mxu1 %v5827_v46  ;;  %v2688_v42 = vmax.f32 %v2492_v15, 0.0 }
 0x34b   : > { %v7433_v50 = vmax.f32 %v7245_v12, %v3659_v49  ;;  %v3660_v52 = vmax.f32 %v3178_v20, 0.0  ;;  %v3180_v0 = vadd.f32 %v3179_v23, %v6962_v21  ;;  %4273 = vmatpush2.bf16.msra.mxu1 %v5825_v29  ;;  %v2504_v19 = vpop.f32.mrf.mxu1 }
 0x34c   : > { %v3181_v6 = vpop.f32.mrf.mxu0 }
 0x34d   : > { %v7443_v16 = vmax.f32 %v7255_v10, %v3660_v52  ;;  %v3661_v3 = vmax.f32 %v3180_v0, 0.0  ;;  %v3182_v12 = vadd.f32 %v3181_v6, %v6959_v55  ;;  %v2489_v10 = vadd.f32 %v7069_v28, %v2488_v26 }
 0x34e   : > { %v3183_v63 = vpop.f32.mrf.mxu0  ;;  %v2500_v6 = vadd.f32 %v7069_v28, %v5626_v45 }
 0x34f   : > { %v7450_v24 = vmax.f32 %v7262_v14, %v3661_v3  ;;  %v3662_v7 = vmax.f32 %v3182_v12, 0.0  ;;  %v3184_v37 = vadd.f32 %v3183_v63, %v6962_v21  ;;  %v2687_v26 = vmax.f32 %v2489_v10, 0.0 }
 0x350   : > { %v3187_v18 = vpop.f32.mrf.mxu0  ;;  %3426 = vmatmul.mubr.bf16.gmra.mxu0 %v2762_v35  ;;  %v5630_v35 = vpop.f32.mrf.mxu1 }
 0x351   : > { %v7455_v61 = vmax.f32 %v7267_v33, %v3662_v7  ;;  %v3663_v49 = vmax.f32 %v3184_v37, 0.0  ;;  %v3188_v20 = vadd.f32 %v3187_v18, %v6959_v55  ;;  %3435 = vmatprep.mubr.bf16.mxu0 %v5978_v17  ;;  %v2763_v3 = vpack.c.bf16 %v2688_v42, %v2687_v26 }
 0x352   : > { %v3189_v23 = vpop.f32.mrf.mxu0  ;;  %v2497_v7 = vadd.f32 %v7069_v28, %v7400_v62  ;;  %v2690_v18 = vmax.f32 %v2500_v6, 0.0  ;;  %v5828_v62 = vld [vmem:[%s8361_s7 + $0xe0] ss:$8 sps:$4 sm:$0xff]  }
 0x353   : > { %v7460_v14 = vmax.f32 %v7272_v44, %v3663_v49  ;;  %v3664_v52 = vmax.f32 %v3188_v20, 0.0  ;;  %v3190_v0 = vadd.f32 %v3189_v23, %v6962_v21 }
 0x354   : > { %v3191_v29 = vpop.f32.mrf.mxu0 }
 0x355   : > { %v7464_v46 = vmax.f32 %v7276_v41, %v3664_v52  ;;  %v3665_v33 = vmax.f32 %v3190_v0, 0.0  ;;  %v3192_v43 = vadd.f32 %v3191_v29, %v6959_v55  ;;  %v2689_v52 = vmax.f32 %v2497_v7, 0.0 }
 0x356   : > { %v3193_v12 = vpop.f32.mrf.mxu0 }
 0x357   : > { %v7469_v15 = vmax.f32 %v7281_v39, %v3665_v33  ;;  %v3666_v44 = vmax.f32 %v3192_v43, 0.0  ;;  %v3194_v63 = vadd.f32 %v3193_v12, %v6962_v21  ;;  %v2507_v39 = vpop.f32.mrf.mxu1  ;;  %v2764_v33 = vpack.c.bf16 %v2690_v18, %v2689_v52  ;;  %v7517_v52 = vld [vmem:[%s8358_s4] ss:$0 sm:$0xff] }
 0x358   : > { %v3197_v37 = vpop.f32.mrf.mxu0  ;;  %3436 = vmatmul.mubr.bf16.gmra.mxu0 %v2763_v3  ;;  %v2508_v43 = vadd.f32 %v7069_v28, %v2507_v39 }
 0x359   : > { %v7475_v41 = vmax.f32 %v7287_v27, %v3666_v44  ;;  %v3667_v10 = vmax.f32 %v3194_v63, 0.0  ;;  %v3198_v45 = vadd.f32 %v3197_v37, %v6959_v55  ;;  %3445 = vmatprep.mubr.bf16.mxu0 %v5978_v17  ;;  %v5830_v27 = vld [vmem:[%s8361_s7 + $0xe4] ss:$8 sps:$4 sm:$0xff]   ;;  %v7494_v3 = vpop.f32.mrf.mxu1 }
 0x35a   : > { %v3199_v49 = vpop.f32.mrf.mxu0  ;;  %4274 = vmatprep.subr.bf16.mxu1 %v5830_v27  ;;  %v2692_v18 = vmax.f32 %v2508_v43, 0.0 }
 0x35b   : > { %v7480_v20 = vmax.f32 %v7292_v25, %v3667_v10  ;;  %v3668_v42 = vmax.f32 %v3198_v45, 0.0  ;;  %v3200_v23 = vadd.f32 %v3199_v49, %v6962_v21  ;;  %4275 = vmatpush2.bf16.msra.mxu1 %v5828_v62  ;;  %v2520_v39 = vpop.f32.mrf.mxu1 }
 0x35c   : > { %v3201_v0 = vpop.f32.mrf.mxu0 }
 0x35d   : > { %v7490_v26 = vmax.f32 %v7302_v53, %v3668_v42  ;;  %v3669_v29 = vmax.f32 %v3200_v23, 0.0  ;;  %v3202_v25 = vadd.f32 %v3201_v0, %v6959_v55  ;;  %v2505_v53 = vadd.f32 %v7069_v28, %v2504_v19 }
 0x35e   : > { %v3203_v6 = vpop.f32.mrf.mxu0  ;;  %v2516_v0 = vadd.f32 %v7517_v52, %v5630_v35 }
 0x35f   : > { %v7497_v12 = vmax.f32 %v7309_v8, %v3669_v29  ;;  %v3670_v44 = vmax.f32 %v3202_v25, 0.0  ;;  %v3204_v63 = vadd.f32 %v3203_v6, %v6962_v21  ;;  %v2691_v28 = vmax.f32 %v2505_v53, 0.0  ;;  %v5634_v25 = vpop.f32.mrf.mxu1 }
 0x360   : > { %v3207_v7 = vpop.f32.mrf.mxu0  ;;  %3446 = vmatmul.mubr.bf16.gmra.mxu0 %v2764_v33  ;;  %v2513_v6 = vadd.f32 %v7517_v52, %v7447_v32  ;;  %v5831_v32 = vld [vmem:[%s8361_s7 + $0xd0] ss:$8 sps:$4 sm:$0xff]  }
 0x361   : > { %v7502_v37 = vmax.f32 %v7314_v4, %v3670_v44  ;;  %v3671_v10 = vmax.f32 %v3204_v63, 0.0  ;;  %v3208_v45 = vadd.f32 %v3207_v7, %v6959_v55  ;;  %3455 = vmatprep.mubr.bf16.mxu0 %v5978_v17  ;;  %v2694_v7 = vmax.f32 %v2516_v0, 0.0 }
 0x362   : > { %v3209_v49 = vpop.f32.mrf.mxu0 }
 0x363   : > { %v7507_v8 = vmax.f32 %v7319_v34, %v3671_v10  ;;  %v3672_v42 = vmax.f32 %v3208_v45, 0.0  ;;  %v3210_v23 = vadd.f32 %v3209_v49, %v6962_v21  ;;  %v2765_v34 = vpack.c.bf16 %v2692_v18, %v2691_v28 }
 0x364   : > { %v3211_v19 = vpop.f32.mrf.mxu0 }
 0x365   : > { %v7511_v62 = vmax.f32 %v7323_v30, %v3672_v42  ;;  %v3673_v4 = vmax.f32 %v3210_v23, 0.0  ;;  %v3212_v27 = vadd.f32 %v3211_v19, %v6959_v55  ;;  %v2693_v42 = vmax.f32 %v2513_v6, 0.0 }
 0x366   : > { %v3213_v29 = vpop.f32.mrf.mxu0 }
 0x367   : > { %v7521_v33 = vmax.f32 %v7328_v56, %v3673_v4  ;;  %v3674_v43 = vmax.f32 %v3212_v27, 0.0  ;;  %v3214_v30 = vadd.f32 %v3213_v29, %v6962_v21  ;;  %v2523_v56 = vpop.f32.mrf.mxu1  ;;  %v2766_v4 = vpack.c.bf16 %v2694_v7, %v2693_v42 }
 0x368   : > { %v3217_v44 = vpop.f32.mrf.mxu0  ;;  %3456 = vmatmul.mubr.bf16.gmra.mxu0 %v2765_v34  ;;  %v2524_v27 = vadd.f32 %v7517_v52, %v2523_v56 }
 0x369   : > { %v7527_v63 = vmax.f32 %v7334_v1, %v3674_v43  ;;  %v3675_v53 = vmax.f32 %v3214_v30, 0.0  ;;  %v3218_v35 = vadd.f32 %v3217_v44, %v6959_v55  ;;  %3465 = vmatprep.mubr.bf16.mxu0 %v5978_v17  ;;  %v5833_v1 = vld [vmem:[%s8361_s7 + $0xd4] ss:$8 sps:$4 sm:$0xff]   ;;  %v7546_v34 = vpop.f32.mrf.mxu1 }
 0x36a   : > { %v3219_v10 = vpop.f32.mrf.mxu0  ;;  %4276 = vmatprep.subr.bf16.mxu1 %v5833_v1  ;;  %v2696_v7 = vmax.f32 %v2524_v27, 0.0 }
 0x36b   : > { %v7532_v45 = vmax.f32 %v7339_v2, %v3675_v53  ;;  %v3676_v18 = vmax.f32 %v3218_v35, 0.0  ;;  %v3220_v49 = vadd.f32 %v3219_v10, %v6962_v21  ;;  %4277 = vmatpush2.bf16.msra.mxu1 %v5831_v32  ;;  %v2536_v56 = vpop.f32.mrf.mxu1 }
 0x36c   : > { %v3221_v23 = vpop.f32.mrf.mxu0 }
 0x36d   : > { %v7542_v28 = vmax.f32 %v7349_v38, %v3676_v18  ;;  %v3677_v19 = vmax.f32 %v3220_v49, 0.0  ;;  %v3222_v2 = vadd.f32 %v3221_v23, %v6959_v55  ;;  %v2521_v38 = vadd.f32 %v7517_v52, %v2520_v39 }
 0x36e   : > { %v3223_v0 = vpop.f32.mrf.mxu0  ;;  %v2532_v23 = vadd.f32 %v7517_v52, %v5634_v25 }
 0x36f   : > { %v7549_v29 = vmax.f32 %v7356_v22, %v3677_v19  ;;  %v3678_v43 = vmax.f32 %v3222_v2, 0.0  ;;  %v3224_v30 = vadd.f32 %v3223_v0, %v6962_v21  ;;  %v2695_v39 = vmax.f32 %v2521_v38, 0.0 }
 0x370   : > { %v3227_v6 = vpop.f32.mrf.mxu0  ;;  %3466 = vmatmul.mubr.bf16.gmra.mxu0 %v2766_v4  ;;  %v5638_v4 = vpop.f32.mrf.mxu1 }
 0x371   : > { %v7554_v44 = vmax.f32 %v7361_v5, %v3678_v43  ;;  %v3679_v53 = vmax.f32 %v3224_v30, 0.0  ;;  %v3228_v35 = vadd.f32 %v3227_v6, %v6959_v55  ;;  %3475 = vmatprep.mubr.bf16.mxu0 %v5978_v17  ;;  %v2767_v19 = vpack.c.bf16 %v2696_v7, %v2695_v39 }
 0x372   : > { %v3229_v10 = vpop.f32.mrf.mxu0  ;;  %v2529_v43 = vadd.f32 %v7517_v52, %v7494_v3  ;;  %v2698_v6 = vmax.f32 %v2532_v23, 0.0  ;;  %v5834_v3 = vld [vmem:[%s8361_s7 + $0xc0] ss:$8 sps:$4 sm:$0xff]  }
 0x373   : > { %v7559_v22 = vmax.f32 %v7366_v48, %v3679_v53  ;;  %v3680_v18 = vmax.f32 %v3228_v35, 0.0  ;;  %v3230_v49 = vadd.f32 %v3229_v10, %v6962_v21 }
 0x374   : > { %v3231_v32 = vpop.f32.mrf.mxu0 }
 0x375   : > { %v7563_v1 = vmax.f32 %v7370_v60, %v3680_v18  ;;  %v3681_v5 = vmax.f32 %v3230_v49, 0.0  ;;  %v3232_v42 = vadd.f32 %v3231_v32, %v6959_v55  ;;  %v2697_v18 = vmax.f32 %v2529_v43, 0.0 }
 0x376   : > { %v3233_v2 = vpop.f32.mrf.mxu0 }
 0x377   : > { %v7568_v27 = vmax.f32 %v7375_v13, %v3681_v5  ;;  %v3682_v48 = vmax.f32 %v3232_v42, 0.0  ;;  %v3234_v0 = vadd.f32 %v3233_v2, %v6962_v21  ;;  %v2539_v13 = vpop.f32.mrf.mxu1  ;;  %v2768_v5 = vpack.c.bf16 %v2698_v6, %v2697_v18 }
 0x378   : > { %v3237_v30 = vpop.f32.mrf.mxu0  ;;  %3476 = vmatmul.mubr.bf16.gmra.mxu0 %v2767_v19  ;;  %v2540_v42 = vadd.f32 %v7517_v52, %v2539_v13 }
 0x379   : > { %v7574_v60 = vmax.f32 %v7381_v47, %v3682_v48  ;;  %v3683_v38 = vmax.f32 %v3234_v0, 0.0  ;;  %v3238_v25 = vadd.f32 %v3237_v30, %v6959_v55  ;;  %3485 = vmatprep.mubr.bf16.mxu0 %v5978_v17  ;;  %v5836_v47 = vld [vmem:[%s8361_s7 + $0xc4] ss:$8 sps:$4 sm:$0xff]   ;;  %v7593_v19 = vpop.f32.mrf.mxu1 }
 0x37a   : > { %v3239_v53 = vpop.f32.mrf.mxu0  ;;  %4278 = vmatprep.subr.bf16.mxu1 %v5836_v47  ;;  %v2700_v6 = vmax.f32 %v2540_v42, 0.0 }
 0x37b   : > { %v7579_v35 = vmax.f32 %v7386_v57, %v3683_v38  ;;  %v3684_v7 = vmax.f32 %v3238_v25, 0.0  ;;  %v3240_v10 = vadd.f32 %v3239_v53, %v6962_v21  ;;  %4279 = vmatpush2.bf16.msra.mxu1 %v5834_v3  ;;  %v2552_v13 = vpop.f32.mrf.mxu1 }
 0x37c   : > { %v3241_v49 = vpop.f32.mrf.mxu0 }
 0x37d   : > { %v7589_v39 = vmax.f32 %v7396_v59, %v3684_v7  ;;  %v3685_v32 = vmax.f32 %v3240_v10, 0.0  ;;  %v3242_v57 = vadd.f32 %v3241_v49, %v6959_v55  ;;  %v2537_v59 = vadd.f32 %v7517_v52, %v2536_v56 }
 0x37e   : > { %v3243_v23 = vpop.f32.mrf.mxu0  ;;  %v2548_v49 = vadd.f32 %v7517_v52, %v5638_v4 }
 0x37f   : > { %v7596_v2 = vmax.f32 %v7403_v36, %v3685_v32  ;;  %v3686_v48 = vmax.f32 %v3242_v57, 0.0  ;;  %v3244_v0 = vadd.f32 %v3243_v23, %v6962_v21  ;;  %v2699_v56 = vmax.f32 %v2537_v59, 0.0 }
 0x380   : > { %v3247_v43 = vpop.f32.mrf.mxu0  ;;  %3486 = vmatmul.mubr.bf16.gmra.mxu0 %v2768_v5  ;;  %v5642_v5 = vpop.f32.mrf.mxu1 }
 0x381   : > { %v7601_v30 = vmax.f32 %v7408_v40, %v3686_v48  ;;  %v3687_v38 = vmax.f32 %v3244_v0, 0.0  ;;  %v3248_v25 = vadd.f32 %v3247_v43, %v6959_v55  ;;  %3495 = vmatprep.mubr.bf16.mxu0 %v5978_v17  ;;  %v2769_v32 = vpack.c.bf16 %v2700_v6, %v2699_v56 }
 0x382   : > { %v3249_v53 = vpop.f32.mrf.mxu0  ;;  %v2545_v48 = vadd.f32 %v7517_v52, %v7546_v34  ;;  %v2702_v43 = vmax.f32 %v2548_v49, 0.0  ;;  %v5837_v34 = vld [vmem:[%s8361_s7 + $0xb0] ss:$8 sps:$4 sm:$0xff]  }
 0x383   : > { %v7606_v36 = vmax.f32 %v7413_v54, %v3687_v38  ;;  %v3688_v7 = vmax.f32 %v3248_v25, 0.0  ;;  %v3250_v10 = vadd.f32 %v3249_v53, %v6962_v21 }
 0x384   : > { %v3251_v3 = vpop.f32.mrf.mxu0 }
 0x385   : > { %v7610_v47 = vmax.f32 %v7417_v11, %v3688_v7  ;;  %v3689_v40 = vmax.f32 %v3250_v10, 0.0  ;;  %v3252_v18 = vadd.f32 %v3251_v3, %v6959_v55  ;;  %v2701_v7 = vmax.f32 %v2545_v48, 0.0 }
 0x386   : > { %v3253_v57 = vpop.f32.mrf.mxu0 }
 0x387   : > { %v7615_v42 = vmax.f32 %v7422_v9, %v3689_v40  ;;  %v3690_v54 = vmax.f32 %v3252_v18, 0.0  ;;  %v3254_v23 = vadd.f32 %v3253_v57, %v6962_v21  ;;  %v2555_v9 = vpop.f32.mrf.mxu1  ;;  %v2770_v40 = vpack.c.bf16 %v2702_v43, %v2701_v7 }
 0x388   : > { %v3257_v0 = vpop.f32.mrf.mxu0  ;;  %3496 = vmatmul.mubr.bf16.gmra.mxu0 %v2769_v32  ;;  %v2556_v18 = vadd.f32 %v7517_v52, %v2555_v9 }
 0x389   : > { %v7621_v11 = vmax.f32 %v7428_v51, %v3690_v54  ;;  %v3691_v59 = vmax.f32 %v3254_v23, 0.0  ;;  %v3258_v4 = vadd.f32 %v3257_v0, %v6959_v55  ;;  %3505 = vmatprep.mubr.bf16.mxu0 %v5978_v17  ;;  %v5839_v51 = vld [vmem:[%s8361_s7 + $0xb4] ss:$8 sps:$4 sm:$0xff]   ;;  %v7640_v32 = vpop.f32.mrf.mxu1 }
 0x38a   : > { %v3259_v38 = vpop.f32.mrf.mxu0  ;;  %4280 = vmatprep.subr.bf16.mxu1 %v5839_v51  ;;  %v2704_v43 = vmax.f32 %v2556_v18, 0.0 }
 0x38b   : > { %v7626_v25 = vmax.f32 %v7433_v50, %v3691_v59  ;;  %v3692_v6 = vmax.f32 %v3258_v4, 0.0  ;;  %v3260_v53 = vadd.f32 %v3259_v38, %v6962_v21  ;;  %4281 = vmatpush2.bf16.msra.mxu1 %v5837_v34  ;;  %v2568_v9 = vpop.f32.mrf.mxu1 }
 0x38c   : > { %v3261_v10 = vpop.f32.mrf.mxu0 }
 0x38d   : > { %v7636_v56 = vmax.f32 %v7443_v16, %v3692_v6  ;;  %v3693_v3 = vmax.f32 %v3260_v53, 0.0  ;;  %v3262_v50 = vadd.f32 %v3261_v10, %v6959_v55  ;;  %v2553_v16 = vadd.f32 %v7517_v52, %v2552_v13 }
 0x38e   : > { %v3263_v49 = vpop.f32.mrf.mxu0  ;;  %v2564_v10 = vadd.f32 %v7517_v52, %v5642_v5 }
 0x38f   : > { %v7643_v57 = vmax.f32 %v7450_v24, %v3693_v3  ;;  %v3694_v54 = vmax.f32 %v3262_v50, 0.0  ;;  %v3264_v23 = vadd.f32 %v3263_v49, %v6962_v21  ;;  %v2703_v13 = vmax.f32 %v2553_v16, 0.0 }
 0x390   : > { %v3267_v48 = vpop.f32.mrf.mxu0  ;;  %3506 = vmatmul.mubr.bf16.gmra.mxu0 %v2770_v40  ;;  %v5646_v40 = vpop.f32.mrf.mxu1 }
 0x391   : > { %v7648_v0 = vmax.f32 %v7455_v61, %v3694_v54  ;;  %v3695_v59 = vmax.f32 %v3264_v23, 0.0  ;;  %v3268_v4 = vadd.f32 %v3267_v48, %v6959_v55  ;;  %3515 = vmatprep.mubr.bf16.mxu0 %v5978_v17  ;;  %v2771_v3 = vpack.c.bf16 %v2704_v43, %v2703_v13 }
 0x392   : > { %v3269_v38 = vpop.f32.mrf.mxu0  ;;  %v2561_v54 = vadd.f32 %v7517_v52, %v7593_v19  ;;  %v2706_v48 = vmax.f32 %v2564_v10, 0.0  ;;  %v5840_v19 = vld [vmem:[%s8361_s7 + $0xa0] ss:$8 sps:$4 sm:$0xff]  }
 0x393   : > { %v7653_v24 = vmax.f32 %v7460_v14, %v3695_v59  ;;  %v3696_v6 = vmax.f32 %v3268_v4, 0.0  ;;  %v3270_v53 = vadd.f32 %v3269_v38, %v6962_v21 }
 0x394   : > { %v3271_v34 = vpop.f32.mrf.mxu0 }
 0x395   : > { %v7657_v51 = vmax.f32 %v7464_v46, %v3696_v6  ;;  %v3697_v61 = vmax.f32 %v3270_v53, 0.0  ;;  %v3272_v7 = vadd.f32 %v3271_v34, %v6959_v55  ;;  %v2705_v6 = vmax.f32 %v2561_v54, 0.0 }
 0x396   : > { %v3273_v50 = vpop.f32.mrf.mxu0 }
 0x397   : > { %v7662_v18 = vmax.f32 %v7469_v15, %v3697_v61  ;;  %v3698_v14 = vmax.f32 %v3272_v7, 0.0  ;;  %v3274_v49 = vadd.f32 %v3273_v50, %v6962_v21  ;;  %v2571_v15 = vpop.f32.mrf.mxu1  ;;  %v2772_v61 = vpack.c.bf16 %v2706_v48, %v2705_v6 }
 0x398   : > { %v3277_v23 = vpop.f32.mrf.mxu0  ;;  %3516 = vmatmul.mubr.bf16.gmra.mxu0 %v2771_v3  ;;  %v2572_v7 = vadd.f32 %v7517_v52, %v2571_v15 }
 0x399   : > { %v7668_v46 = vmax.f32 %v7475_v41, %v3698_v14  ;;  %v3699_v16 = vmax.f32 %v3274_v49, 0.0  ;;  %v3278_v5 = vadd.f32 %v3277_v23, %v6959_v55  ;;  %3525 = vmatprep.mubr.bf16.mxu0 %v5978_v17  ;;  %v5842_v41 = vld [vmem:[%s8361_s7 + $0xa4] ss:$8 sps:$4 sm:$0xff]   ;;  %v2569_v49 = vadd.f32 %v7517_v52, %v2568_v9 }
 0x39a   : > { %v3279_v59 = vpop.f32.mrf.mxu0  ;;  %4282 = vmatprep.subr.bf16.mxu1 %v5842_v41  ;;  %v2580_v41 = vadd.f32 %v7517_v52, %v5646_v40 }
 0x39b   : > { %v7673_v4 = vmax.f32 %v7480_v20, %v3699_v16  ;;  %v3700_v43 = vmax.f32 %v3278_v5, 0.0  ;;  %v3280_v38 = vadd.f32 %v3279_v59, %v6962_v21  ;;  %4283 = vmatpush2.bf16.msra.mxu1 %v5840_v19  ;;  %v2708_v5 = vmax.f32 %v2572_v7, 0.0 }
 0x39c   : > { %v3281_v53 = vpop.f32.mrf.mxu0  ;;  %v2710_v40 = vmax.f32 %v2580_v41, 0.0 }
 0x39d   : > { %v7683_v13 = vmax.f32 %v7490_v26, %v3700_v43  ;;  %v3701_v34 = vmax.f32 %v3280_v38, 0.0  ;;  %v3282_v20 = vadd.f32 %v3281_v53, %v6959_v55  ;;  %v2707_v43 = vmax.f32 %v2569_v49, 0.0 }
 0x39e   : > { %v3283_v10 = vpop.f32.mrf.mxu0 }
 0x39f   : > { %v7688_v3 = vmax.f32 %v7497_v12, %v3701_v34  ;;  %v3702_v50 = vmax.f32 %v3282_v20, 0.0  ;;  %v3284_v14 = vadd.f32 %v3283_v10, %v6962_v21  ;;  %v2773_v6 = vpack.c.bf16 %v2708_v5, %v2707_v43 }
 0x3a0   : > { %v3287_v54 = vpop.f32.mrf.mxu0  ;;  %3526 = vmatmul.mubr.bf16.gmra.mxu0 %v2772_v61  ;;  %v2577_v61 = vadd.f32 %v7517_v52, %v7640_v32  ;;  %v5843_v52 = vld [vmem:[%s8361_s7 + $0x90] ss:$8 sps:$4 sm:$0xff]  }
 0x3a1   : > { %v7693_v26 = vmax.f32 %v7502_v37, %v3702_v50  ;;  %v3703_v23 = vmax.f32 %v3284_v14, 0.0  ;;  %v3288_v16 = vadd.f32 %v3287_v54, %v6959_v55  ;;  %3535 = vmatprep.mubr.bf16.mxu0 %v5978_v17 }
 0x3a2   : > { %v3289_v48 = vpop.f32.mrf.mxu0  ;;  %v2709_v32 = vmax.f32 %v2577_v61, 0.0 }
 0x3a3   : > { %v7698_v12 = vmax.f32 %v7507_v8, %v3703_v23  ;;  %v3704_v59 = vmax.f32 %v3288_v16, 0.0  ;;  %v3290_v15 = vadd.f32 %v3289_v48, %v6962_v21 }
 0x3a4   : > { %v3291_v9 = vpop.f32.mrf.mxu0  ;;  %v2774_v5 = vpack.c.bf16 %v2710_v40, %v2709_v32 }
 0x3a5   : > { %v7702_v38 = vmax.f32 %v7511_v62, %v3704_v59  ;;  %v3705_v37 = vmax.f32 %v3290_v15, 0.0  ;;  %v3292_v19 = vadd.f32 %v3291_v9, %v6959_v55 }
 0x3a6   : > { %v3293_v53 = vpop.f32.mrf.mxu0 }
 0x3a7   : > { %v7707_v34 = vmax.f32 %v7521_v33, %v3705_v37  ;;  %v3706_v8 = vmax.f32 %v3292_v19, 0.0  ;;  %v3294_v20 = vadd.f32 %v3293_v53, %v6962_v21 }
 0x3a8   : > { %v3297_v7 = vpop.f32.mrf.mxu0  ;;  %3536 = vmatmul.mubr.bf16.gmra.mxu0 %v2773_v6 }
 0x3a9   : > { %v7713_v62 = vmax.f32 %v7527_v63, %v3706_v8  ;;  %v3707_v10 = vmax.f32 %v3294_v20, 0.0  ;;  %v3298_v50 = vadd.f32 %v3297_v7, %v6959_v55  ;;  %3545 = vmatprep.mubr.bf16.mxu0 %v5978_v17  ;;  %v5845_v63 = vld [vmem:[%s8361_s7 + $0x94] ss:$8 sps:$4 sm:$0xff]  }
 0x3aa   : > { %v3299_v14 = vpop.f32.mrf.mxu0  ;;  %4284 = vmatprep.subr.bf16.mxu1 %v5845_v63 }
 0x3ab   : > { %v7718_v33 = vmax.f32 %v7532_v45, %v3707_v10  ;;  %v3708_v49 = vmax.f32 %v3298_v50, 0.0  ;;  %v3300_v54 = vadd.f32 %v3299_v14, %v6962_v21  ;;  %4285 = vmatpush2.bf16.msra.mxu1 %v5843_v52 }
 0x3ac   : > { %v3301_v23 = vpop.f32.mrf.mxu0 }
 0x3ad   : > { %v7728_v17 = vmax.f32 %v7542_v28, %v3708_v49  ;;  %v3709_v16 = vmax.f32 %v3300_v54, 0.0  ;;  %v3302_v45 = vadd.f32 %v3301_v23, %v6959_v55  ;;  %v5848_v23 = vld [vmem:[%s8361_s7 + $0x84] ss:$8 sps:$4 sm:$0xff]  }
 0x3ae   : > { %v3303_v48 = vpop.f32.mrf.mxu0  ;;  %4286 = vmatprep.subr.bf16.mxu1 %v5848_v23 }
 0x3af   : > { %v7732_v59 = vmax.f32 %v7549_v29, %v3709_v16  ;;  %v3710_v15 = vmax.f32 %v3302_v45, 0.0  ;;  %v3304_v43 = vadd.f32 %v3303_v48, %v6962_v21 }
 0x3b0   : > { %v3307_v9 = vpop.f32.mrf.mxu0  ;;  %3546 = vmatmul.mubr.bf16.gmra.mxu0 %v2774_v5 }
 0x3b1   : > { %v7736_v37 = vmax.f32 %v7554_v44, %v3710_v15  ;;  %v3711_v28 = vmax.f32 %v3304_v43, 0.0  ;;  %v3308_v19 = vadd.f32 %v3307_v9, %v6959_v55 }
 0x3b2   : > { %v3309_v41 = vpop.f32.mrf.mxu0 }
 0x3b3   : > { %v7740_v6 = vmax.f32 %v7559_v22, %v3711_v28  ;;  %v3712_v53 = vmax.f32 %v3308_v19, 0.0  ;;  %v3310_v8 = vadd.f32 %v3309_v41, %v6962_v21 }
 0x3b4   : > { %v3311_v29 = vpop.f32.mrf.mxu0 }
 0x3b5   : > { %v7744_v20 = vmax.f32 %v7563_v1, %v3712_v53  ;;  %v3713_v61 = vmax.f32 %v3310_v8, 0.0  ;;  %v3312_v7 = vadd.f32 %v3311_v29, %v6959_v55 }
 0x3b6   : > { %v3313_v10 = vpop.f32.mrf.mxu0 }
 0x3b7   : > { %v7748_v44 = vmax.f32 %v7568_v27, %v3713_v61  ;;  %v3714_v50 = vmax.f32 %v3312_v7, 0.0  ;;  %v3314_v40 = vadd.f32 %v3313_v10, %v6962_v21  ;;  %v5846_v27 = vld [vmem:[%s8361_s7 + $0x80] ss:$8 sps:$4 sm:$0xff]  }
 0x3b8   : > { %v3317_v14 = vpop.f32.mrf.mxu0  ;;  %4287 = vmatpush2.bf16.msra.mxu1 %v5846_v27 }
 0x3b9   : > { %v7752_v22 = vmax.f32 %v7574_v60, %v3714_v50  ;;  %v3715_v49 = vmax.f32 %v3314_v40, 0.0  ;;  %v3318_v54 = vadd.f32 %v3317_v14, %v6959_v55 }
 0x3ba   : > { %v3319_v52 = vpop.f32.mrf.mxu0 }
 0x3bb   : > { %v7756_v1 = vmax.f32 %v7579_v35, %v3715_v49  ;;  %v3716_v63 = vmax.f32 %v3318_v54, 0.0  ;;  %v3320_v32 = vadd.f32 %v3319_v52, %v6962_v21 }
 0x3bc   : > { %v3321_v60 = vpop.f32.mrf.mxu0 }
 0x3bd   : > { %v7766_v16 = vmax.f32 %v7589_v39, %v3716_v63  ;;  %v3717_v45 = vmax.f32 %v3320_v32, 0.0  ;;  %v3322_v5 = vadd.f32 %v3321_v60, %v6959_v55 }
 0x3be   : > { %v3323_v35 = vpop.f32.mrf.mxu0 }
 0x3bf   : > { %v7770_v48 = vmax.f32 %v7596_v2, %v3717_v45  ;;  %v3718_v15 = vmax.f32 %v3322_v5, 0.0  ;;  %v3324_v43 = vadd.f32 %v3323_v35, %v6962_v21 }
 0x3c0   : > { %v3327_v9 = vpop.f32.mrf.mxu0 }
 0x3c1   : > { %v7774_v28 = vmax.f32 %v7601_v30, %v3718_v15  ;;  %v3719_v19 = vmax.f32 %v3324_v43, 0.0  ;;  %v3328_v39 = vadd.f32 %v3327_v9, %v6959_v55 }
 0x3c2   : > { %v3329_v41 = vpop.f32.mrf.mxu0 }
 0x3c3   : > { %v7778_v53 = vmax.f32 %v7606_v36, %v3719_v19  ;;  %v3720_v8 = vmax.f32 %v3328_v39, 0.0  ;;  %v3330_v29 = vadd.f32 %v3329_v41, %v6962_v21 }
 0x3c4   : > { %v3331_v61 = vpop.f32.mrf.mxu0 }
 0x3c5   : > { %v7782_v2 = vmax.f32 %v7610_v47, %v3720_v8  ;;  %v3721_v7 = vmax.f32 %v3330_v29, 0.0  ;;  %v3332_v10 = vadd.f32 %v3331_v61, %v6959_v55 }
 0x3c6   : > { %v3333_v50 = vpop.f32.mrf.mxu0 }
 0x3c7   : > { %v7786_v30 = vmax.f32 %v7615_v42, %v3721_v7  ;;  %v3722_v40 = vmax.f32 %v3332_v10, 0.0  ;;  %v3334_v14 = vadd.f32 %v3333_v50, %v6962_v21 }
 0x3c8   : > { %v3337_v49 = vpop.f32.mrf.mxu0 }
 0x3c9   : > { %v7790_v36 = vmax.f32 %v7621_v11, %v3722_v40  ;;  %v3723_v54 = vmax.f32 %v3334_v14, 0.0  ;;  %v3338_v52 = vadd.f32 %v3337_v49, %v6959_v55 }
 0x3ca   : > { %v3339_v63 = vpop.f32.mrf.mxu0 }
 0x3cb   : > { %v7794_v47 = vmax.f32 %v7626_v25, %v3723_v54  ;;  %v3724_v32 = vmax.f32 %v3338_v52, 0.0  ;;  %v3340_v27 = vadd.f32 %v3339_v63, %v6962_v21 }
 0x3cc   : > { %v3341_v23 = vpop.f32.mrf.mxu0 }
 0x3cd   : > { %v7798_v42 = vmax.f32 %v7636_v56, %v3724_v32  ;;  %v3725_v60 = vmax.f32 %v3340_v27, 0.0  ;;  %v3342_v45 = vadd.f32 %v3341_v23, %v6959_v55 }
 0x3ce   : > { %v3343_v5 = vpop.f32.mrf.mxu0 }
 0x3cf   : > { %v7802_v11 = vmax.f32 %v7643_v57, %v3725_v60  ;;  %v3726_v35 = vmax.f32 %v3342_v45, 0.0  ;;  %v3344_v15 = vadd.f32 %v3343_v5, %v6962_v21 }
 0x3d0   : > { %v3347_v43 = vpop.f32.mrf.mxu0 }
 0x3d1   : > { %v7806_v25 = vmax.f32 %v7648_v0, %v3726_v35  ;;  %v3727_v9 = vmax.f32 %v3344_v15, 0.0  ;;  %v3348_v19 = vadd.f32 %v3347_v43, %v6959_v55 }
 0x3d2   : > { %v3349_v39 = vpop.f32.mrf.mxu0 }
 0x3d3   : > { %v7810_v56 = vmax.f32 %v7653_v24, %v3727_v9  ;;  %v3728_v41 = vmax.f32 %v3348_v19, 0.0  ;;  %v3350_v8 = vadd.f32 %v3349_v39, %v6962_v21 }
 0x3d4   : > { %v3351_v29 = vpop.f32.mrf.mxu0 }
 0x3d5   : > { %v7814_v57 = vmax.f32 %v7657_v51, %v3728_v41  ;;  %v3729_v61 = vmax.f32 %v3350_v8, 0.0  ;;  %v3352_v7 = vadd.f32 %v3351_v29, %v6959_v55 }
 0x3d6   : > { %v3353_v10 = vpop.f32.mrf.mxu0 }
 0x3d7   : > { %v7818_v0 = vmax.f32 %v7662_v18, %v3729_v61  ;;  %v3730_v50 = vmax.f32 %v3352_v7, 0.0  ;;  %v3354_v40 = vadd.f32 %v3353_v10, %v6962_v21 }
 0x3d8   : > { %v3357_v14 = vpop.f32.mrf.mxu0 }
 0x3d9   : > { %v7822_v24 = vmax.f32 %v7668_v46, %v3730_v50  ;;  %v3731_v49 = vmax.f32 %v3354_v40, 0.0  ;;  %v3358_v54 = vadd.f32 %v3357_v14, %v6959_v55 }
 0x3da   : > { %v3359_v52 = vpop.f32.mrf.mxu0 }
 0x3db   : > { %v7826_v51 = vmax.f32 %v7673_v4, %v3731_v49  ;;  %v3732_v63 = vmax.f32 %v3358_v54, 0.0  ;;  %v3360_v32 = vadd.f32 %v3359_v52, %v6962_v21 }
 0x3dc   : > { %v3361_v27 = vpop.f32.mrf.mxu0 }
 0x3dd   : > { %v7830_v18 = vmax.f32 %v7683_v13, %v3732_v63  ;;  %v3733_v23 = vmax.f32 %v3360_v32, 0.0  ;;  %v3362_v60 = vadd.f32 %v3361_v27, %v6959_v55 }
 0x3de   : > { %v3363_v45 = vpop.f32.mrf.mxu0 }
 0x3df   : > { %v7834_v46 = vmax.f32 %v7688_v3, %v3733_v23  ;;  %v3734_v5 = vmax.f32 %v3362_v60, 0.0  ;;  %v3364_v35 = vadd.f32 %v3363_v45, %v6962_v21 }
 0x3e0   : > { %v3367_v15 = vpop.f32.mrf.mxu0 }
 0x3e1   : > { %v7838_v4 = vmax.f32 %v7693_v26, %v3734_v5  ;;  %v3735_v43 = vmax.f32 %v3364_v35, 0.0  ;;  %v3368_v9 = vadd.f32 %v3367_v15, %v6959_v55 }
 0x3e2   : > { %v3369_v19 = vpop.f32.mrf.mxu0 }
 0x3e3   : > { %v7842_v13 = vmax.f32 %v7698_v12, %v3735_v43  ;;  %v3736_v39 = vmax.f32 %v3368_v9, 0.0  ;;  %v3370_v41 = vadd.f32 %v3369_v19, %v6962_v21 }
 0x3e4   : > { %v3371_v8 = vpop.f32.mrf.mxu0 }
 0x3e5   : > { %v7846_v3 = vmax.f32 %v7702_v38, %v3736_v39  ;;  %v3737_v29 = vmax.f32 %v3370_v41, 0.0  ;;  %v3372_v61 = vadd.f32 %v3371_v8, %v6959_v55 }
 0x3e6   : > { %v3373_v7 = vpop.f32.mrf.mxu0 }
 0x3e7   : > { %v7850_v26 = vmax.f32 %v7707_v34, %v3737_v29  ;;  %v3738_v10 = vmax.f32 %v3372_v61, 0.0  ;;  %v3374_v50 = vadd.f32 %v3373_v7, %v6962_v21 }
 0x3e8   : > { %v3377_v40 = vpop.f32.mrf.mxu0 }
 0x3e9   : > { %v7854_v12 = vmax.f32 %v7713_v62, %v3738_v10  ;;  %v3739_v14 = vmax.f32 %v3374_v50, 0.0  ;;  %v3378_v49 = vadd.f32 %v3377_v40, %v6959_v55 }
 0x3ea   : > { %v3379_v54 = vpop.f32.mrf.mxu0 }
 0x3eb   : > { %v7858_v38 = vmax.f32 %v7718_v33, %v3739_v14  ;;  %v3740_v52 = vmax.f32 %v3378_v49, 0.0  ;;  %v3380_v63 = vadd.f32 %v3379_v54, %v6962_v21 }
 0x3ec   : > { %v3381_v32 = vpop.f32.mrf.mxu0 }
 0x3ed   : > { %v7862_v34 = vmax.f32 %v7728_v17, %v3740_v52  ;;  %v3741_v27 = vmax.f32 %v3380_v63, 0.0  ;;  %v3382_v23 = vadd.f32 %v3381_v32, %v6959_v55 }
 0x3ee   : > { %v3383_v60 = vpop.f32.mrf.mxu0 }
 0x3ef   : > { %v7866_v62 = vmax.f32 %v7732_v59, %v3741_v27  ;;  %v3742_v45 = vmax.f32 %v3382_v23, 0.0  ;;  %v3384_v5 = vadd.f32 %v3383_v60, %v6962_v21 }
 0x3f0   : > { %v3387_v35 = vpop.f32.mrf.mxu0 }
 0x3f1   : > { %v7870_v33 = vmax.f32 %v7736_v37, %v3742_v45  ;;  %v3743_v15 = vmax.f32 %v3384_v5, 0.0  ;;  %v3388_v43 = vadd.f32 %v3387_v35, %v6959_v55 }
 0x3f2   : > { %v3389_v9 = vpop.f32.mrf.mxu0 }
 0x3f3   : > { %v7874_v17 = vmax.f32 %v7740_v6, %v3743_v15  ;;  %v3744_v19 = vmax.f32 %v3388_v43, 0.0  ;;  %v3390_v39 = vadd.f32 %v3389_v9, %v6962_v21 }
 0x3f4   : > { %v3391_v41 = vpop.f32.mrf.mxu0 }
 0x3f5   : > { %v7878_v59 = vmax.f32 %v7744_v20, %v3744_v19  ;;  %v3745_v8 = vmax.f32 %v3390_v39, 0.0  ;;  %v3392_v29 = vadd.f32 %v3391_v41, %v6959_v55 }
 0x3f6   : > { %v3393_v61 = vpop.f32.mrf.mxu0 }
 0x3f7   : > { %v7882_v37 = vmax.f32 %v7748_v44, %v3745_v8  ;;  %v3746_v7 = vmax.f32 %v3392_v29, 0.0  ;;  %v3394_v10 = vadd.f32 %v3393_v61, %v6962_v21 }
 0x3f8   : > { %v3397_v50 = vpop.f32.mrf.mxu0 }
 0x3f9   : > { %v7886_v6 = vmax.f32 %v7752_v22, %v3746_v7  ;;  %v3747_v40 = vmax.f32 %v3394_v10, 0.0  ;;  %v3398_v14 = vadd.f32 %v3397_v50, %v6959_v55 }
 0x3fa   : > { %v3399_v49 = vpop.f32.mrf.mxu0 }
 0x3fb   : > { %v7890_v20 = vmax.f32 %v7756_v1, %v3747_v40  ;;  %v3748_v54 = vmax.f32 %v3398_v14, 0.0  ;;  %v3400_v52 = vadd.f32 %v3399_v49, %v6962_v21  ;;  %v5851_v1 = vld [vmem:[%s8363_s9 + $0x74] ss:$8 sps:$4 sm:$0xff]  }
 0x3fc   : > { %v3401_v63 = vpop.f32.mrf.mxu0  ;;  %4621 = vmatprep.subr.bf16.mxu1 %v5851_v1 }
 0x3fd   : > { %v7894_v44 = vmax.f32 %v7766_v16, %v3748_v54  ;;  %v3749_v32 = vmax.f32 %v3400_v52, 0.0  ;;  %v3402_v27 = vadd.f32 %v3401_v63, %v6959_v55 }
 0x3fe   : > { %v7897_v23 = vpop.f32.mrf.mxu0 }
 0x3ff   : > { %v7900_v22 = vmax.f32 %v7770_v48, %v3749_v32  ;;  %v3750_v60 = vmax.f32 %v3402_v27, 0.0 }
 0x400   : > { %v3407_v45 = vpop.f32.mrf.mxu0 }
 0x401   : > { %v7906_v5 = vmax.f32 %v7774_v28, %v3750_v60  ;;  %v3408_v16 = vadd.f32 %v3407_v45, %v6959_v55 }
 0x402   : > { %v3409_v35 = vpop.f32.mrf.mxu0 }
 0x403   : > { %v3752_v15 = vmax.f32 %v3408_v16, 0.0  ;;  %v3410_v43 = vadd.f32 %v3409_v35, %v6962_v21 }
 0x404   : > { %v3411_v9 = vpop.f32.mrf.mxu0 }
 0x405   : > { %v7911_v48 = vmax.f32 %v7782_v2, %v3752_v15  ;;  %v3753_v19 = vmax.f32 %v3410_v43, 0.0  ;;  %v3412_v39 = vadd.f32 %v3411_v9, %v6959_v55 }
 0x406   : > { %v7914_v41 = vpop.f32.mrf.mxu0 }
 0x407   : > { %v7917_v8 = vmax.f32 %v7786_v30, %v3753_v19  ;;  %v3754_v28 = vmax.f32 %v3412_v39, 0.0 }
 0x408   : > { %v3417_v29 = vpop.f32.mrf.mxu0 }
 0x409   : > { %v7920_v61 = vmax.f32 %v7790_v36, %v3754_v28  ;;  %v3418_v7 = vadd.f32 %v3417_v29, %v6959_v55 }
 0x40a   : > { %v3419_v10 = vpop.f32.mrf.mxu0 }
 0x40b   : > { %v3756_v50 = vmax.f32 %v3418_v7, 0.0  ;;  %v3420_v2 = vadd.f32 %v3419_v10, %v6962_v21 }
 0x40c   : > { %v3421_v40 = vpop.f32.mrf.mxu0 }
 0x40d   : > { %v7925_v14 = vmax.f32 %v7798_v42, %v3756_v50  ;;  %v3757_v49 = vmax.f32 %v3420_v2, 0.0  ;;  %v3422_v54 = vadd.f32 %v3421_v40, %v6959_v55 }
 0x40e   : > { %v7928_v30 = vpop.f32.mrf.mxu0 }
 0x40f   : > { %v7931_v52 = vmax.f32 %v7802_v11, %v3757_v49  ;;  %v3758_v36 = vmax.f32 %v3422_v54, 0.0 }
 0x410   : > { %v3427_v63 = vpop.f32.mrf.mxu0 }
 0x411   : > { %v7934_v32 = vmax.f32 %v7806_v25, %v3758_v36  ;;  %v3428_v27 = vadd.f32 %v3427_v63, %v6959_v55 }
 0x412   : > { %v3429_v60 = vpop.f32.mrf.mxu0 }
 0x413   : > { %v3760_v45 = vmax.f32 %v3428_v27, 0.0  ;;  %v3430_v42 = vadd.f32 %v3429_v60, %v6962_v21 }
 0x414   : > { %v3431_v1 = vpop.f32.mrf.mxu0 }
 0x415   : > { %v7939_v16 = vmax.f32 %v7814_v57, %v3760_v45  ;;  %v3761_v35 = vmax.f32 %v3430_v42, 0.0  ;;  %v3432_v15 = vadd.f32 %v3431_v1, %v6959_v55 }
 0x416   : > { %v7942_v11 = vpop.f32.mrf.mxu0 }
 0x417   : > { %v7945_v43 = vmax.f32 %v7818_v0, %v3761_v35  ;;  %v3762_v25 = vmax.f32 %v3432_v15, 0.0 }
 0x418   : > { %v3437_v9 = vpop.f32.mrf.mxu0 }
 0x419   : > { %v7948_v19 = vmax.f32 %v7822_v24, %v3762_v25  ;;  %v3438_v39 = vadd.f32 %v3437_v9, %v6959_v55 }
 0x41a   : > { %v3439_v28 = vpop.f32.mrf.mxu0 }
 0x41b   : > { %v3764_v29 = vmax.f32 %v3438_v39, 0.0  ;;  %v3440_v57 = vadd.f32 %v3439_v28, %v6962_v21 }
 0x41c   : > { %v3441_v7 = vpop.f32.mrf.mxu0 }
 0x41d   : > { %v7953_v10 = vmax.f32 %v7830_v18, %v3764_v29  ;;  %v3765_v50 = vmax.f32 %v3440_v57, 0.0  ;;  %v3442_v2 = vadd.f32 %v3441_v7, %v6959_v55 }
 0x41e   : > { %v7956_v0 = vpop.f32.mrf.mxu0 }
 0x41f   : > { %v7959_v40 = vmax.f32 %v7834_v46, %v3765_v50  ;;  %v3766_v24 = vmax.f32 %v3442_v2, 0.0 }
 0x420   : > { %v3447_v49 = vpop.f32.mrf.mxu0 }
 0x421   : > { %v7962_v54 = vmax.f32 %v7838_v4, %v3766_v24  ;;  %v3448_v36 = vadd.f32 %v3447_v49, %v6959_v55 }
 0x422   : > { %v3449_v63 = vpop.f32.mrf.mxu0 }
 0x423   : > { %v3768_v27 = vmax.f32 %v3448_v36, 0.0  ;;  %v3450_v18 = vadd.f32 %v3449_v63, %v6962_v21 }
 0x424   : > { %v3451_v60 = vpop.f32.mrf.mxu0 }
 0x425   : > { %v7967_v45 = vmax.f32 %v7846_v3, %v3768_v27  ;;  %v3769_v42 = vmax.f32 %v3450_v18, 0.0  ;;  %v3452_v1 = vadd.f32 %v3451_v60, %v6959_v55 }
 0x426   : > { %v7970_v46 = vpop.f32.mrf.mxu0 }
 0x427   : > { %v7973_v35 = vmax.f32 %v7850_v26, %v3769_v42  ;;  %v3770_v4 = vmax.f32 %v3452_v1, 0.0 }
 0x428   : > { %v3457_v15 = vpop.f32.mrf.mxu0 }
 0x429   : > { %v7976_v25 = vmax.f32 %v7854_v12, %v3770_v4  ;;  %v3458_v9 = vadd.f32 %v3457_v15, %v6959_v55  ;;  %v3404_v15 = vadd.f32 %v7897_v23, %v6962_v21 }
 0x42a   : > { %v3459_v39 = vpop.f32.mrf.mxu0 }
 0x42b   : > { %v3772_v28 = vmax.f32 %v3458_v9, 0.0  ;;  %v3460_v3 = vadd.f32 %v3459_v39, %v6962_v21 }
 0x42c   : > { %v3461_v29 = vpop.f32.mrf.mxu0 }
 0x42d   : > { %v7981_v57 = vmax.f32 %v7862_v34, %v3772_v28  ;;  %v3773_v7 = vmax.f32 %v3460_v3, 0.0  ;;  %v3462_v50 = vadd.f32 %v3461_v29, %v6959_v55  ;;  %v3751_v29 = vmax.f32 %v3404_v15, 0.0 }
 0x42e   : > { %v7984_v26 = vpop.f32.mrf.mxu0 }
 0x42f   : > { %v7987_v2 = vmax.f32 %v7866_v62, %v3773_v7  ;;  %v3774_v12 = vmax.f32 %v3462_v50, 0.0  ;;  %v3838_v23 = vmax.f32 %v7778_v53, %v3751_v29 }
 0x430   : > { %v3467_v24 = vpop.f32.mrf.mxu0 }
 0x431   : > { %v7990_v49 = vmax.f32 %v7870_v33, %v3774_v12  ;;  %v3468_v36 = vadd.f32 %v3467_v24, %v6959_v55 }
 0x432   : > { %v3469_v63 = vpop.f32.mrf.mxu0 }
 0x433   : > { %v3776_v27 = vmax.f32 %v3468_v36, 0.0  ;;  %v3470_v34 = vadd.f32 %v3469_v63, %v6962_v21 }
 0x434   : > { %v3471_v18 = vpop.f32.mrf.mxu0 }
 0x435   : > { %v7995_v60 = vmax.f32 %v7878_v59, %v3776_v27  ;;  %v3777_v42 = vmax.f32 %v3470_v34, 0.0  ;;  %v3472_v1 = vadd.f32 %v3471_v18, %v6959_v55 }
 0x436   : > { %v7998_v62 = vpop.f32.mrf.mxu0 }
 0x437   : > { %v8001_v4 = vmax.f32 %v7882_v37, %v3777_v42  ;;  %v3778_v33 = vmax.f32 %v3472_v1, 0.0 }
 0x438   : > { %v3477_v9 = vpop.f32.mrf.mxu0 }
 0x439   : > { %v8006_v39 = vmax.f32 %v7886_v6, %v3778_v33  ;;  %v3478_v28 = vadd.f32 %v3477_v9, %v6959_v55  ;;  %v3414_v6 = vadd.f32 %v7914_v41, %v6962_v21 }
 0x43a   : > { %v3479_v59 = vpop.f32.mrf.mxu0 }
 0x43b   : > { %v3480_v3 = vadd.f32 %v3479_v59, %v6962_v21  ;;  %v3780_v50 = vmax.f32 %v3478_v28, 0.0 }
 0x43c   : > { %v3481_v7 = vpop.f32.mrf.mxu0 }
 0x43d   : > { %v3482_v12 = vadd.f32 %v3481_v7, %v6959_v55  ;;  %v3781_v24 = vmax.f32 %v3480_v3, 0.0  ;;  %v3818_v34 = vmax.f32 %v7894_v44, %v3780_v50  ;;  %v3755_v3 = vmax.f32 %v3414_v6, 0.0  ;;  %v5849_v44 = vld [vmem:[%s8363_s9 + $0x70] ss:$8 sps:$4 sm:$0xff]   ;;  %v5854_v50 = vld [vmem:[%s8363_s9 + $0x64] ss:$8 sps:$4 sm:$0xff]  }
 0x43e   : > { %v3483_v37 = vpop.f32.mrf.mxu0 }
 0x43f   : > { %v3782_v36 = vmax.f32 %v3482_v12, 0.0  ;;  %v3484_v63 = vadd.f32 %v3483_v37, %v6962_v21  ;;  %v3825_v15 = vmax.f32 %v7900_v22, %v3781_v24  ;;  %v3866_v24 = vmax.f32 %v7794_v47, %v3755_v3  ;;  %v5857_v47 = vld [vmem:[%s8363_s9 + $0x54] ss:$8 sps:$4 sm:$0xff]   ;;  %v5855_v3 = vld [vmem:[%s8363_s9 + $0x50] ss:$8 sps:$4 sm:$0xff]  }
 0x440   : > { %v3487_v27 = vpop.f32.mrf.mxu0 }
 0x441   : > { %v3832_v18 = vmax.f32 %v7906_v5, %v3782_v36  ;;  %v3783_v42 = vmax.f32 %v3484_v63, 0.0  ;;  %v3488_v1 = vadd.f32 %v3487_v27, %v6959_v55  ;;  %v3424_v36 = vadd.f32 %v7928_v30, %v6962_v21 }
 0x442   : > { %v3489_v33 = vpop.f32.mrf.mxu0 }
 0x443   : > { %v4036_v9 = vpack.c.bf16 %v3832_v18, %v3818_v34  ;;  %v3839_v28 = vmax.f32 %v3838_v23, %v3783_v42  ;;  %v3490_v59 = vadd.f32 %v3489_v33, %v6962_v21  ;;  %v3784_v29 = vmax.f32 %v3488_v1, 0.0  ;;  %v5852_v18 = vld [vmem:[%s8363_s9 + $0x60] ss:$8 sps:$4 sm:$0xff]  }
 0x444   : > { %v3491_v53 = vpop.f32.mrf.mxu0  ;;  %v3759_v33 = vmax.f32 %v3424_v36, 0.0  ;;  %v5858_v36 = vld [vmem:[%s8363_s9 + $0x40] ss:$8 sps:$4 sm:$0xff]  }
 0x445   : > { %v3492_v41 = vadd.f32 %v3491_v53, %v6959_v55  ;;  %v4037_v7 = vpack.c.bf16 %v3839_v28, %v3825_v15  ;;  %v3785_v22 = vmax.f32 %v3490_v59, 0.0  ;;  %v3846_v23 = vmax.f32 %v7911_v48, %v3784_v29 }
 0x446   : > { %v3493_v5 = vpop.f32.mrf.mxu0 }
 0x447   : > { %v3786_v12 = vmax.f32 %v3492_v41, 0.0  ;;  %v3494_v37 = vadd.f32 %v3493_v5, %v6962_v21  ;;  %4288 = vmatprep.mubr.bf16.mxu1 %v4037_v7  ;;  %v3853_v30 = vmax.f32 %v7917_v8, %v3785_v22  ;;  %v5860_v8 = vld [vmem:[%s8363_s9 + $0x44] ss:$8 sps:$4 sm:$0xff]   ;;  %v3434_v5 = vadd.f32 %v7942_v11, %v6962_v21 }
 0x448   : > { %v3497_v63 = vpop.f32.mrf.mxu0  ;;  %4289 = vmatmul.mubr.bf16.vlgmr.msra.gmra.mxu1 %v4036_v9 }
 0x449   : > { %v3860_v6 = vmax.f32 %v7920_v61, %v3786_v12  ;;  %v3787_v27 = vmax.f32 %v3494_v37, 0.0  ;;  %v3498_v34 = vadd.f32 %v3497_v63, %v6959_v55  ;;  %4622 = vmatpush1.bf16.msra.mxu1 %v5849_v44  ;;  %v3894_v44 = vmax.f32 %v7810_v56, %v3759_v33  ;;  %v5863_v56 = vld [vmem:[%s8363_s9 + $0x34] ss:$8 sps:$4 sm:$0xff]  }
 0x44a   : > { %v3499_v42 = vpop.f32.mrf.mxu0  ;;  %4623 = vmatprep.subr.bf16.mxu1 %v5854_v50 }
 0x44b   : > { %v4038_v1 = vpack.c.bf16 %v3860_v6, %v3846_v23  ;;  %v3867_v48 = vmax.f32 %v3866_v24, %v3787_v27  ;;  %v3500_v61 = vadd.f32 %v3499_v42, %v6962_v21  ;;  %v3788_v9 = vmax.f32 %v3498_v34, 0.0 }
 0x44c   : > { %v3501_v15 = vpop.f32.mrf.mxu0  ;;  %v3763_v6 = vmax.f32 %v3434_v5, 0.0 }
 0x44d   : > { %v3502_v28 = vadd.f32 %v3501_v15, %v6959_v55  ;;  %v4039_v59 = vpack.c.bf16 %v3867_v48, %v3853_v30  ;;  %4624 = vmatpush1.bf16.msra.mxu1 %v5852_v18  ;;  %v3789_v29 = vmax.f32 %v3500_v61, 0.0  ;;  %v3874_v22 = vmax.f32 %v7925_v14, %v3788_v9 }
 0x44e   : > { %v3503_v53 = vpop.f32.mrf.mxu0  ;;  %4625 = vmatprep.subr.bf16.mxu1 %v5857_v47  ;;  %v5861_v47 = vld [vmem:[%s8363_s9 + $0x30] ss:$8 sps:$4 sm:$0xff]   ;;  %v3922_v33 = vmax.f32 %v7826_v51, %v3763_v6  ;;  %v3444_v15 = vadd.f32 %v7956_v0, %v6962_v21  ;;  %v5869_v51 = vld [vmem:[%s8363_s9 + $0x14] ss:$8 sps:$4 sm:$0xff]  }
 0x44f   : > { %v3790_v41 = vmax.f32 %v3502_v28, 0.0  ;;  %v3504_v7 = vadd.f32 %v3503_v53, %v6962_v21  ;;  %4298 = vmatprep.mubr.bf16.mxu1 %v4039_v59  ;;  %v3881_v11 = vmax.f32 %v7931_v52, %v3789_v29  ;;  %v5866_v52 = vld [vmem:[%s8363_s9 + $0x24] ss:$8 sps:$4 sm:$0xff]  }
 0x450   : > { %v3507_v50 = vpop.f32.mrf.mxu0  ;;  %4299 = vmatmul.mubr.bf16.gmra.mxu1 %v4038_v1 }
 0x451   : > { %v3888_v12 = vmax.f32 %v7934_v32, %v3790_v41  ;;  %v3791_v37 = vmax.f32 %v3504_v7, 0.0  ;;  %v3508_v24 = vadd.f32 %v3507_v50, %v6959_v55  ;;  %4626 = vmatpush1.bf16.msra.mxu1 %v5855_v3  ;;  %v3767_v7 = vmax.f32 %v3444_v15, 0.0 }
 0x452   : > { %v3509_v63 = vpop.f32.mrf.mxu0  ;;  %4627 = vmatprep.subr.bf16.mxu1 %v5860_v8  ;;  %v5864_v8 = vld [vmem:[%s8363_s9 + $0x20] ss:$8 sps:$4 sm:$0xff]  }
 0x453   : > { %v4040_v23 = vpack.c.bf16 %v3888_v12, %v3874_v22  ;;  %v3895_v14 = vmax.f32 %v3894_v44, %v3791_v37  ;;  %v3510_v32 = vadd.f32 %v3509_v63, %v6962_v21  ;;  %v3792_v34 = vmax.f32 %v3508_v24, 0.0  ;;  %v5867_v12 = vld [vmem:[%s8363_s9 + $0x10] ss:$8 sps:$4 sm:$0xff]  }
 0x454   : > { %v3511_v27 = vpop.f32.mrf.mxu0 }
 0x455   : > { %v3512_v18 = vadd.f32 %v3511_v27, %v6959_v55  ;;  %v4041_v42 = vpack.c.bf16 %v3895_v14, %v3881_v11  ;;  %4628 = vmatpush1.bf16.msra.mxu1 %v5858_v36  ;;  %v3793_v1 = vmax.f32 %v3510_v32, 0.0  ;;  %v3902_v28 = vmax.f32 %v7939_v16, %v3792_v34  ;;  %v5870_v34 = vld [vmem:[%s8363_s9] ss:$8 sps:$4 sm:$0xff]  }
 0x456   : > { %v3513_v30 = vpop.f32.mrf.mxu0  ;;  %4629 = vmatprep.subr.bf16.mxu1 %v5863_v56  ;;  %v3950_v56 = vmax.f32 %v7842_v13, %v3767_v7  ;;  %v3454_v11 = vadd.f32 %v7970_v46, %v6962_v21  ;;  %v5875_v13 = vld [vmem:[%s8363_s9 + $0xf4] ss:$8 sps:$4 sm:$0xff]  }
 0x457   : > { %v3794_v48 = vmax.f32 %v3512_v18, 0.0  ;;  %v3514_v61 = vadd.f32 %v3513_v30, %v6962_v21  ;;  %4308 = vmatprep.mubr.bf16.mxu1 %v4041_v42  ;;  %v3909_v0 = vmax.f32 %v7945_v43, %v3793_v1  ;;  %v5872_v43 = vld [vmem:[%s8363_s9 + $0x4] ss:$8 sps:$4 sm:$0xff]  }
 0x458   : > { %v3517_v9 = vpop.f32.mrf.mxu0  ;;  %4309 = vmatmul.mubr.bf16.gmra.mxu1 %v4040_v23 }
 0x459   : > { %v3916_v59 = vmax.f32 %v7948_v19, %v3794_v48  ;;  %v3795_v3 = vmax.f32 %v3514_v61, 0.0  ;;  %v3518_v53 = vadd.f32 %v3517_v9, %v6959_v55  ;;  %4630 = vmatpush1.bf16.msra.mxu1 %v5861_v47  ;;  %v3771_v47 = vmax.f32 %v3454_v11, 0.0  ;;  %v5873_v61 = vld [vmem:[%s8363_s9 + $0xf0] ss:$8 sps:$4 sm:$0xff]  }
 0x45a   : > { %v3519_v29 = vpop.f32.mrf.mxu0  ;;  %4631 = vmatprep.subr.bf16.mxu1 %v5866_v52 }
 0x45b   : > { %v4042_v41 = vpack.c.bf16 %v3916_v59, %v3902_v28  ;;  %v3923_v16 = vmax.f32 %v3922_v33, %v3795_v3  ;;  %v3520_v19 = vadd.f32 %v3519_v29, %v6962_v21  ;;  %v3796_v5 = vmax.f32 %v3518_v53, 0.0 }
 0x45c   : > { %v3521_v44 = vpop.f32.mrf.mxu0  ;;  %v3978_v59 = vmax.f32 %v7858_v38, %v3771_v47  ;;  %v3464_v3 = vadd.f32 %v7984_v26, %v6962_v21  ;;  %v5881_v38 = vld [vmem:[%s8363_s9 + $0xd4] ss:$8 sps:$4 sm:$0xff]   ;;  %v5885_v47 = vld [vmem:[%s8363_s9 + $0xb0] ss:$8 sps:$4 sm:$0xff]  }
 0x45d   : > { %v3522_v50 = vadd.f32 %v3521_v44, %v6959_v55  ;;  %v4043_v22 = vpack.c.bf16 %v3923_v16, %v3909_v0  ;;  %4632 = vmatpush1.bf16.msra.mxu1 %v5864_v8  ;;  %v3797_v24 = vmax.f32 %v3520_v19, 0.0  ;;  %v3930_v14 = vmax.f32 %v7953_v10, %v3796_v5 }
 0x45e   : > { %v3523_v37 = vpop.f32.mrf.mxu0  ;;  %4633 = vmatprep.subr.bf16.mxu1 %v5869_v51  ;;  %v3775_v7 = vmax.f32 %v3464_v3, 0.0  ;;  %v4084_v3 = vld [vmem:[%s8362_s8] sm:$0x3] }
 0x45f   : > { %v3798_v36 = vmax.f32 %v3522_v50, 0.0  ;;  %v3524_v63 = vadd.f32 %v3523_v37, %v6962_v21  ;;  %4318 = vmatprep.mubr.bf16.mxu1 %v4043_v22  ;;  %v3937_v46 = vmax.f32 %v7959_v40, %v3797_v24  ;;  %v5878_v40 = vld [vmem:[%s8363_s9 + $0xe4] ss:$8 sps:$4 sm:$0xff]  }
 0x460   : > { %v3527_v23 = vpop.f32.mrf.mxu0  ;;  %4319 = vmatmul.mubr.bf16.gmra.mxu1 %v4042_v41  ;;  %v5876_v41 = vld [vmem:[%s8363_s9 + $0xe0] ss:$8 sps:$4 sm:$0xff]  }
 0x461   : > { %v3944_v32 = vmax.f32 %v7962_v54, %v3798_v36  ;;  %v3799_v6 = vmax.f32 %v3524_v63, 0.0  ;;  %v3528_v27 = vadd.f32 %v3527_v23, %v6959_v55  ;;  %4634 = vmatpush1.bf16.msra.mxu1 %v5867_v12  ;;  %v5879_v12 = vld [vmem:[%s8363_s9 + $0xd0] ss:$8 sps:$4 sm:$0xff]   ;;  %v4006_v63 = vmax.f32 %v7874_v17, %v3775_v7  ;;  %v5887_v17 = vld [vmem:[%s8363_s9 + $0xb4] ss:$8 sps:$4 sm:$0xff]  }
 0x462   : > { %v3529_v18 = vpop.f32.mrf.mxu0  ;;  %4635 = vmatprep.subr.bf16.mxu1 %v5872_v43 }
 0x463   : > { %v4044_v42 = vpack.c.bf16 %v3944_v32, %v3930_v14  ;;  %v3951_v10 = vmax.f32 %v3950_v56, %v3799_v6  ;;  %v3530_v54 = vadd.f32 %v3529_v18, %v6962_v21  ;;  %v3800_v52 = vmax.f32 %v3528_v27, 0.0  ;;  %v5882_v27 = vld [vmem:[%s8363_s9 + $0xc0] ss:$8 sps:$4 sm:$0xff]  }
 0x464   : > { %v3531_v30 = vpop.f32.mrf.mxu0  ;;  %v3474_v56 = vadd.f32 %v7998_v62, %v6962_v21 }
 0x465   : > { %v3532_v1 = vadd.f32 %v3531_v30, %v6959_v55  ;;  %v4045_v48 = vpack.c.bf16 %v3951_v10, %v3937_v46  ;;  %4636 = vmatpush1.bf16.msra.mxu1 %v5870_v34  ;;  %v3801_v15 = vmax.f32 %v3530_v54, 0.0  ;;  %v3958_v8 = vmax.f32 %v7967_v45, %v3800_v52 }
 0x466   : > { %v3533_v33 = vpop.f32.mrf.mxu0  ;;  %4637 = vmatprep.subr.bf16.mxu1 %v5875_v13  ;;  %v3779_v46 = vmax.f32 %v3474_v56, 0.0 }
 0x467   : > { %v3802_v9 = vmax.f32 %v3532_v1, 0.0  ;;  %v3534_v28 = vadd.f32 %v3533_v33, %v6962_v21  ;;  %4328 = vmatprep.mubr.bf16.mxu1 %v4045_v48  ;;  %v3965_v26 = vmax.f32 %v7973_v35, %v3801_v15  ;;  %v5884_v35 = vld [vmem:[%s8363_s9 + $0xc4] ss:$8 sps:$4 sm:$0xff]  }
 0x468   : > { %v3537_v53 = vpop.f32.mrf.mxu0  ;;  %4329 = vmatmul.mubr.bf16.gmra.mxu1 %v4044_v42  ;;  %v4034_v48 = vmax.f32 %v7890_v20, %v3779_v46  ;;  %v5888_v20 = vld [vmem:[%s8363_s9 + $0xa0] ss:$8 sps:$4 sm:$0xff]  }
 0x469   : > { %v3972_v29 = vmax.f32 %v7976_v25, %v3802_v9  ;;  %v3803_v51 = vmax.f32 %v3534_v28, 0.0  ;;  %v3538_v0 = vadd.f32 %v3537_v53, %v6959_v55  ;;  %4638 = vmatpush2.bf16.msra.mxu1 %v5873_v61 }
 0x46a   : > { %v3539_v16 = vpop.f32.mrf.mxu0  ;;  %4639 = vmatprep.subr.bf16.mxu1 %v5878_v40 }
 0x46b   : > { %v4046_v19 = vpack.c.bf16 %v3972_v29, %v3958_v8  ;;  %v3979_v45 = vmax.f32 %v3978_v59, %v3803_v51  ;;  %v3540_v25 = vadd.f32 %v3539_v16, %v6962_v21  ;;  %v3804_v5 = vmax.f32 %v3538_v0, 0.0  ;;  %v5894_v59 = vld [vmem:[%s8363_s9 + $0x80] ss:$8 sps:$4 sm:$0xff]  }
 0x46c   : > { %v3541_v44 = vpop.f32.mrf.mxu0  ;;  %v8183_v8 = vrot.slane %v4084_v3, %v6951_v31  ;;  %v8186_v29 = vrot.slane %v4084_v3, %v6945_v58 }
 0x46d   : > { %v3542_v50 = vadd.f32 %v3541_v44, %v6959_v55  ;;  %v4047_v22 = vpack.c.bf16 %v3979_v45, %v3965_v26  ;;  %4640 = vmatpush2.bf16.msra.mxu1 %v5876_v41  ;;  %v3805_v43 = vmax.f32 %v3540_v25, 0.0  ;;  %v3986_v23 = vmax.f32 %v7981_v57, %v3804_v5 }
 0x46e   : > { %v3543_v37 = vpop.f32.mrf.mxu0  ;;  %4641 = vmatprep.subr.bf16.mxu1 %v5881_v38 }
 0x46f   : > { %v3806_v24 = vmax.f32 %v3542_v50, 0.0  ;;  %v3544_v36 = vadd.f32 %v3543_v37, %v6962_v21  ;;  %4338 = vmatprep.mubr.bf16.mxu1 %v4047_v22  ;;  %v3993_v62 = vmax.f32 %v7987_v2, %v3805_v43 }
 0x470   : > { %v3547_v11 = vpop.f32.mrf.mxu0  ;;  %4339 = vmatmul.mubr.bf16.gmra.mxu1 %v4046_v19 }
 0x471   : > { %v4000_v14 = vmax.f32 %v7990_v49, %v3806_v24  ;;  %v3807_v32 = vmax.f32 %v3544_v36, 0.0  ;;  %v3548_v6 = vadd.f32 %v3547_v11, %v6959_v55  ;;  %4642 = vmatpush2.bf16.msra.mxu1 %v5879_v12 }
 0x472   : > { %v3549_v34 = vpop.f32.mrf.mxu0  ;;  %4643 = vmatprep.subr.bf16.mxu1 %v5884_v35 }
 0x473   : > { %v4048_v18 = vpack.c.bf16 %v4000_v14, %v3986_v23  ;;  %v4007_v57 = vmax.f32 %v4006_v63, %v3807_v32  ;;  %v3550_v49 = vadd.f32 %v3549_v34, %v6962_v21  ;;  %v3808_v42 = vmax.f32 %v3548_v6, 0.0 }
 0x474   : > { %v3551_v13 = vpop.f32.mrf.mxu0 }
 0x475   : > { %v3552_v10 = vadd.f32 %v3551_v13, %v6959_v55  ;;  %v4049_v54 = vpack.c.bf16 %v4007_v57, %v3993_v62  ;;  %4644 = vmatpush2.bf16.msra.mxu1 %v5882_v27  ;;  %v3809_v52 = vmax.f32 %v3550_v49, 0.0  ;;  %v4014_v61 = vmax.f32 %v7995_v60, %v3808_v42  ;;  %v5893_v60 = vld [vmem:[%s8363_s9 + $0x94] ss:$8 sps:$4 sm:$0xff]  }
 0x476   : > { %v3553_v30 = vpop.f32.mrf.mxu0  ;;  %4645 = vmatprep.subr.bf16.mxu1 %v5887_v17 }
 0x477   : > { %v3810_v1 = vmax.f32 %v3552_v10, 0.0  ;;  %v3554_v2 = vadd.f32 %v3553_v30, %v6962_v21  ;;  %4348 = vmatprep.mubr.bf16.mxu1 %v4049_v54  ;;  %v4021_v40 = vmax.f32 %v8001_v4, %v3809_v52  ;;  %v5890_v21 = vld [vmem:[%s8363_s9 + $0xa4] ss:$8 sps:$4 sm:$0xff]   ;;  %v5891_v4 = vld [vmem:[%s8363_s9 + $0x90] ss:$8 sps:$4 sm:$0xff]  }
 0x478   : > { %4349 = vmatmul.mubr.bf16.gmra.mxu1 %v4048_v18 }
 0x479   : > { %v4028_v55 = vmax.f32 %v8006_v39, %v3810_v1  ;;  %v3811_v33 = vmax.f32 %v3554_v2, 0.0  ;;  %4646 = vmatpush2.bf16.msra.mxu1 %v5885_v47  ;;  %v5896_v39 = vld [vmem:[%s8363_s9 + $0x84] ss:$8 sps:$4 sm:$0xff]  }
 0x47a   : > { %4647 = vmatprep.subr.bf16.mxu1 %v5890_v21 }
 0x47b   : > { %v4050_v15 = vpack.c.bf16 %v4028_v55, %v4014_v61  ;;  %v4035_v9 = vmax.f32 %v4034_v48, %v3811_v33 }
 0x47d   : > { %v4051_v28 = vpack.c.bf16 %v4035_v9, %v4021_v40  ;;  %4648 = vmatpush2.bf16.msra.mxu1 %v5888_v20 }
 0x47e   : > { %4649 = vmatprep.subr.bf16.mxu1 %v5893_v60 }
 0x47f   : > { %4358 = vmatprep.mubr.bf16.mxu1 %v4051_v28 }
 0x480   : > { %4359 = vmatmul.mubr.bf16.gmra.mxu1 %v4050_v15 }
 0x481   : > { %4650 = vmatpush2.bf16.msra.mxu1 %v5891_v4 }
 0x482   : > { %4651 = vmatprep.subr.bf16.mxu1 %v5896_v39 }
 0x485   : > { %4652 = vmatpush2.bf16.msra.mxu1 %v5894_v59 }
 0x508   : > { %v4290_v53 = vpop.f32.mrf.mxu1 }
 0x509   : > { %v4291_v38 = vadd.f32 %v4290_v53, %v8186_v29 }
 0x50a   : > { %v4292_v51 = vpop.f32.mrf.mxu1 }
 0x50b   : > { %v4293_v41 = vadd.f32 %v4292_v51, %v8183_v8  ;;  %v4369_v5 = vmax.f32 %v4291_v38, 0.0 }
 0x50c   : > { %v4294_v0 = vpop.f32.mrf.mxu1 }
 0x50d   : > { %v4295_v16 = vadd.f32 %v4294_v0, %v8186_v29  ;;  %v4370_v7 = vmax.f32 %v4293_v41, 0.0 }
 0x50e   : > { %v4296_v26 = vpop.f32.mrf.mxu1 }
 0x50f   : > { %v4297_v19 = vadd.f32 %v4296_v26, %v8183_v8  ;;  %v4371_v45 = vmax.f32 %v4295_v16, 0.0 }
 0x510   : > { %v4300_v25 = vpop.f32.mrf.mxu1 }
 0x511   : > { %v4372_v44 = vmax.f32 %v4297_v19, 0.0  ;;  %v4401_v12 = vpack.c.bf16 %v4371_v45, %v4369_v5  ;;  %v4301_v24 = vadd.f32 %v4300_v25, %v8186_v29 }
 0x512   : > { %v4302_v50 = vpop.f32.mrf.mxu1 }
 0x513   : > { %v4402_v22 = vpack.c.bf16 %v4372_v44, %v4370_v7  ;;  %v4303_v35 = vadd.f32 %v4302_v50, %v8183_v8  ;;  %v4373_v32 = vmax.f32 %v4301_v24, 0.0 }
 0x514   : > { %v4304_v37 = vpop.f32.mrf.mxu1 }
 0x515   : > { %v4305_v43 = vadd.f32 %v4304_v37, %v8186_v29  ;;  %4653 = vmatprep.mubr.bf16.mxu1 %v4402_v22  ;;  %v4374_v23 = vmax.f32 %v4303_v35, 0.0 }
 0x516   : > { %v4306_v36 = vpop.f32.mrf.mxu1  ;;  %4654 = vmatmul.mubr.bf16.vlgmr.msra.gmra.mxu1 %v4401_v12 }
 0x517   : > { %v4307_v63 = vadd.f32 %v4306_v36, %v8183_v8  ;;  %v4375_v56 = vmax.f32 %v4305_v43, 0.0 }
 0x518   : > { %v4310_v11 = vpop.f32.mrf.mxu1 }
 0x519   : > { %v4376_v14 = vmax.f32 %v4307_v63, 0.0  ;;  %v4403_v34 = vpack.c.bf16 %v4375_v56, %v4373_v32  ;;  %v4311_v57 = vadd.f32 %v4310_v11, %v8186_v29 }
 0x51a   : > { %v4312_v6 = vpop.f32.mrf.mxu1 }
 0x51b   : > { %v4404_v27 = vpack.c.bf16 %v4376_v14, %v4374_v23  ;;  %v4313_v62 = vadd.f32 %v4312_v6, %v8183_v8  ;;  %v4377_v47 = vmax.f32 %v4311_v57, 0.0 }
 0x51c   : > { %v4314_v17 = vpop.f32.mrf.mxu1 }
 0x51d   : > { %v4315_v18 = vadd.f32 %v4314_v17, %v8186_v29  ;;  %4663 = vmatprep.mubr.bf16.mxu1 %v4404_v27  ;;  %v4378_v10 = vmax.f32 %v4313_v62, 0.0 }
 0x51e   : > { %v4316_v49 = vpop.f32.mrf.mxu1  ;;  %4664 = vmatmul.mubr.bf16.gmra.mxu1 %v4403_v34 }
 0x51f   : > { %v4317_v13 = vadd.f32 %v4316_v49, %v8183_v8  ;;  %v4379_v46 = vmax.f32 %v4315_v18, 0.0 }
 0x520   : > { %v4320_v42 = vpop.f32.mrf.mxu1 }
 0x521   : > { %v4380_v54 = vmax.f32 %v4317_v13, 0.0  ;;  %v4405_v1 = vpack.c.bf16 %v4379_v46, %v4377_v47  ;;  %v4321_v55 = vadd.f32 %v4320_v42, %v8186_v29 }
 0x522   : > { %v4322_v30 = vpop.f32.mrf.mxu1 }
 0x523   : > { %v4406_v52 = vpack.c.bf16 %v4380_v54, %v4378_v10  ;;  %v4323_v48 = vadd.f32 %v4322_v30, %v8183_v8  ;;  %v4381_v20 = vmax.f32 %v4321_v55, 0.0 }
 0x524   : > { %v4324_v2 = vpop.f32.mrf.mxu1 }
 0x525   : > { %v4325_v61 = vadd.f32 %v4324_v2, %v8186_v29  ;;  %4673 = vmatprep.mubr.bf16.mxu1 %v4406_v52  ;;  %v4382_v28 = vmax.f32 %v4323_v48, 0.0 }
 0x526   : > { %v4326_v33 = vpop.f32.mrf.mxu1  ;;  %4674 = vmatmul.mubr.bf16.gmra.mxu1 %v4405_v1 }
 0x527   : > { %v4327_v40 = vadd.f32 %v4326_v33, %v8183_v8  ;;  %v4383_v15 = vmax.f32 %v4325_v61, 0.0 }
 0x528   : > { %v4330_v9 = vpop.f32.mrf.mxu1 }
 0x529   : > { %v4384_v21 = vmax.f32 %v4327_v40, 0.0  ;;  %v4407_v39 = vpack.c.bf16 %v4383_v15, %v4381_v20  ;;  %v4331_v51 = vadd.f32 %v4330_v9, %v8186_v29 }
 0x52a   : > { %v4332_v60 = vpop.f32.mrf.mxu1 }
 0x52b   : > { %v4408_v4 = vpack.c.bf16 %v4384_v21, %v4382_v28  ;;  %v4333_v3 = vadd.f32 %v4332_v60, %v8183_v8  ;;  %v4385_v45 = vmax.f32 %v4331_v51, 0.0  ;;  %v4449_v28 = vld [vmem:[%s8364_s10] sm:$0x3] }
 0x52c   : > { %v4334_v59 = vpop.f32.mrf.mxu1  ;;  %v8224_v21 = vrot.slane %v4449_v28, %v6945_v58 }
 0x52d   : > { %v4335_v53 = vadd.f32 %v4334_v59, %v8186_v29  ;;  %4683 = vmatprep.mubr.bf16.mxu1 %v4408_v4  ;;  %v4386_v26 = vmax.f32 %v4333_v3, 0.0 }
 0x52e   : > { %v4336_v0 = vpop.f32.mrf.mxu1  ;;  %4684 = vmatmul.mubr.bf16.gmra.mxu1 %v4407_v39 }
 0x52f   : > { %v4337_v41 = vadd.f32 %v4336_v0, %v8183_v8  ;;  %v4387_v16 = vmax.f32 %v4335_v53, 0.0 }
 0x530   : > { %v4340_v38 = vpop.f32.mrf.mxu1 }
 0x531   : > { %v4388_v19 = vmax.f32 %v4337_v41, 0.0  ;;  %v4409_v44 = vpack.c.bf16 %v4387_v16, %v4385_v45  ;;  %v4341_v12 = vadd.f32 %v4340_v38, %v8186_v29 }
 0x532   : > { %v4342_v25 = vpop.f32.mrf.mxu1 }
 0x533   : > { %v4410_v7 = vpack.c.bf16 %v4388_v19, %v4386_v26  ;;  %v4343_v50 = vadd.f32 %v4342_v25, %v8183_v8  ;;  %v4389_v56 = vmax.f32 %v4341_v12, 0.0 }
 0x534   : > { %v4344_v5 = vpop.f32.mrf.mxu1 }
 0x535   : > { %v4345_v22 = vadd.f32 %v4344_v5, %v8186_v29  ;;  %4693 = vmatprep.mubr.bf16.mxu1 %v4410_v7  ;;  %v4390_v36 = vmax.f32 %v4343_v50, 0.0 }
 0x536   : > { %v4346_v37 = vpop.f32.mrf.mxu1  ;;  %4694 = vmatmul.mubr.bf16.gmra.mxu1 %v4409_v44 }
 0x537   : > { %v4347_v35 = vadd.f32 %v4346_v37, %v8183_v8  ;;  %v4391_v43 = vmax.f32 %v4345_v22, 0.0 }
 0x538   : > { %v4350_v24 = vpop.f32.mrf.mxu1 }
 0x539   : > { %v4392_v63 = vmax.f32 %v4347_v35, 0.0  ;;  %v4411_v14 = vpack.c.bf16 %v4391_v43, %v4389_v56  ;;  %v4351_v34 = vadd.f32 %v4350_v24, %v8186_v29 }
 0x53a   : > { %v4352_v11 = vpop.f32.mrf.mxu1 }
 0x53b   : > { %v4412_v23 = vpack.c.bf16 %v4392_v63, %v4390_v36  ;;  %v4353_v6 = vadd.f32 %v4352_v11, %v8183_v8  ;;  %v4393_v46 = vmax.f32 %v4351_v34, 0.0 }
 0x53c   : > { %v4354_v32 = vpop.f32.mrf.mxu1 }
 0x53d   : > { %v4355_v27 = vadd.f32 %v4354_v32, %v8186_v29  ;;  %4703 = vmatprep.mubr.bf16.mxu1 %v4412_v23  ;;  %v4394_v49 = vmax.f32 %v4353_v6, 0.0 }
 0x53e   : > { %v4356_v17 = vpop.f32.mrf.mxu1  ;;  %4704 = vmatmul.mubr.bf16.gmra.mxu1 %v4411_v14 }
 0x53f   : > { %v4357_v62 = vadd.f32 %v4356_v17, %v8183_v8  ;;  %v4395_v18 = vmax.f32 %v4355_v27, 0.0 }
 0x540   : > { %v4360_v57 = vpop.f32.mrf.mxu1 }
 0x541   : > { %v4396_v13 = vmax.f32 %v4357_v62, 0.0  ;;  %v4413_v54 = vpack.c.bf16 %v4395_v18, %v4393_v46  ;;  %v4361_v1 = vadd.f32 %v4360_v57, %v8186_v29 }
 0x542   : > { %v4362_v42 = vpop.f32.mrf.mxu1 }
 0x543   : > { %v4414_v10 = vpack.c.bf16 %v4396_v13, %v4394_v49  ;;  %v4363_v30 = vadd.f32 %v4362_v42, %v8183_v8  ;;  %v4397_v40 = vmax.f32 %v4361_v1, 0.0 }
 0x544   : > { %v4364_v47 = vpop.f32.mrf.mxu1 }
 0x545   : > { %v4365_v52 = vadd.f32 %v4364_v47, %v8186_v29  ;;  %4713 = vmatprep.mubr.bf16.mxu1 %v4414_v10  ;;  %v4398_v55 = vmax.f32 %v4363_v30, 0.0  ;;  %v8227_v29 = vrot.slane %v4449_v28, %v6951_v31 }
 0x546   : > { %v4366_v2 = vpop.f32.mrf.mxu1  ;;  %4714 = vmatmul.mubr.bf16.gmra.mxu1 %v4413_v54 }
 0x547   : > { %v4367_v48 = vadd.f32 %v4366_v2, %v8183_v8  ;;  %v4399_v61 = vmax.f32 %v4365_v52, 0.0 }
 0x549   : > { %v4400_v33 = vmax.f32 %v4367_v48, 0.0  ;;  %v4415_v9 = vpack.c.bf16 %v4399_v61, %v4397_v40 }
 0x54b   : > { %v4416_v15 = vpack.c.bf16 %v4400_v33, %v4398_v55 }
 0x54d   : > { %4723 = vmatprep.mubr.bf16.mxu1 %v4416_v15 }
 0x54e   : > { %4724 = vmatmul.mubr.bf16.gmra.mxu1 %v4415_v9 }
 0x5d6   : > { %v4655_v20 = vpop.f32.mrf.mxu1 }
 0x5d7   : > { %v4656_v8 = vadd.f32 %v4655_v20, %v8224_v21 }
 0x5d8   : > { %v4657_v60 = vpop.f32.mrf.mxu1 }
 0x5d9   : > { %v4734_v4 = vmax.f32 %v4656_v8, 0.0  ;;  %v4658_v39 = vadd.f32 %v4657_v60, %v8227_v29 }
 0x5da   : > { %v4659_v59 = vpop.f32.mrf.mxu1 }
 0x5db   : > { %v4660_v3 = vadd.f32 %v4659_v59, %v8224_v21  ;;  %4766 = vxpose.xlu0.b32.start [1/16] %v4734_v4, 128  ;;  %v4735_v53 = vmax.f32 %v4658_v39, 0.0 }
 0x5dc   : > { %v4661_v51 = vpop.f32.mrf.mxu1 }
 0x5dd   : > { %v4736_v0 = vmax.f32 %v4660_v3, 0.0  ;;  %v4662_v58 = vadd.f32 %v4661_v51, %v8227_v29  ;;  %4798 = vxpose.xlu1.b32.start [1/16] %v4735_v53, 128 }
 0x5de   : > { %v4665_v41 = vpop.f32.mrf.mxu1 }
 0x5df   : > { %v4737_v31 = vmax.f32 %v4662_v58, 0.0  ;;  %v4666_v16 = vadd.f32 %v4665_v41, %v8224_v21  ;;  %4767 = vxpose.xlu0.b32.cont [2/16] %v4736_v0, 128 }
 0x5e0   : > { %v4667_v38 = vpop.f32.mrf.mxu1 }
 0x5e1   : > { %v4738_v26 = vmax.f32 %v4666_v16, 0.0  ;;  %v4668_v19 = vadd.f32 %v4667_v38, %v8227_v29  ;;  %4799 = vxpose.xlu1.b32.cont [2/16] %v4737_v31, 128 }
 0x5e2   : > { %v4669_v45 = vpop.f32.mrf.mxu1 }
 0x5e3   : > { %v4739_v25 = vmax.f32 %v4668_v19, 0.0  ;;  %v4670_v7 = vadd.f32 %v4669_v45, %v8224_v21  ;;  %4768 = vxpose.xlu0.b32.cont [3/16] %v4738_v26, 128 }
 0x5e4   : > { %v4671_v44 = vpop.f32.mrf.mxu1 }
 0x5e5   : > { %v4740_v5 = vmax.f32 %v4670_v7, 0.0  ;;  %v4672_v50 = vadd.f32 %v4671_v44, %v8227_v29  ;;  %4800 = vxpose.xlu1.b32.cont [3/16] %v4739_v25, 128 }
 0x5e6   : > { %v4675_v22 = vpop.f32.mrf.mxu1 }
 0x5e7   : > { %v4741_v12 = vmax.f32 %v4672_v50, 0.0  ;;  %v4676_v37 = vadd.f32 %v4675_v22, %v8224_v21  ;;  %4769 = vxpose.xlu0.b32.cont [4/16] %v4740_v5, 128 }
 0x5e8   : > { %v4677_v35 = vpop.f32.mrf.mxu1 }
 0x5e9   : > { %v4742_v43 = vmax.f32 %v4676_v37, 0.0  ;;  %v4678_v24 = vadd.f32 %v4677_v35, %v8227_v29  ;;  %4801 = vxpose.xlu1.b32.cont [4/16] %v4741_v12, 128 }
 0x5ea   : > { %v4679_v36 = vpop.f32.mrf.mxu1 }
 0x5eb   : > { %v4743_v63 = vmax.f32 %v4678_v24, 0.0  ;;  %v4680_v56 = vadd.f32 %v4679_v36, %v8224_v21  ;;  %4770 = vxpose.xlu0.b32.cont [5/16] %v4742_v43, 128 }
 0x5ec   : > { %v4681_v11 = vpop.f32.mrf.mxu1 }
 0x5ed   : > { %v4744_v23 = vmax.f32 %v4680_v56, 0.0  ;;  %v4682_v14 = vadd.f32 %v4681_v11, %v8227_v29  ;;  %4802 = vxpose.xlu1.b32.cont [5/16] %v4743_v63, 128 }
 0x5ee   : > { %v4685_v32 = vpop.f32.mrf.mxu1 }
 0x5ef   : > { %v4745_v6 = vmax.f32 %v4682_v14, 0.0  ;;  %v4686_v27 = vadd.f32 %v4685_v32, %v8224_v21  ;;  %4771 = vxpose.xlu0.b32.cont [6/16] %v4744_v23, 128 }
 0x5f0   : > { %v4687_v34 = vpop.f32.mrf.mxu1 }
 0x5f1   : > { %v4746_v17 = vmax.f32 %v4686_v27, 0.0  ;;  %v4688_v62 = vadd.f32 %v4687_v34, %v8227_v29  ;;  %4803 = vxpose.xlu1.b32.cont [6/16] %v4745_v6, 128 }
 0x5f2   : > { %v4689_v18 = vpop.f32.mrf.mxu1 }
 0x5f3   : > { %v4747_v57 = vmax.f32 %v4688_v62, 0.0  ;;  %v4690_v49 = vadd.f32 %v4689_v18, %v8224_v21  ;;  %4772 = vxpose.xlu0.b32.cont [7/16] %v4746_v17, 128 }
 0x5f4   : > { %v4691_v13 = vpop.f32.mrf.mxu1 }
 0x5f5   : > { %v4748_v46 = vmax.f32 %v4690_v49, 0.0  ;;  %v4692_v42 = vadd.f32 %v4691_v13, %v8227_v29  ;;  %4804 = vxpose.xlu1.b32.cont [7/16] %v4747_v57, 128 }
 0x5f6   : > { %v4695_v10 = vpop.f32.mrf.mxu1 }
 0x5f7   : > { %v4749_v54 = vmax.f32 %v4692_v42, 0.0  ;;  %v4696_v47 = vadd.f32 %v4695_v10, %v8224_v21  ;;  %4773 = vxpose.xlu0.b32.cont [8/16] %v4748_v46, 128 }
 0x5f8   : > { %v4697_v30 = vpop.f32.mrf.mxu1 }
 0x5f9   : > { %v4750_v52 = vmax.f32 %v4696_v47, 0.0  ;;  %v4698_v1 = vadd.f32 %v4697_v30, %v8227_v29  ;;  %4805 = vxpose.xlu1.b32.cont [8/16] %v4749_v54, 128 }
 0x5fa   : > { %v4699_v2 = vpop.f32.mrf.mxu1 }
 0x5fb   : > { %v4751_v48 = vmax.f32 %v4698_v1, 0.0  ;;  %v4700_v61 = vadd.f32 %v4699_v2, %v8224_v21  ;;  %4774 = vxpose.xlu0.b32.cont [9/16] %v4750_v52, 128 }
 0x5fc   : > { %v4701_v55 = vpop.f32.mrf.mxu1 }
 0x5fd   : > { %v4752_v33 = vmax.f32 %v4700_v61, 0.0  ;;  %v4702_v40 = vadd.f32 %v4701_v55, %v8227_v29  ;;  %4806 = vxpose.xlu1.b32.cont [9/16] %v4751_v48, 128 }
 0x5fe   : > { %v4705_v15 = vpop.f32.mrf.mxu1 }
 0x5ff   : > { %v4753_v9 = vmax.f32 %v4702_v40, 0.0  ;;  %v4706_v28 = vadd.f32 %v4705_v15, %v8224_v21  ;;  %4775 = vxpose.xlu0.b32.cont [10/16] %v4752_v33, 128 }
 0x600   : > { %v4707_v20 = vpop.f32.mrf.mxu1 }
 0x601   : > { %v4754_v8 = vmax.f32 %v4706_v28, 0.0  ;;  %v4708_v60 = vadd.f32 %v4707_v20, %v8227_v29  ;;  %4807 = vxpose.xlu1.b32.cont [10/16] %v4753_v9, 128 }
 0x602   : > { %v4709_v4 = vpop.f32.mrf.mxu1 }
 0x603   : > { %v4755_v39 = vmax.f32 %v4708_v60, 0.0  ;;  %v4710_v59 = vadd.f32 %v4709_v4, %v8224_v21  ;;  %4776 = vxpose.xlu0.b32.cont [11/16] %v4754_v8, 128 }
 0x604   : > { %v4711_v3 = vpop.f32.mrf.mxu1 }
 0x605   : > { %v4756_v53 = vmax.f32 %v4710_v59, 0.0  ;;  %v4712_v51 = vadd.f32 %v4711_v3, %v8227_v29  ;;  %4808 = vxpose.xlu1.b32.cont [11/16] %v4755_v39, 128 }
 0x606   : > { %v4715_v0 = vpop.f32.mrf.mxu1 }
 0x607   : > { %v4757_v58 = vmax.f32 %v4712_v51, 0.0  ;;  %v4716_v41 = vadd.f32 %v4715_v0, %v8224_v21  ;;  %4777 = vxpose.xlu0.b32.cont [12/16] %v4756_v53, 128 }
 0x608   : > { %v4717_v31 = vpop.f32.mrf.mxu1 }
 0x609   : > { %v4758_v16 = vmax.f32 %v4716_v41, 0.0  ;;  %v4718_v38 = vadd.f32 %v4717_v31, %v8227_v29  ;;  %4809 = vxpose.xlu1.b32.cont [12/16] %v4757_v58, 128 }
 0x60a   : > { %v4719_v26 = vpop.f32.mrf.mxu1 }
 0x60b   : > { %v4759_v19 = vmax.f32 %v4718_v38, 0.0  ;;  %v4720_v45 = vadd.f32 %v4719_v26, %v8224_v21  ;;  %4778 = vxpose.xlu0.b32.cont [13/16] %v4758_v16, 128 }
 0x60c   : > { %v4721_v25 = vpop.f32.mrf.mxu1 }
 0x60d   : > { %v4760_v7 = vmax.f32 %v4720_v45, 0.0  ;;  %v4722_v44 = vadd.f32 %v4721_v25, %v8227_v29  ;;  %4810 = vxpose.xlu1.b32.cont [13/16] %v4759_v19, 128 }
 0x60e   : > { %v4725_v5 = vpop.f32.mrf.mxu1 }
 0x60f   : > { %v4761_v50 = vmax.f32 %v4722_v44, 0.0  ;;  %v4726_v22 = vadd.f32 %v4725_v5, %v8224_v21  ;;  %4779 = vxpose.xlu0.b32.cont [14/16] %v4760_v7, 128 }
 0x610   : > { %v4727_v12 = vpop.f32.mrf.mxu1 }
 0x611   : > { %v4762_v37 = vmax.f32 %v4726_v22, 0.0  ;;  %v4728_v35 = vadd.f32 %v4727_v12, %v8227_v29  ;;  %4811 = vxpose.xlu1.b32.cont [14/16] %v4761_v50, 128 }
 0x612   : > { %v4729_v43 = vpop.f32.mrf.mxu1 }
 0x613   : > { %v4763_v24 = vmax.f32 %v4728_v35, 0.0  ;;  %v4730_v36 = vadd.f32 %v4729_v43, %v8224_v21  ;;  %4780 = vxpose.xlu0.b32.cont [15/16] %v4762_v37, 128 }
 0x614   : > { %v4731_v63 = vpop.f32.mrf.mxu1 }
 0x615   : > { %v4764_v56 = vmax.f32 %v4730_v36, 0.0  ;;  %v4732_v11 = vadd.f32 %v4731_v63, %v8227_v29  ;;  %4812 = vxpose.xlu1.b32.cont [15/16] %v4763_v24, 128 }
 0x617   : > { %v4765_v23 = vmax.f32 %v4732_v11, 0.0  ;;  %4781 = vxpose.xlu0.b32.end [16/16] %v4764_v56, 128 }
 0x619   : > { %4813 = vxpose.xlu1.b32.end [16/16] %v4765_v23, 128 }
 0x657   : > { %v4782_v14 = vpop.trf.xlu0 }
 0x658   : > { %4830 = vst [vmem:[%s8264_s14] sm:$0xff] %v4782_v14 }
 0x659   : > { %v4814_v21 = vpop.trf.xlu1 }
 0x65a   : > { %4846 = vst [vmem:[%s8264_s14 + $0x80] sm:$0xff] %v4814_v21 }
 0x65b   : > { %v4783_v29 = vpop.trf.xlu0 }
 0x65c   : > { %4831 = vst [vmem:[%s8264_s14 + $0x8] sm:$0xff] %v4783_v29 }
 0x65d   : > { %v4815_v32 = vpop.trf.xlu1 }
 0x65e   : > { %4847 = vst [vmem:[%s8264_s14 + $0x88] sm:$0xff] %v4815_v32 }
 0x65f   : > { %v4784_v6 = vpop.trf.xlu0 }
 0x660   : > { %4832 = vst [vmem:[%s8264_s14 + $0x10] sm:$0xff] %v4784_v6 }
 0x661   : > { %v4816_v27 = vpop.trf.xlu1 }
 0x662   : > { %4848 = vst [vmem:[%s8264_s14 + $0x90] sm:$0xff] %v4816_v27 }
 0x663   : > { %v4785_v34 = vpop.trf.xlu0 }
 0x664   : > { %4833 = vst [vmem:[%s8264_s14 + $0x18] sm:$0xff] %v4785_v34 }
 0x665   : > { %v4817_v17 = vpop.trf.xlu1 }
 0x666   : > { %4849 = vst [vmem:[%s8264_s14 + $0x98] sm:$0xff] %v4817_v17 }
 0x667   : > { %v4786_v62 = vpop.trf.xlu0 }
 0x668   : > { %4834 = vst [vmem:[%s8264_s14 + $0x20] sm:$0xff] %v4786_v62 }
 0x669   : > { %v4818_v18 = vpop.trf.xlu1 }
 0x66a   : > { %4850 = vst [vmem:[%s8264_s14 + $0xa0] sm:$0xff] %v4818_v18 }
 0x66b   : > { %v4787_v57 = vpop.trf.xlu0 }
 0x66c   : > { %4835 = vst [vmem:[%s8264_s14 + $0x28] sm:$0xff] %v4787_v57 }
 0x66d   : > { %v4819_v49 = vpop.trf.xlu1 }
 0x66e   : > { %4851 = vst [vmem:[%s8264_s14 + $0xa8] sm:$0xff] %v4819_v49 }
 0x66f   : > { %v4788_v13 = vpop.trf.xlu0 }
 0x670   : > { %4836 = vst [vmem:[%s8264_s14 + $0x30] sm:$0xff] %v4788_v13 }
 0x671   : > { %v4820_v46 = vpop.trf.xlu1 }
 0x672   : > { %4852 = vst [vmem:[%s8264_s14 + $0xb0] sm:$0xff] %v4820_v46 }
 0x673   : > { %v4789_v42 = vpop.trf.xlu0 }
 0x674   : > { %4837 = vst [vmem:[%s8264_s14 + $0x38] sm:$0xff] %v4789_v42 }
 0x675   : > { %v4821_v10 = vpop.trf.xlu1 }
 0x676   : > { %4853 = vst [vmem:[%s8264_s14 + $0xb8] sm:$0xff] %v4821_v10 }
 0x677   : > { %v4790_v54 = vpop.trf.xlu0 }
 0x678   : > { %4838 = vst [vmem:[%s8264_s14 + $0x40] sm:$0xff] %v4790_v54 }
 0x679   : > { %v4822_v47 = vpop.trf.xlu1 }
 0x67a   : > { %4854 = vst [vmem:[%s8264_s14 + $0xc0] sm:$0xff] %v4822_v47 }
 0x67b   : > { %v4791_v30 = vpop.trf.xlu0 }
 0x67c   : > { %4839 = vst [vmem:[%s8264_s14 + $0x48] sm:$0xff] %v4791_v30 }
 0x67d   : > { %v4823_v52 = vpop.trf.xlu1 }
 0x67e   : > { %4855 = vst [vmem:[%s8264_s14 + $0xc8] sm:$0xff] %v4823_v52 }
 0x67f   : > { %v4792_v1 = vpop.trf.xlu0 }
 0x680   : > { %4840 = vst [vmem:[%s8264_s14 + $0x50] sm:$0xff] %v4792_v1 }
 0x681   : > { %v4824_v2 = vpop.trf.xlu1 }
 0x682   : > { %4856 = vst [vmem:[%s8264_s14 + $0xd0] sm:$0xff] %v4824_v2 }
 0x683   : > { %v4793_v48 = vpop.trf.xlu0 }
 0x684   : > { %4841 = vst [vmem:[%s8264_s14 + $0x58] sm:$0xff] %v4793_v48 }
 0x685   : > { %v4825_v61 = vpop.trf.xlu1 }
 0x686   : > { %4857 = vst [vmem:[%s8264_s14 + $0xd8] sm:$0xff] %v4825_v61 }
 0x687   : > { %v4794_v55 = vpop.trf.xlu0 }
 0x688   : > { %4842 = vst [vmem:[%s8264_s14 + $0x60] sm:$0xff] %v4794_v55 }
 0x689   : > { %v4826_v33 = vpop.trf.xlu1 }
 0x68a   : > { %4858 = vst [vmem:[%s8264_s14 + $0xe0] sm:$0xff] %v4826_v33 }
 0x68b   : > { %v4795_v40 = vpop.trf.xlu0 }
 0x68c   : > { %4843 = vst [vmem:[%s8264_s14 + $0x68] sm:$0xff] %v4795_v40 }
 0x68d   : > { %v4827_v15 = vpop.trf.xlu1 }
 0x68e   : > { %4859 = vst [vmem:[%s8264_s14 + $0xe8] sm:$0xff] %v4827_v15 }
 0x68f   : > { %v4796_v9 = vpop.trf.xlu0 }
 0x690   : > { %4844 = vst [vmem:[%s8264_s14 + $0x70] sm:$0xff] %v4796_v9 }
 0x691   : > { %v4828_v28 = vpop.trf.xlu1 }
 0x692   : > { %4860 = vst [vmem:[%s8264_s14 + $0xf0] sm:$0xff] %v4828_v28 }
 0x693   : > { %v4797_v20 = vpop.trf.xlu0 }
 0x694   : > { %4845 = vst [vmem:[%s8264_s14 + $0x78] sm:$0xff] %v4797_v20 }
 0x695   : > { %v4829_v8 = vpop.trf.xlu1 }
 0x696   : > { %4861 = vst [vmem:[%s8264_s14 + $0xf8] sm:$0xff] %v4829_v8 }
 0x697   : > { %5913 = shalt.err (!%p5910_p5)
}
 0x698   : > { %s5914_s12 = scalar_lea.hbm %s8301_s26, 4096  ;;  %s5918_s24 = scalar_lea.hbm %s8365_s11, 8192 }
 0x699   : > { %p5915_p6 = scmp.ne.s32.totalorder %s8301_s26, %s5914_s12  ;;  %p5919_p10 = scmp.lt.s32.totalorder %s8301_s26, %s8365_s11 }
 0x69a   : > { %p5920_p11 = scmp.lt.s32.totalorder %s5918_s24, %s5914_s12 }
 0x69b   : > { %p5916_p7 = pnand %p5915_p6, %p6082_p4 }
 0x69c   : > { %p5921_p12 = por %p5920_p11, %p5919_p10 }
 0x69d   : > { %p5917_p9 = pneg %p5916_p7 }
 0x69f   : > { %p5922_p13 = pnand %p5921_p12, %p5917_p9 }
 0x6a1   : > { %5925 = shalt.err (!%p5922_p13)
}
 0x6a2   : > { %s5980_s20 = smov 128   ;;  %s5981_s13 = smov 8  }
 0x6a3   : > { %5651 = dma.vmem_to_hbm [thread:$0]  (%p6082_p4), %s8303_s16, 4096, %s8301_s26, %s8309_s0, %s5980_s20, %s5980_s20, %s5981_s13  }
 0x6a4 PF: > { %p5657_p0 = scmp.ge.s32.totalorder %s5976_s22, 2  ;;  %s4892_s15 = sand.u32 1, %s5956_s17  }
 0x6a5   : > { %s4893_s1 = scalar_lea.sflag [#allocation3], %s4892_s15 }
 0x6a6   : > { %p5654_p1 = pnand %p5657_p0, %p6089_p8 }
 0x6a8   : > { %p5655_p2 = pneg %p5654_p1 }
 0x6aa   : > { %5951 = dma.done.wait (%p5655_p2), %s4893_s1, 4096  }
 0x6ab   : > { %5953 = vsyncadd (%p5655_p2), %s4893_s1, 4294963200  ;;  %s24_s22 = sadd.s32 1, %s5976_s22   ;;  %s8372_s17 = smov %s5960_s18 }
 0x6ac   : > { %p21_p3 = scmp.ge.s32.totalorder %s24_s22, 4   ;;  %s8373_s18 = smov %s5964_s19 }
 0x6ad   : > { %s8374_s19 = smov %s6095_s30  ;;  %s8375_s20 = smov %s5972_s21 }
 0x6ae   : > { %s8376_s21 = smov %s8378_s25  ;;  %23 = sbr.rel (!%p21_p3) target bundleno = 7 (0x7), region = 99 }
 0x6b3   :  { %4898 = vsyncpa [#allocation3], 1 }
 0x6b4   :  { %4900 = vsyncpa [#allocation3 + $0x1], 1 }

</bundles_post_ra>
